<compile_context>
chip_gen: v5e
topology: v5e:2x2
jax: 0.10.0
libtpu: 0.0.40
codegen_flags: <defaults>
</compile_context>

<pallas_src>
import numpy as np
import jax
import jax.numpy as jnp
from jax import lax
from jax.experimental import pallas as pl
from jax.experimental.pallas import tpu as pltpu


PACK_ROWS = 8      # packed output sublane rows
LABEL_ROW = 4
SCORE_ROW = 5


# ---------------------------------------------------------------------------
# Fused post-top-k kernel
# ---------------------------------------------------------------------------
def _post_topk_kernel(vals_ref, idx_ref, lhs_ref, m8_ref, out_ref):
    # vals_ref : (bb, 1, Kp) f32   top-k raw logits (pad lanes arbitrary)
    # idx_ref  : (bb, 1, Kp) i32   top-k query indices (topk_indexes // C), pad = -1
    # lhs_ref  : (bb, 8, Qp) f32   rows = (cx, cy, w, h, label, 0, 0, 0) per query
    # m8_ref   : (bb, 8, 8)  f32   per-image transform: cxcywh->xyxy * image scale
    # out_ref  : (bb, 8, Kp) f32   rows = (x1, y1, x2, y2, label, score, 0, 0)
    bb = out_ref.shape[0]
    Kp = out_ref.shape[-1]
    Qp = lhs_ref.shape[-1]

    # Hoisted iotas (JAX does not CSE broadcast_in_dim inside the loop).
    q_iota = lax.broadcasted_iota(jnp.int32, (Qp, Kp), 0)
    row_iota = lax.broadcasted_iota(jnp.int32, (PACK_ROWS, Kp), 0)

    for i in range(bb):  # static, small per-image loop within the batch block
        # One-hot selection matrix: onehot[q, k] = (q == topk_boxes[k]).
        # Padded columns (idx = -1) and padded query rows contribute zeros.
        onehot = (q_iota == idx_ref[i]).astype(jnp.float32)            # (Qp, Kp)

        # Fused box + label gather: ONE MXU matmul over the shared one-hot.
        g = jnp.dot(lhs_ref[i], onehot,
                    preferred_element_type=jnp.float32,
                    precision=lax.Precision.HIGHEST)                   # (8, Kp)

        # cxcywh -> xyxy and per-image scale folded into a single (8, 8) matrix,
        # applied post-gather so the work runs over K lanes only.
        packed = jnp.dot(m8_ref[i], g,
                         preferred_element_type=jnp.float32,
                         precision=lax.Precision.HIGHEST)              # (8, Kp)

        # Sigmoid only on the K winners; drop them into the score row.
        scores = 1.0 / (1.0 + jnp.exp(-vals_ref[i]))                   # (1, Kp)
        packed = jnp.where(row_iota == SCORE_ROW,
                           jnp.broadcast_to(scores, (PACK_ROWS, Kp)),
                           packed)

        out_ref[i] = packed                       # one dense (8, Kp) store per image


# ---------------------------------------------------------------------------
# Wrapper reproducing OVPostProcess.forward
# ---------------------------------------------------------------------------
def _round_up(x, m):
    return ((x + m - 1) // m) * m


def ov_post_process(outputs, target_sizes, num_queries=100, num_top=300):
    out_logits = jnp.asarray(outputs["pred_logits"], jnp.float32)     # [B, Qt, C]
    out_bbox = jnp.asarray(outputs["pred_boxes"], jnp.float32)        # [B, Qt, 4]
    B, Qt, C = out_logits.shape
    assert len(out_logits) == len(target_sizes)
    assert target_sizes.shape[1] == 2

    select_id = outputs.get("select_id", list(range(C)))
    select_id = [int(c) for c in np.asarray(select_id).reshape(-1)]

    K = num_top
    Kp = _round_up(K, 128)            # 300 -> 384 : unmasked lane tiles
    Qp = _round_up(Qt, 128)           # 400 -> 512 : aligned one-hot / LHS lanes

    # ---- global top-k over the flattened (query, class) raw logits ----------
    # TODO(synk): the global top-k itself uses lax.top_k; a Pallas selection
    # network has no clean equivalent and would not be faster here.
    flat_logits = out_logits.reshape(B, Qt * C)
    topk_vals, topk_indexes = lax.top_k(flat_logits, K)               # [B, K]
    topk_boxes = (topk_indexes // C).astype(jnp.int32)                # [B, K]

    vals3 = jnp.pad(topk_vals, ((0, 0), (0, Kp - K))).reshape(B, 1, Kp)
    idx3 = jnp.pad(topk_boxes, ((0, 0), (0, Kp - K)),
                   constant_values=-1).reshape(B, 1, Kp)

    # ---- packed (8, Qp) LHS: rows = cx, cy, w, h, label, 0, 0, 0 ------------
    label_per_q = np.zeros((Qt,), dtype=np.float32)
    for ind, c in enumerate(select_id):
        lo = ind * num_queries
        if lo >= Qt:
            break
        label_per_q[lo:min((ind + 1) * num_queries, Qt)] = c
    label_row = jnp.broadcast_to(jnp.asarray(label_per_q)[None, None, :],
                                 (B, 1, Qt))

    bbox_t = jnp.swapaxes(out_bbox, 1, 2)                             # [B, 4, Qt]
    lhs = jnp.concatenate(
        [bbox_t, label_row, jnp.zeros((B, PACK_ROWS - 5, Qt), jnp.float32)],
        axis=1)                                                       # [B, 8, Qt]
    lhs = jnp.pad(lhs, ((0, 0), (0, 0), (0, Qp - Qt)))                # [B, 8, Qp]

    # ---- per-image 8x8 transform: (cxcywh -> xyxy) * image scale ------------
    affine = np.zeros((PACK_ROWS, PACK_ROWS), dtype=np.float32)
    affine[0, 0] = 1.0; affine[0, 2] = -0.5          # x1 = cx - 0.5 w
    affine[1, 1] = 1.0; affine[1, 3] = -0.5          # y1 = cy - 0.5 h
    affine[2, 0] = 1.0; affine[2, 2] = 0.5           # x2 = cx + 0.5 w
    affine[3, 1] = 1.0; affine[3, 3] = 0.5           # y2 = cy + 0.5 h
    affine[LABEL_ROW, LABEL_ROW] = 1.0               # label passthrough
    ts = jnp.asarray(target_sizes, jnp.float32)
    img_h, img_w = ts[:, 0], ts[:, 1]
    ones = jnp.ones_like(img_w)
    row_scale = jnp.stack([img_w, img_h, img_w, img_h, ones, ones, ones, ones],
                          axis=1)                                     # [B, 8]
    m8 = jnp.asarray(affine)[None, :, :] * row_scale[:, :, None]      # [B, 8, 8]

    # ---- batch blocking: several images per grid step, >= 2 parallel steps --
    bb = min(8, max(1, B // 2))
    nsteps = -(-B // bb)
    B_pad = nsteps * bb
    if B_pad != B:
        padb = (0, B_pad - B)
        vals3 = jnp.pad(vals3, (padb, (0, 0), (0, 0)))
        idx3 = jnp.pad(idx3, (padb, (0, 0), (0, 0)), constant_values=-1)
        lhs = jnp.pad(lhs, (padb, (0, 0), (0, 0)))
        m8 = jnp.pad(m8, (padb, (0, 0), (0, 0)))

    cost = pl.CostEstimate(
        flops=2 * B_pad * (PACK_ROWS * Qp * Kp + PACK_ROWS * PACK_ROWS * Kp),
        transcendentals=B_pad * Kp,
        bytes_accessed=4 * B_pad * (2 * Kp + PACK_ROWS * Qp
                                    + PACK_ROWS * PACK_ROWS + PACK_ROWS * Kp))

    packed = pl.pallas_call(
        _post_topk_kernel,
        out_shape=jax.ShapeDtypeStruct((B_pad, PACK_ROWS, Kp), jnp.float32),
        grid=(nsteps,),
        in_specs=[
            pl.BlockSpec((bb, 1, Kp), lambda g: (g, 0, 0)),           # top-k logits
            pl.BlockSpec((bb, 1, Kp), lambda g: (g, 0, 0)),           # top-k query ids
            pl.BlockSpec((bb, PACK_ROWS, Qp), lambda g: (g, 0, 0)),   # packed per-query rows
            pl.BlockSpec((bb, PACK_ROWS, PACK_ROWS), lambda g: (g, 0, 0)),  # 8x8 per image
        ],
        out_specs=pl.BlockSpec((bb, PACK_ROWS, Kp), lambda g: (g, 0, 0)),
        compiler_params=pltpu.CompilerParams(dimension_semantics=("parallel",)),
        cost_estimate=cost,
    )(vals3, idx3, lhs, m8)

    boxes = jnp.swapaxes(packed[:B, 0:4, :K], 1, 2)                   # [B, K, 4]
    labels = packed[:B, LABEL_ROW, :K]                                # [B, K]
    scores = packed[:B, SCORE_ROW, :K]                                # [B, K]

    results = [{"scores": s, "labels": l, "boxes": b}
               for s, l, b in zip(scores, labels, boxes)]
    return results, topk_indexes


# ---------------------------------------------------------------------------
# Pure-numpy reference mirroring the PyTorch module (float64)
# ---------------------------------------------------------------------------
def _reference(outputs, target_sizes, num_queries=100, num_top=300):
    logits = np.asarray(outputs["pred_logits"], dtype=np.float64)
    bbox = np.asarray(outputs["pred_boxes"], dtype=np.float64)
    ts = np.asarray(target_sizes, dtype=np.float64)
    B, Qt, C = logits.shape
    select_id = outputs.get("select_id", list(range(C)))
    select_id = [int(c) for c in np.asarray(select_id).reshape(-1)]

    flat_logits = logits.reshape(B, -1)
    # sigmoid is strictly monotone: ordering by logits == ordering by probs
    # (ties broken toward lower index, matching lax.top_k).
    topk_indexes = np.argsort(-flat_logits, axis=1, kind="stable")[:, :num_top]
    prob = 1.0 / (1.0 + np.exp(-flat_logits))
    scores = np.take_along_axis(prob, topk_indexes, axis=1)
    topk_boxes = topk_indexes // C

    labels_flat = np.zeros_like(prob)
    for ind, c in enumerate(select_id):
        labels_flat[:, ind * num_queries:(ind + 1) * num_queries] = c
    labels = np.take_along_axis(labels_flat, topk_boxes, axis=1)

    cx, cy, w, h = bbox[..., 0], bbox[..., 1], bbox[..., 2], bbox[..., 3]
    xyxy = np.stack([cx - 0.5 * w, cy - 0.5 * h, cx + 0.5 * w, cy + 0.5 * h],
                    axis=-1)
    boxes = np.take_along_axis(xyxy, topk_boxes[..., None].repeat(4, axis=-1),
                               axis=1)
    img_h, img_w = ts[:, 0], ts[:, 1]
    scale = np.stack([img_w, img_h, img_w, img_h], axis=1)
    boxes = boxes * scale[:, None, :]
    return scores, labels, boxes, topk_indexes


if __name__ == "__main__":
    key = jax.random.PRNGKey(0)
    k1, k2 = jax.random.split(key, 2)

    num_queries = 100                 # module default
    num_classes = 4                   # logit dim; default select_id = range(4)
    B = 2
    Qt = num_queries * num_classes    # OV-DETR: queries repeated per selected class
    num_top = 300                     # hard-coded 300 in the reference module

    pred_logits = jax.random.normal(k1, (B, Qt, num_classes), dtype=jnp.float32)
    pred_boxes = jax.random.uniform(k2, (B, Qt, 4), dtype=jnp.float32,
                                    minval=0.05, maxval=0.95)
    target_sizes = jnp.array([[480, 640], [512, 384]], dtype=jnp.int32)
    outputs = {"pred_logits": pred_logits, "pred_boxes": pred_boxes}

    results, topk_indexes = ov_post_process(outputs, target_sizes,
                                            num_queries=num_queries,
                                            num_top=num_top)
    for r in results:
        jax.block_until_ready(r["scores"])
        jax.block_until_ready(r["labels"])
        jax.block_until_ready(r["boxes"])
    jax.block_until_ready(topk_indexes)

    ref_scores, ref_labels, ref_boxes, ref_idx = _reference(
        outputs, target_sizes, num_queries=num_queries, num_top=num_top)

    ok = bool(np.array_equal(np.asarray(topk_indexes), ref_idx))
    for i in range(B):
        got_s = np.asarray(results[i]["scores"])
        got_l = np.asarray(results[i]["labels"])
        got_b = np.asarray(results[i]["boxes"])
        ok &= got_s.shape == (num_top,) and got_b.shape == (num_top, 4)
        ok &= bool(np.allclose(got_s, ref_scores[i], rtol=1e-5, atol=1e-5))
        ok &= bool(np.array_equal(got_l, ref_labels[i].astype(np.float32)))
        ok &= bool(np.allclose(got_b, ref_boxes[i], rtol=1e-5, atol=2e-4))

    if ok:
        print("KERNEL_OK")
    else:
        print("KERNEL_MISMATCH")
</pallas_src>

<mosaic_0001>
module attributes {stable_mosaic.version = 11 : i64} {
  func.func @_post_topk_kernel(%arg0: i32, %arg1: memref<1x1x384xf32, #tpu.memory_space<vmem>>, %arg2: memref<1x1x384xi32, #tpu.memory_space<vmem>>, %arg3: memref<1x8x512xf32, #tpu.memory_space<vmem>>, %arg4: memref<1x8x8xf32, #tpu.memory_space<vmem>>, %arg5: memref<1x8x384xf32, #tpu.memory_space<vmem>>) attributes {dimension_semantics = [#tpu.dimension_semantics<parallel>], iteration_bounds = array<i64: 2>, scalar_prefetch = 0 : i64, scratch_operands = 0 : i64, tpu.core_type = #tpu.core_type<tc>, window_params = [{transform_indices = @transform_0, window_bounds = array<i64: 1, 1, 384>}, {transform_indices = @transform_1, window_bounds = array<i64: 1, 1, 384>}, {transform_indices = @transform_2, window_bounds = array<i64: 1, 8, 512>}, {transform_indices = @transform_3, window_bounds = array<i64: 1, 8, 8>}, {transform_indices = @transform_4, window_bounds = array<i64: 1, 8, 384>}]} {
    %0 = tpu.iota {dimensions = array<i32: 0>} : vector<512x384xi32>
    %1 = tpu.iota {dimensions = array<i32: 0>} : vector<8x384xi32>
    %c0 = arith.constant 0 : index
    %c0_0 = arith.constant 0 : index
    %c0_1 = arith.constant 0 : index
    %2 = vector.load %arg2[%c0, %c0_0, %c0_1] : memref<1x1x384xi32, #tpu.memory_space<vmem>>, vector<1x1x384xi32>
    %3 = vector.shape_cast %2 : vector<1x1x384xi32> to vector<1x384xi32>
    %4 = vector.broadcast %3 : vector<1x384xi32> to vector<512x384xi32>
    %5 = arith.cmpi eq, %0, %4 : vector<512x384xi32>
    %6 = arith.extui %5 : vector<512x384xi1> to vector<512x384xi32>
    %7 = arith.sitofp %6 : vector<512x384xi32> to vector<512x384xf32>
    %c0_2 = arith.constant 0 : index
    %c0_3 = arith.constant 0 : index
    %c0_4 = arith.constant 0 : index
    %8 = vector.load %arg3[%c0_2, %c0_3, %c0_4] : memref<1x8x512xf32, #tpu.memory_space<vmem>>, vector<1x8x512xf32>
    %9 = vector.shape_cast %8 : vector<1x8x512xf32> to vector<8x512xf32>
    %cst = arith.constant dense<0.000000e+00> : vector<8x384xf32>
    %10 = tpu.matmul %9, %7, %cst {dimension_numbers = #tpu.dot_dimension_numbers<[1], [0], [0], [1], [0, 0, 1, 1], [], []>, precision = #tpu.contract_precision<fp32>} : vector<8x512xf32>, vector<512x384xf32>, vector<8x384xf32> -> vector<8x384xf32>
    %c0_5 = arith.constant 0 : index
    %c0_6 = arith.constant 0 : index
    %c0_7 = arith.constant 0 : index
    %11 = vector.load %arg4[%c0_5, %c0_6, %c0_7] : memref<1x8x8xf32, #tpu.memory_space<vmem>>, vector<1x8x8xf32>
    %12 = vector.shape_cast %11 : vector<1x8x8xf32> to vector<8x8xf32>
    %cst_8 = arith.constant dense<0.000000e+00> : vector<8x384xf32>
    %13 = tpu.matmul %12, %10, %cst_8 {dimension_numbers = #tpu.dot_dimension_numbers<[1], [0], [0], [1], [0, 0, 1, 1], [], []>, precision = #tpu.contract_precision<fp32>} : vector<8x8xf32>, vector<8x384xf32>, vector<8x384xf32> -> vector<8x384xf32>
    %c0_9 = arith.constant 0 : index
    %c0_10 = arith.constant 0 : index
    %c0_11 = arith.constant 0 : index
    %14 = vector.load %arg1[%c0_9, %c0_10, %c0_11] : memref<1x1x384xf32, #tpu.memory_space<vmem>>, vector<1x1x384xf32>
    %15 = vector.shape_cast %14 : vector<1x1x384xf32> to vector<1x384xf32>
    %cst_12 = arith.constant 0.000000e+00 : f32
    %16 = vector.broadcast %cst_12 : f32 to vector<1x384xf32>
    %17 = arith.subf %16, %15 : vector<1x384xf32>
    %18 = math.exp %17 : vector<1x384xf32>
    %cst_13 = arith.constant 1.000000e+00 : f32
    %19 = vector.broadcast %cst_13 : f32 to vector<1x384xf32>
    %20 = arith.addf %19, %18 : vector<1x384xf32>
    %cst_14 = arith.constant 1.000000e+00 : f32
    %21 = vector.broadcast %cst_14 : f32 to vector<1x384xf32>
    %22 = arith.divf %21, %20 : vector<1x384xf32>
    %c5_i32 = arith.constant 5 : i32
    %23 = vector.broadcast %c5_i32 : i32 to vector<8x384xi32>
    %24 = arith.cmpi eq, %1, %23 : vector<8x384xi32>
    %25 = vector.shape_cast %22 : vector<1x384xf32> to vector<1x384xf32>
    %26 = vector.broadcast %25 : vector<1x384xf32> to vector<8x384xf32>
    %27 = arith.select %24, %26, %13 : vector<8x384xi1>, vector<8x384xf32>
    %c0_15 = arith.constant 0 : index
    %c0_16 = arith.constant 0 : index
    %c0_17 = arith.constant 0 : index
    %28 = vector.load %arg5[%c0_15, %c0_16, %c0_17] : memref<1x8x384xf32, #tpu.memory_space<vmem>>, vector<1x8x384xf32>
    %29 = vector.shape_cast %28 : vector<1x8x384xf32> to vector<8x384xf32>
    %30 = vector.shape_cast %27 : vector<8x384xf32> to vector<1x8x384xf32>
    tpu.vector_store %arg5[%c0_15, %c0_16, %c0_17], %30 {strides = array<i32>} : memref<1x8x384xf32, #tpu.memory_space<vmem>>, vector<1x8x384xf32>,
    return
  }
  func.func @transform_0(%arg0: i32) -> (i32, i32, i32) {
    %c0_i32 = arith.constant 0 : i32
    %c0_i32_0 = arith.constant 0 : i32
    %c0_i32_1 = arith.constant 0 : i32
    return %arg0, %c0_i32, %c0_i32_0 : i32, i32, i32
  }
  func.func @transform_1(%arg0: i32) -> (i32, i32, i32) {
    %c0_i32 = arith.constant 0 : i32
    %c0_i32_0 = arith.constant 0 : i32
    %c0_i32_1 = arith.constant 0 : i32
    return %arg0, %c0_i32, %c0_i32_0 : i32, i32, i32
  }
  func.func @transform_2(%arg0: i32) -> (i32, i32, i32) {
    %c0_i32 = arith.constant 0 : i32
    %c0_i32_0 = arith.constant 0 : i32
    %c0_i32_1 = arith.constant 0 : i32
    return %arg0, %c0_i32, %c0_i32_0 : i32, i32, i32
  }
  func.func @transform_3(%arg0: i32) -> (i32, i32, i32) {
    %c0_i32 = arith.constant 0 : i32
    %c0_i32_0 = arith.constant 0 : i32
    %c0_i32_1 = arith.constant 0 : i32
    return %arg0, %c0_i32, %c0_i32_0 : i32, i32, i32
  }
  func.func @transform_4(%arg0: i32) -> (i32, i32, i32) {
    %c0_i32 = arith.constant 0 : i32
    %c0_i32_0 = arith.constant 0 : i32
    %c0_i32_1 = arith.constant 0 : i32
    return %arg0, %c0_i32, %c0_i32_0 : i32, i32, i32
  }
}

</mosaic_0001>

<bundles_post_ra>
// kernel: tpu_custom_call.1
= control target key start
LH: loop header
LB: loop body
LE: loop exit
PB: predicated region body
PF: predicated region fallthrough
CT: control target
= control target key end

     0   :  { %s12683_s0 = inlined_call_operand.hbm [shape: f32[2,1,384], index: 0, kind: input, shape index: {}]   ;;  %s12684_s1 = inlined_call_operand.hbm [shape: s32[2,1,384], index: 1, kind: input, shape index: {}]   ;;  %s12685_s2 = inlined_call_operand.hbm [shape: f32[2,8,512], index: 2, kind: input, shape index: {}]   ;;  %s12686_s3 = inlined_call_operand.hbm [shape: f32[2,8,8], index: 3, kind: input, shape index: {}]   ;;  %s12687_s4 = inlined_call_operand.hbm [shape: f32[2,8,384], index: 4, kind: output, shape index: {}]  }
   0x1   :  { %13132 = sst [smem:[#allocation103_spill]] %s12684_s1 }
   0x2   :  { %9 = vsyncpa [#allocation3], 0 }
   0x3   :  { %11 = vsyncpa [#allocation3 + $0x1], 0 }
   0x4   :  { %12 = vsyncpa [#allocation6], 0 }
   0x5   :  { %14 = vsyncpa [#allocation6 + $0x1], 0 }
   0x6   :  { %15 = vsyncpa [#allocation9], 0 }
   0x7   :  { %17 = vsyncpa [#allocation9 + $0x1], 0 }
   0x8   :  { %18 = vsyncpa [#allocation4], 0 }
   0x9   :  { %20 = vsyncpa [#allocation4 + $0x1], 0  ;;  %s6783_s15 = smov 0   ;;  %s6785_s16 = smov 0  }
   0xa   :  { %s6787_s17 = smov 0   ;;  %s6789_s18 = smov 0  }
   0xb LB: > { %13133 = sst [smem:[#allocation15_spill]] %s6750_s17  ;;  %s6804_s19 = sadd.s32 4294967295, %s6754_s18   ;;  %s6754_s18 = sphi %s6789_s18, %s13893_s18   ;;  %s6750_s17 = sphi %s6787_s17, %s13895_s17   ;;  %s6746_s16 = sphi %s6785_s16, %s13897_s16   ;;  %s6742_s15 = sphi %s6783_s15, %s13896_s15  }
   0xc   : > { %s5701_s20 = sadd.s32 4294967294, %s6754_s18   ;;  %s6808_s21 = sadd.s32 1, %s6754_s18  }
   0xd   : > { %13134 = sst [smem:[#allocation16_spill]] %s6808_s21  ;;  %s33_s22 = sadd.s32 1, %s6750_s17 }
   0xe   : > { %s30_s23 = ssub.s32 %s6754_s18, %s6808_s21  ;;  %p40_p0 = scmp.ne.s32.totalorder %s6750_s17, %s6746_s16 }
   0xf   : > { %p31_p1 = scmp.eq.s32.totalorder %s30_s23, 0  ;;  %p41_p2 = scmp.eq.s32.totalorder %s6754_s18, 0 }
  0x10   : > { %p46_p3 = scmp.ne.s32.totalorder %s6746_s16, %s6742_s15  ;;  %p47_p4 = scmp.eq.s32.totalorder %s6804_s19, 0 }
  0x11   : > { %s6820_s24 = scalar_select %p31_p1, %s6750_s17, %s33_s22  }
  0x12   : > { %p42_p5 = por %p41_p2, %p40_p0  ;;  %p6822_p6 = por %p47_p4, %p46_p3 }
  0x13   : > { %13135 = sst [smem:[#allocation17_spill]] %s6820_s24  ;;  %p148_p7 = scmp.eq.s32.totalorder %s6804_s19, 1 }
  0x14   : > { %p154_p8 = scmp.eq.s32.totalorder %s5701_s20, 1  ;;  %p5703_p9 = scmp.ge.s32.totalorder %s6754_s18, 2 }
  0x15   : > { %p6518_p10 = scmp.lt.s32.totalorder %s6754_s18, 2  ;;  %p6829_p11 = por %p148_p7, %p40_p0 }
  0x16   : > { %p6833_p12 = por %p154_p8, %p46_p3  ;;  %s6838_s28 = sand.u32 1, %s6750_s17  }
  0x17   : > { %s6485_s29 = smul.u32 3, %s6754_s18  ;;  %p6842_p13 = pnand %p6518_p10, %p42_p5 }
  0x18   : > { %s6484_s30 = smul.u32 3, %s6838_s28  ;;  %s193_s6 = sand.u32 1, %s6754_s18  }
  0x19   : > { %s13140_s1 = sld [smem:[#allocation103_spill]]  ;;  %p5709_p0 = scmp.ge.s32.totalorder %s6754_s18, 1 }
  0x1a   : > { %s197_s11 = scalar_lea.vmem [#allocation5], %s6484_s30  ;;  %s6853_s13 = scalar_lea.sflag [#allocation6], %s193_s6 }
  0x1b   : > { %s205_s12 = sshll.u32 %s197_s11, 4  ;;  %p6564_p2 = pneg %p6842_p13  ;;  %s206_s12 = int_to_ptr.vmem [resolvable:$true] %s205_s12 }
  0x1f   : > { %s201_s9 = scalar_lea.hbm %s13140_s1, %s6485_s29  ;;  %s6567_s7 = scalar_lea.hbm %s13140_s1, 6 }
  0x20   : > { %s203_s10 = sshll.u32 %s201_s9, 4  ;;  %s204_s10 = int_to_ptr.hbm [resolvable:$true] %s203_s10 }
  0x21   : > { %s6560_s14 = sshra.s32 %s204_s10, 4  ;;  %s6561_s14 = int_to_ptr.hbm [resolvable:$true] %s6560_s14 }
  0x22   : > { %s6562_s20 = scalar_lea.hbm %s6561_s14, 3  ;;  %p6568_p5 = scmp.lt.s32.totalorder %s6561_s14, %s13140_s1 }
  0x23   : > { %p6563_p1 = scmp.ne.s32.totalorder %s6561_s14, %s6562_s20  ;;  %p6569_p7 = scmp.lt.s32.totalorder %s6567_s7, %s6562_s20 }
  0x25   : > { %p6565_p3 = pnand %p6564_p2, %p6563_p1  ;;  %p6570_p8 = por %p6569_p7, %p6568_p5 }
  0x27   : > { %p6566_p4 = pneg %p6565_p3 }
  0x29   : > { %p6571_p10 = pnand %p6570_p8, %p6566_p4 }
  0x2b   : > { %6574 = shalt.err (!%p6571_p10)
}
  0x2c   : > { %6507 = dma.hbm_to_vmem [thread:$0]  (!%p6842_p13), %s204_s10, 48, %s206_s12, %s6853_s13  }
  0x2d   : > { %p249_p1 = scmp.lt.s32.totalorder %s6754_s18, 3  ;;  %s182_s22 = scalar_lea.hbm %s12683_s0, %s6485_s29 }
  0x2e   : > { %s184_s20 = sshll.u32 %s182_s22, 4  ;;  %s178_s23 = scalar_lea.vmem [#allocation2], %s6484_s30  ;;  %s185_s20 = int_to_ptr.hbm [resolvable:$true] %s184_s20 }
  0x2f   : > { %p6875_p3 = pnand %p5709_p0, %p249_p1  ;;  %s186_s7 = sshll.u32 %s178_s23, 4  ;;  %s187_s7 = int_to_ptr.vmem [resolvable:$true] %s186_s7 }
  0x30   : > { %s5704_s8 = sshll.u32 %s6838_s28, 5  ;;  %s175_s9 = scalar_lea.sflag [#allocation3], %s6838_s28 }
  0x31   : > { %s6590_s1 = sshra.s32 %s185_s20, 4  ;;  %s6597_s6 = scalar_lea.hbm %s12683_s0, 6  ;;  %s6591_s1 = int_to_ptr.hbm [resolvable:$true] %s6590_s1 }
  0x32   : > { %s6592_s10 = scalar_lea.hbm %s6591_s1, 3  ;;  %p6598_p0 = scmp.lt.s32.totalorder %s6591_s1, %s12683_s0 }
  0x33   : > { %p6593_p4 = scmp.ne.s32.totalorder %s6591_s1, %s6592_s10  ;;  %p6599_p8 = scmp.lt.s32.totalorder %s6597_s6, %s6592_s10 }
  0x35   : > { %p6595_p5 = pnand %p6593_p4, %p6564_p2  ;;  %p6600_p10 = por %p6599_p8, %p6598_p0 }
  0x37   : > { %p6596_p7 = pneg %p6595_p5 }
  0x39   : > { %p6601_p1 = pnand %p6600_p10, %p6596_p7 }
  0x3b   : > { %6604 = shalt.err (!%p6601_p1)
}
  0x3c   : > { %6504 = dma.hbm_to_vmem [thread:$0]  (!%p6842_p13), %s185_s20, 48, %s187_s7, %s175_s9  }
  0x3d   : > { %s6483_s30 = sshll.u32 %s6754_s18, 5  ;;  %s216_s29 = scalar_lea.vmem [#allocation7], %s5704_s8 }
  0x3e   : > { %s221_s17 = scalar_lea.hbm %s12685_s2, %s6483_s30  ;;  %s225_s12 = sshll.u32 %s216_s29, 4  ;;  %s226_s12 = int_to_ptr.vmem [resolvable:$true] %s225_s12 }
  0x3f   : > { %s223_s21 = sshll.u32 %s221_s17, 4  ;;  %s6627_s7 = scalar_lea.hbm %s12685_s2, 64  ;;  %s224_s21 = int_to_ptr.hbm [resolvable:$true] %s223_s21 }
  0x40   : > { %s6620_s1 = sshra.s32 %s224_s21, 4  ;;  %s6621_s1 = int_to_ptr.hbm [resolvable:$true] %s6620_s1 }
  0x41   : > { %s6622_s10 = scalar_lea.hbm %s6621_s1, 32  ;;  %p6628_p0 = scmp.lt.s32.totalorder %s6621_s1, %s12685_s2 }
  0x42   : > { %p6623_p4 = scmp.ne.s32.totalorder %s6621_s1, %s6622_s10  ;;  %p6629_p8 = scmp.lt.s32.totalorder %s6627_s7, %s6622_s10 }
  0x44   : > { %p6625_p5 = pnand %p6623_p4, %p6564_p2  ;;  %p6630_p10 = por %p6629_p8, %p6628_p0 }
  0x46   : > { %p6626_p7 = pneg %p6625_p5 }
  0x48   : > { %p6631_p1 = pnand %p6630_p10, %p6626_p7 }
  0x4a   : > { %6634 = shalt.err (!%p6631_p1)
}
  0x4b   : > { %6510 = dma.hbm_to_vmem [thread:$0]  (!%p6842_p13), %s224_s21, 512, %s226_s12, %s6853_s13  }
  0x4c   : > { %s5707_s17 = sshll.u32 %s6838_s28, 3  ;;  %s5708_s8 = sshll.u32 %s6754_s18, 3 }
  0x4d   : > { %s240_s30 = scalar_lea.hbm %s12686_s3, %s5708_s8  ;;  %s236_s29 = scalar_lea.vmem [#allocation8], %s5707_s17 }
  0x4e   : > { %s242_s23 = sshll.u32 %s240_s30, 4  ;;  %s244_s1 = sshll.u32 %s236_s29, 4  ;;  %s243_s23 = int_to_ptr.hbm [resolvable:$true] %s242_s23  ;;  %s245_s1 = int_to_ptr.vmem [resolvable:$true] %s244_s1 }
  0x4f   : > { %s233_s10 = scalar_lea.sflag [#allocation9], %s6838_s28  ;;  %s6650_s6 = sshra.s32 %s243_s23, 4  ;;  %s6651_s6 = int_to_ptr.hbm [resolvable:$true] %s6650_s6 }
  0x50   : > { %s6652_s20 = scalar_lea.hbm %s6651_s6, 8  ;;  %s6657_s12 = scalar_lea.hbm %s12686_s3, 16 }
  0x51   : > { %p6653_p4 = scmp.ne.s32.totalorder %s6651_s6, %s6652_s20  ;;  %p6658_p0 = scmp.lt.s32.totalorder %s6651_s6, %s12686_s3 }
  0x52   : > { %p6659_p8 = scmp.lt.s32.totalorder %s6657_s12, %s6652_s20 }
  0x53   : > { %p6655_p5 = pnand %p6653_p4, %p6564_p2 }
  0x54   : > { %p6660_p10 = por %p6659_p8, %p6658_p0 }
  0x55   : > { %p6656_p7 = pneg %p6655_p5 }
  0x57   : > { %p6661_p1 = pnand %p6660_p10, %p6656_p7 }
  0x59   : > { %6664 = shalt.err (!%p6661_p1)
}
  0x5a   : > { %6513 = dma.hbm_to_vmem [thread:$0]  (!%p6842_p13), %s243_s23, 128, %s245_s1, %s233_s10  }
  0x5b   : > { %253 = sbr.rel (%p6875_p3) target bundleno = 1024 (0x400), region = 36 }
  0x60   : > { %s6930_s28 = sand.u32 1, %s6746_s16  }
  0x61   : > { %s6488_s24 = smul.u32 3, %s6930_s28  ;;  %s256_s17 = scalar_lea.sflag [#allocation3], %s6930_s28 }
  0x63   : > { %s6934_s8 = scalar_lea.vmem [#allocation2], %s6488_s24 }
  0x64   : > { %6725 = dma.done.wait (%p6822_p6), %s256_s17, 48  }
  0x65   : > { %6727 = vsyncadd (%p6822_p6), %s256_s17, 4294967248  ;;  %s265_s5 = sand.u32 1, %s6804_s19   ;;  %s6941_s11 = scalar_lea.vmem [#allocation5], %s6488_s24 }
  0x66   : > { %s266_s14 = scalar_lea.sflag [#allocation6], %s265_s5 }
  0x67   : > { %6729 = dma.done.wait (%p6822_p6), %s266_s14, 560  }
  0x68   : > { %6731 = vsyncadd (%p6822_p6), %s266_s14, 4294966736  ;;  %s5710_s22 = sshll.u32 %s6930_s28, 5  ;;  %s5711_s30 = sshll.u32 %s6930_s28, 3 }
  0x69   : > { %s6949_s23 = scalar_lea.vmem [#allocation7], %s5710_s22  ;;  %s286_s29 = scalar_lea.sflag [#allocation9], %s6930_s28 }
  0x6a   : > { %s6952_s1 = scalar_lea.vmem [#allocation8], %s5711_s30 }
  0x6b   : > { %6733 = dma.done.wait (%p6822_p6), %s286_s29, 128  }
  0x6c   : > { %6735 = vsyncadd (%p6822_p6), %s286_s29, 4294967168  ;;  %v330_v0 = vlaneseq  ;;  %v395_v12 = vld [vmem:[%s6941_s11] sm:$0x7]  ;;  %v12717_v25 = vmov 1.0   ;;  %v12738_v26 = vmov 0.0   ;;  %s6489_s25 = smul.u32 24, %s6930_s28 }
  0x6d   : > { %v7003_v17 = vperm.slane %v395_v12, 0  ;;  %s6490_s6 = smul.u32 24, %s6804_s19  ;;  %s5549_s19 = scalar_lea.sflag [#allocation4], %s6930_s28 }
  0x6e   : > { %v6958_v1 = vshrl.u32 %v330_v0, 7  ;;  %s329_s10 = scalar_lea.vmem [#allocation10], %s6489_s25  ;;  %s6700_s5 = scalar_lea.hbm %s12687_s4, 48 }
  0x6f   : > { %s5560_s13 = scalar_lea.hbm %s12687_s4, %s6490_s6  ;;  %s5562_s12 = sshll.u32 %s329_s10, 4  ;;  %s5563_s12 = int_to_ptr.vmem [resolvable:$true] %s5562_s12 }
  0x70   : > { %13142 = vst [vmem:[#allocation18_spill] sm:$0xff] %v6958_v1  ;;  %v6961_v2 = vadd.s32 120, %v6958_v1  ;;  %v6964_v3 = vadd.s32 112, %v6958_v1  ;;  %v6967_v4 = vadd.s32 104, %v6958_v1  ;;  %v6970_v5 = vadd.s32 96, %v6958_v1  ;;  %s5564_s7 = sshll.u32 %s5560_s13, 4  ;;  %s5565_s7 = int_to_ptr.hbm [resolvable:$true] %s5564_s7 }
  0x71   : > { %v6973_v6 = vadd.s32 88, %v6958_v1  ;;  %v6976_v7 = vadd.s32 80, %v6958_v1  ;;  %v6979_v8 = vadd.s32 72, %v6958_v1  ;;  %v6982_v9 = vadd.s32 64, %v6958_v1  ;;  %s6694_s9 = sshra.s32 %s5565_s7, 4  ;;  %s6695_s9 = int_to_ptr.hbm [resolvable:$true] %s6694_s9 }
  0x72   : > { %13143 = vst [vmem:[#allocation19_spill] sm:$0xff] %v6961_v2  ;;  %v6985_v10 = vadd.s32 56, %v6958_v1  ;;  %v6988_v11 = vadd.s32 48, %v6958_v1  ;;  %v6992_v13 = vadd.s32 40, %v6958_v1  ;;  %v6995_v14 = vadd.s32 32, %v6958_v1  ;;  %s6696_s24 = scalar_lea.hbm %s6695_s9, 24  ;;  %p6701_p3 = scmp.lt.s32.totalorder %s6695_s9, %s12687_s4 }
  0x73   : > { %13144 = vst [vmem:[#allocation20_spill] sm:$0xff] %v6964_v3  ;;  %v6998_v15 = vadd.s32 24, %v6958_v1  ;;  %v7001_v16 = vadd.s32 16, %v6958_v1  ;;  %v7006_v18 = vadd.s32 8, %v6958_v1  ;;  %v7009_v19 = vadd.s32 248, %v6958_v1  ;;  %p6697_p6 = scmp.ne.s32.totalorder %s6695_s9, %s6696_s24  ;;  %p6702_p4 = scmp.lt.s32.totalorder %s6700_s5, %s6696_s24 }
  0x74   : > { %13145 = vst [vmem:[#allocation21_spill] sm:$0xff] %v6967_v4  ;;  %v7012_v20 = vadd.s32 240, %v6958_v1  ;;  %v7015_v21 = vadd.s32 232, %v6958_v1  ;;  %v7018_v22 = vadd.s32 224, %v6958_v1  ;;  %v7021_v23 = vadd.s32 216, %v6958_v1 }
  0x75   : > { %13146 = vst [vmem:[#allocation22_spill] sm:$0xff] %v6970_v5  ;;  %v7024_v24 = vadd.s32 208, %v6958_v1  ;;  %vm444_vm0 = vcmp.eq.s32.totalorder %v6961_v2, %v7003_v17  ;;  %vm441_vm1 = vcmp.eq.s32.totalorder %v6964_v3, %v7003_v17  ;;  %vm438_vm2 = vcmp.eq.s32.totalorder %v6967_v4, %v7003_v17  ;;  %p6698_p13 = pnand %p6697_p6, %p6829_p11  ;;  %p6703_p5 = por %p6702_p4, %p6701_p3 }
  0x76   : > { %13147 = vst [vmem:[#allocation23_spill] sm:$0xff] %v6973_v6  ;;  %vm435_vm3 = vcmp.eq.s32.totalorder %v6970_v5, %v7003_v17  ;;  %5904 = vmatpush.msk.msra.mxu0 %vm444_vm0, %v12717_v25  ;;  %5920 = vmatpush.msk.msra.mxu3 %vm444_vm0, %v12717_v25  ;;  %v5757_v27 = vsel %vm444_vm0, 1.0, %v12738_v26  ;;  %v5754_v28 = vsel %vm441_vm1, 1.0, %v12738_v26  ;;  %v5751_v29 = vsel %vm438_vm2, 1.0, %v12738_v26 }
  0x77   : > { %13148 = vst [vmem:[#allocation24_spill] sm:$0xff] %v6976_v7  ;;  %vm432_vm4 = vcmp.eq.s32.totalorder %v6973_v6, %v7003_v17  ;;  %v7056_v30 = vsub.f32 %v5757_v27, %v5757_v27  ;;  %v7058_v31 = vsub.f32 %v5754_v28, %v5754_v28  ;;  %v7060_v32 = vsub.f32 %v5751_v29, %v5751_v29  ;;  %p6699_p2 = pneg %p6698_p13 }
  0x78   : > { %13149 = vst [vmem:[#allocation25_spill] sm:$0xff] %v6979_v8  ;;  %v5748_v33 = vsel %vm435_vm3, 1.0, %v12738_v26  ;;  %5905 = vmatpush.msk.msra.mxu0 %vm441_vm1, %v12717_v25  ;;  %5921 = vmatpush.msk.msra.mxu3 %vm441_vm1, %v12717_v25  ;;  %vm429_vm5 = vcmp.eq.s32.totalorder %v6976_v7, %v7003_v17  ;;  %v5745_v35 = vsel %vm432_vm4, 1.0, %v12738_v26  ;;  %vm12721_vm6 = vcmp.eq.s32.totalorder %v6979_v8, %v7003_v17 }
  0x79   : > { %13150 = vst [vmem:[#allocation26_spill] sm:$0xff] %v6982_v9  ;;  %v7074_v34 = vsub.f32 %v5748_v33, %v5748_v33  ;;  %1123 = vmatpush.msra.mxu2 %v7056_v30  ;;  %v1022_v36 = vand.u32 4294901760, %v7056_v30  ;;  %v12715_v37 = vand.u32 4294901760, %v7058_v31  ;;  %v7087_v38 = vsub.f32 %v5745_v35, %v5745_v35  ;;  %p6704_p7 = pnand %p6703_p5, %p6699_p2 }
  0x7a   : > { %13151 = vst [vmem:[#allocation27_spill] sm:$0xff] %v6985_v10  ;;  %v12712_v39 = vand.u32 4294901760, %v7060_v32  ;;  %5906 = vmatpush.msk.msra.mxu0 %vm438_vm2, %v12717_v25  ;;  %5922 = vmatpush.msk.msra.mxu3 %vm438_vm2, %v12717_v25  ;;  %v5742_v40 = vsel %vm429_vm5, 1.0, %v12738_v26  ;;  %vm12720_vm7 = vcmp.eq.s32.totalorder %v6982_v9, %v7003_v17  ;;  %v5739_v42 = vsel %vm12721_vm6, 1.0, %v12738_v26 }
  0x7b   : > { %13152 = vst [vmem:[#allocation28_spill] sm:$0xff] %v6988_v11  ;;  %v12711_v41 = vand.u32 4294901760, %v7074_v34  ;;  %1126 = vmatpush.msra.mxu2 %v7058_v31  ;;  %v1023_v43 = vsub.f32 %v7056_v30, %v1022_v36  ;;  %v1029_v44 = vsub.f32 %v7058_v31, %v12715_v37  ;;  %v7119_v46 = vsub.f32 %v5742_v40, %v5742_v40 }
  0x7c   : > { %13153 = vst [vmem:[#allocation29_spill] sm:$0xff] %v6992_v13  ;;  %v1035_v45 = vsub.f32 %v7060_v32, %v12712_v39  ;;  %5907 = vmatpush.msk.msra.mxu0 %vm435_vm3, %v12717_v25  ;;  %5923 = vmatpush.msk.msra.mxu3 %vm435_vm3, %v12717_v25  ;;  %v7132_v48 = vsub.f32 %v5739_v42, %v5739_v42  ;;  %v12707_v49 = vand.u32 4294901760, %v7087_v38  ;;  %v5736_v53 = vsel %vm12720_vm7, 1.0, %v12738_v26 }
  0x7d   : > { %13154 = vst [vmem:[#allocation30_spill] sm:$0xff] %v6995_v14  ;;  %v1041_v47 = vsub.f32 %v7074_v34, %v12711_v41  ;;  %vm12691_vm8 = vcmp.eq.s32.totalorder %v6985_v10, %v7003_v17  ;;  %1129 = vmatpush.msra.mxu2 %v7060_v32  ;;  %v1024_v50 = vand.u32 4294901760, %v1023_v43  ;;  %v1030_v51 = vand.u32 4294901760, %v1029_v44 }
  0x7e   : > { %13155 = vst [vmem:[#allocation31_spill] sm:$0xff] %v6998_v15  ;;  %v1036_v52 = vand.u32 4294901760, %v1035_v45  ;;  %5908 = vmatpush.msk.msra.mxu0 %vm432_vm4, %v12717_v25  ;;  %5924 = vmatpush.msk.msra.mxu3 %vm432_vm4, %v12717_v25  ;;  %v1047_v55 = vsub.f32 %v7087_v38, %v12707_v49  ;;  %v7153_v56 = vsub.f32 %v5736_v53, %v5736_v53  ;;  %v12703_v57 = vand.u32 4294901760, %v7119_v46 }
  0x7f   : > { %13156 = vst [vmem:[#allocation32_spill] sm:$0xff] %v7001_v16  ;;  %v1042_v54 = vand.u32 4294901760, %v1041_v47  ;;  %vm12692_vm9 = vcmp.eq.s32.totalorder %v6988_v11, %v7003_v17  ;;  %1025 = vmatpush.msra.mxu1 %v1024_v50  ;;  %1132 = vmatpush.msra.mxu2 %v7074_v34  ;;  %v5733_v58 = vsel %vm12691_vm8, 1.0, %v12738_v26  ;;  %vm12695_vm10 = vcmp.eq.s32.totalorder %v6992_v13, %v7003_v17 }
  0x80   : > { %13157 = vst [vmem:[#allocation33_spill] sm:$0xff] %v7006_v18  ;;  %v12702_v59 = vand.u32 4294901760, %v7132_v48  ;;  %5909 = vmatpush.msk.msra.mxu0 %vm429_vm5, %v12717_v25  ;;  %5925 = vmatpush.msk.msra.mxu3 %vm429_vm5, %v12717_v25  ;;  %v1048_v60 = vand.u32 4294901760, %v1047_v55  ;;  %v7174_v61 = vsub.f32 %v5733_v58, %v5733_v58  ;;  %v5730_v62 = vsel %vm12692_vm9, 1.0, %v12738_v26 }
  0x81   : > { %13158 = vst [vmem:[#allocation34_spill] sm:$0xff] %v7009_v19  ;;  %vm12699_vm11 = vcmp.eq.s32.totalorder %v6995_v14, %v7003_v17  ;;  %1031 = vmatpush.msra.mxu1 %v1030_v51  ;;  %1135 = vmatpush.msra.mxu2 %v7087_v38  ;;  %v1053_v63 = vsub.f32 %v7119_v46, %v12703_v57  ;;  %v12701_v27 = vand.u32 4294901760, %v7153_v56  ;;  %v5727_v28 = vsel %vm12695_vm10, 1.0, %v12738_v26 }
  0x82   : > { %13159 = vst [vmem:[#allocation35_spill] sm:$0xff] %v7012_v20  ;;  %v1059_v0 = vsub.f32 %v7132_v48, %v12702_v59  ;;  %v7189_v12 = vsub.f32 %v5730_v62, %v5730_v62  ;;  %5910 = vmatpush.msk.msra.mxu0 %vm12721_vm6, %v12717_v25  ;;  %5926 = vmatpush.msk.msra.mxu3 %vm12721_vm6, %v12717_v25  ;;  %v12698_v29 = vand.u32 4294901760, %v7174_v61  ;;  %v5724_v33 = vsel %vm12699_vm11, 1.0, %v12738_v26 }
  0x83   : > { %13160 = vst [vmem:[#allocation36_spill] sm:$0xff] %v7015_v21  ;;  %vm12705_vm12 = vcmp.eq.s32.totalorder %v6998_v15, %v7003_v17  ;;  %1037 = vmatpush.msra.mxu1 %v1036_v52  ;;  %1138 = vmatpush.msra.mxu2 %v7119_v46  ;;  %v1054_v35 = vand.u32 4294901760, %v1053_v63  ;;  %v1065_v42 = vsub.f32 %v7153_v56, %v12701_v27  ;;  %v13189_v3 = vmov 0.0  }
  0x84   : > { %13161 = vst [vmem:[#allocation37_spill] sm:$0xff] %v7018_v22  ;;  %v1060_v40 = vand.u32 4294901760, %v1059_v0  ;;  %v7215_v43 = vsub.f32 %v5727_v28, %v5727_v28  ;;  %5911 = vmatpush.msk.msra.mxu0 %vm12720_vm7, %v12717_v25  ;;  %5927 = vmatpush.msk.msra.mxu3 %vm12720_vm7, %v12717_v25  ;;  %v7228_v44 = vsub.f32 %v7174_v61, %v12698_v29  ;;  %v12697_v47 = vand.u32 4294901760, %v7189_v12 }
  0x85   : > { %13162 = vst [vmem:[#allocation38_spill] sm:$0xff] %v7021_v23  ;;  %v7230_v45 = vsub.f32 %v5724_v33, %v5724_v33  ;;  %vm12710_vm13 = vcmp.eq.s32.totalorder %v7001_v16, %v7003_v17  ;;  %1043 = vmatpush.msra.mxu1 %v1042_v54  ;;  %1141 = vmatpush.msra.mxu2 %v7132_v48  ;;  %v1066_v50 = vand.u32 4294901760, %v1065_v42  ;;  %v5721_v51 = vsel %vm12705_vm12, 1.0, %v12738_v26 }
  0x86   : > { %13163 = vst [vmem:[#allocation39_spill] sm:$0xff] %v7024_v24  ;;  %vm12716_vm14 = vcmp.eq.s32.totalorder %v7006_v18, %v7003_v17  ;;  %v12696_v52 = vand.u32 4294901760, %v7215_v43  ;;  %5912 = vmatpush.msk.msra.mxu0 %vm12691_vm8, %v12717_v25  ;;  %5928 = vmatpush.msk.msra.mxu3 %vm12691_vm8, %v12717_v25  ;;  %v1072_v53 = vand.u32 4294901760, %v7228_v44  ;;  %v7255_v54 = vsub.f32 %v7189_v12, %v12697_v47 }
  0x87   : > { %v7257_v55 = vsub.f32 %v5721_v51, %v5721_v51  ;;  %v5718_v58 = vsel %vm12710_vm13, 1.0, %v12738_v26  ;;  %1049 = vmatpush.msra.mxu1 %v1048_v60  ;;  %1144 = vmatpush.msra.mxu2 %v7153_v56  ;;  %vm12719_vm15 = vcmp.eq.s32.totalorder %v6958_v1, %v7003_v17  ;;  %v12694_v0 = vand.u32 4294901760, %v7230_v45 }
  0x88   : > { %v7267_v62 = vsub.f32 %v7215_v43, %v12696_v52  ;;  %v7269_v63 = vsub.f32 %v5718_v58, %v5718_v58  ;;  %5913 = vmatpush.msk.msra.mxu0 %vm12692_vm9, %v12717_v25  ;;  %5929 = vmatpush.msk.msra.mxu3 %vm12692_vm9, %v12717_v25  ;;  %v1078_v60 = vand.u32 4294901760, %v7255_v54  ;;  %v5715_v28 = vsel %vm12716_vm14, 1.0, %v12738_v26 }
  0x89   : > { %vm12728_vm8 = vcmp.eq.s32.totalorder %v7009_v19, %v7003_v17  ;;  %v12693_v33 = vand.u32 4294901760, %v7257_v55  ;;  %1055 = vmatpush.msra.mxu1 %v1054_v35  ;;  %1147 = vmatpush.msra.mxu2 %v7174_v61  ;;  %v7295_v44 = vsub.f32 %v7230_v45, %v12694_v0  ;;  %v7297_v51 = vsub.f32 %v5715_v28, %v5715_v28 }
  0x8a   : > { %v1084_v42 = vand.u32 4294901760, %v7267_v62  ;;  %v5805_v54 = vsel %vm12728_vm8, 1.0, %v12738_v26  ;;  %5914 = vmatpush.msk.msra.mxu0 %vm12695_vm10, %v12717_v25  ;;  %5930 = vmatpush.msk.msra.mxu3 %vm12695_vm10, %v12717_v25  ;;  %v5712_v62 = vsel %vm12719_vm15, 1.0, %v12738_v26  ;;  %vm12730_vm9 = vcmp.eq.s32.totalorder %v7012_v20, %v7003_v17 }
  0x8b   : > { %v7311_v35 = vsub.f32 %v5805_v54, %v5805_v54  ;;  %v7316_v58 = vsub.f32 %v7257_v55, %v12693_v33  ;;  %1061 = vmatpush.msra.mxu1 %v1060_v40  ;;  %1150 = vmatpush.msra.mxu2 %v7189_v12  ;;  %v1090_v28 = vand.u32 4294901760, %v7295_v44  ;;  %v7326_v54 = vsub.f32 %v5712_v62, %v5712_v62 }
  0x8c   : > { %v5802_v33 = vsel %vm12730_vm9, 1.0, %v12738_v26  ;;  %v12700_v0 = vand.u32 4294901760, %v7269_v63  ;;  %5915 = vmatpush.msk.msra.mxu0 %vm12699_vm11, %v12717_v25  ;;  %5931 = vmatpush.msk.msra.mxu3 %vm12699_vm11, %v12717_v25  ;;  %vm12734_vm10 = vcmp.eq.s32.totalorder %v7015_v21, %v7003_v17  ;;  %v12706_v29 = vand.u32 4294901760, %v7297_v51 }
  0x8d   : > { %v12704_v40 = vand.u32 4294901760, %v7311_v35  ;;  %v7343_v62 = vsub.f32 %v5802_v33, %v5802_v33  ;;  %1067 = vmatpush.msra.mxu1 %v1066_v50  ;;  %1153 = vmatpush.msra.mxu2 %v7215_v43  ;;  %v5799_v47 = vsel %vm12734_vm10, 1.0, %v12738_v26  ;;  %vm483_vm11 = vcmp.eq.s32.totalorder %v7018_v22, %v7003_v17 }
  0x8e   : > { %v7351_v52 = vsub.f32 %v7269_v63, %v12700_v0  ;;  %5916 = vmatpush.msk.msra.mxu0 %vm12705_vm12, %v12717_v25  ;;  %5932 = vmatpush.msk.msra.mxu3 %vm12705_vm12, %v12717_v25  ;;  %v7372_v0 = vsub.f32 %v5799_v47, %v5799_v47  ;;  %v5796_v27 = vsel %vm483_vm11, 1.0, %v12738_v26  ;;  %v7383_v57 = vsub.f32 %v7297_v51, %v12706_v29 }
  0x8f   : > { %v1364_v50 = vsub.f32 %v7311_v35, %v12704_v40  ;;  %v12708_v33 = vand.u32 4294901760, %v7343_v62  ;;  %1073 = vmatpush.msra.mxu1 %v1072_v53  ;;  %1156 = vmatpush.msra.mxu2 %v7230_v45  ;;  %v7385_v40 = vsub.f32 %v5796_v27, %v5796_v27  ;;  %v12709_v47 = vand.u32 4294901760, %v7326_v54 }
  0x90   : > { %v1102_v59 = vand.u32 4294901760, %v7351_v52  ;;  %5917 = vmatpush.msk.msra.mxu0 %vm12710_vm13, %v12717_v25  ;;  %5933 = vmatpush.msk.msra.mxu3 %vm12710_vm13, %v12717_v25  ;;  %v12714_v27 = vand.u32 4294901760, %v7372_v0  ;;  %vm12742_vm12 = vcmp.eq.s32.totalorder %v7021_v23, %v7003_v17  ;;  %v1108_v29 = vand.u32 4294901760, %v7383_v57 }
  0x91   : > { %v1365_v52 = vand.u32 4294901760, %v1364_v50  ;;  %v1370_v53 = vsub.f32 %v7343_v62, %v12708_v33  ;;  %1079 = vmatpush.msra.mxu1 %v1078_v60  ;;  %1159 = vmatpush.msra.mxu2 %v7257_v55  ;;  %v12713_v49 = vand.u32 4294901760, %v7385_v40  ;;  %v7408_v50 = vsub.f32 %v7326_v54, %v12709_v47 }
  0x92   : > { %v5793_v33 = vsel %vm12742_vm12, 1.0, %v12738_v26  ;;  %5918 = vmatpush.msk.msra.mxu0 %vm12716_vm14, %v12717_v25  ;;  %5934 = vmatpush.msk.msra.mxu3 %vm12716_vm14, %v12717_v25  ;;  %v1376_v60 = vsub.f32 %v7372_v0, %v12714_v27  ;;  %vm477_vm13 = vcmp.eq.s32.totalorder %v7024_v24, %v7003_v17  ;;  %v7453_v27 = vadd.s32 192, %v6958_v1 }
  0x93   : > { %v1371_v57 = vand.u32 4294901760, %v1370_v53  ;;  %v7425_v47 = vsub.f32 %v5793_v33, %v5793_v33  ;;  %1085 = vmatpush.msra.mxu1 %v1084_v42  ;;  %1162 = vmatpush.msra.mxu2 %v7269_v63  ;;  %v1382_v41 = vsub.f32 %v7385_v40, %v12713_v49  ;;  %v1114_v39 = vand.u32 4294901760, %v7408_v50 }
  0x94   : > { %v5790_v53 = vsel %vm477_vm13, 1.0, %v12738_v26  ;;  %v7439_v33 = vadd.s32 200, %v6958_v1  ;;  %5919 = vmatpush.msk.msra.mxu0 %vm12719_vm15, %v12717_v25  ;;  %5935 = vmatpush.msk.msra.mxu3 %vm12719_vm15, %v12717_v25  ;;  %v1377_v42 = vand.u32 4294901760, %v1376_v60  ;;  %13167 = vst [vmem:[#allocation43_spill] sm:$0xff] %v7453_v27  ;;  %v7459_v44 = vadd.s32 184, %v6958_v1 }
  0x95   : > { %13164 = vst [vmem:[#allocation40_spill] sm:$0xff] %v7425_v47  ;;  %v12722_v50 = vand.u32 4294901760, %v7425_v47  ;;  %v7450_v49 = vsub.f32 %v5790_v53, %v5790_v53  ;;  %1091 = vmatpush.msra.mxu1 %v1090_v28  ;;  %1165 = vmatpush.msra.mxu2 %v7297_v51  ;;  %v1383_v37 = vand.u32 4294901760, %v1382_v41  ;;  %v7462_v25 = vadd.s32 176, %v6958_v1 }
  0x96   : > { %13165 = vst [vmem:[#allocation41_spill] sm:$0xff] %v7439_v33  ;;  %vm474_vm14 = vcmp.eq.s32.totalorder %v7439_v33, %v7003_v17  ;;  %1217 = vmatpush.msrb.mxu0 %v1022_v36  ;;  %1366 = vmatpush.msrb.mxu3 %v1365_v52  ;;  %vm471_vm15 = vcmp.eq.s32.totalorder %v7453_v27, %v7003_v17  ;;  %v13170_v53 = vand.u32 4294901760, %v7316_v58  ;;  %v13171_v52 = vand.u32 4294901760, %v7058_v31 }
  0x97   : > { %13166 = vst [vmem:[#allocation42_spill] sm:$0xff] %v7450_v49  ;;  %v1388_v28 = vsub.f32 %v7425_v47, %v12722_v50  ;;  %v12725_v60 = vand.u32 4294901760, %v7450_v49  ;;  %v5787_v41 = vsel %vm474_vm14, 1.0, %v12738_v26  ;;  %1168 = vmatpush.msra.mxu2 %v7326_v54  ;;  %v5784_v36 = vsel %vm471_vm15, 1.0, %v12738_v26 }
  0x98   : > { %13168 = vst [vmem:[#allocation44_spill] sm:$0xff] %v7459_v44  ;;  %1097 = vmatpush.msra.mxu1 %v13170_v53  ;;  %v7479_v30 = vsub.f32 %v5787_v41, %v5787_v41  ;;  %vm468_vm7 = vcmp.eq.s32.totalorder %v7459_v44, %v7003_v17  ;;  %vm465_vm6 = vcmp.eq.s32.totalorder %v7462_v25, %v7003_v17  ;;  %v13173_v47 = vmov 1.0  }
  0x99   : > { %13169 = vst [vmem:[#allocation45_spill] sm:$0xff] %v7462_v25  ;;  %1221 = vmatpush.msrb.mxu0 %v13171_v52  ;;  %1372 = vmatpush.msrb.mxu3 %v1371_v57  ;;  %v1389_v58 = vand.u32 4294901760, %v1388_v28  ;;  %v1394_v41 = vsub.f32 %v7450_v49, %v12725_v60  ;;  %v7494_v53 = vsub.f32 %v5784_v36, %v5784_v36  ;;  %v5781_v50 = vsel %vm468_vm7, 1.0, %v12738_v26 }
  0x9a   : > { %5952 = vmatpush.msk.msrb.mxu2 %vm12728_vm8, %v13173_v47  ;;  %1103 = vmatpush.msra.mxu1 %v1102_v59  ;;  %v12729_v31 = vand.u32 4294901760, %v7479_v30  ;;  %v7505_v57 = vsub.f32 %v5781_v50, %v5781_v50  ;;  %v5778_v28 = vsel %vm465_vm6, 1.0, %v12738_v26  ;;  %v7512_v36 = vadd.s32 168, %v6958_v1 }
  0x9b   : > { %13172 = vst [vmem:[#allocation46_spill] sm:$0xff] %v7494_v53  ;;  %v13175_v52 = vand.u32 4294901760, %v7060_v32  ;;  %1378 = vmatpush.msrb.mxu3 %v1377_v42  ;;  %v1395_v60 = vand.u32 4294901760, %v1394_v41  ;;  %v12731_v49 = vand.u32 4294901760, %v7494_v53  ;;  %v7517_v59 = vsub.f32 %v5778_v28, %v5778_v28 }
  0x9c   : > { %13174 = vst [vmem:[#allocation47_spill] sm:$0xff] %v7512_v36  ;;  %v7520_v50 = vadd.s32 160, %v6958_v1  ;;  %5953 = vmatpush.msk.msrb.mxu2 %vm12730_vm9, %v13173_v47  ;;  %1109 = vmatpush.msra.mxu1 %v1108_v29  ;;  %v1400_v32 = vsub.f32 %v7479_v30, %v12729_v31  ;;  %v12735_v42 = vand.u32 4294901760, %v7505_v57  ;;  %vm462_vm8 = vcmp.eq.s32.totalorder %v7512_v36, %v7003_v17 }
  0x9d   : > { %1225 = vmatpush.msrb.mxu0 %v13175_v52  ;;  %v7533_v41 = vadd.s32 152, %v6958_v1  ;;  %v13178_v28 = vand.u32 4294901760, %v7074_v34  ;;  %1384 = vmatpush.msrb.mxu3 %v1383_v37  ;;  %v1406_v29 = vsub.f32 %v7494_v53, %v12731_v49  ;;  %v5775_v31 = vsel %vm462_vm8, 1.0, %v12738_v26 }
  0x9e   : > { %13176 = vst [vmem:[#allocation48_spill] sm:$0xff] %v7520_v50  ;;  %vm459_vm9 = vcmp.eq.s32.totalorder %v7520_v50, %v7003_v17  ;;  %5954 = vmatpush.msk.msrb.mxu2 %vm12734_vm10, %v13173_v47  ;;  %1115 = vmatpush.msra.mxu1 %v1114_v39  ;;  %v1412_v34 = vsub.f32 %v7505_v57, %v12735_v42  ;;  %v13180_v49 = vand.u32 4294901760, %v7087_v38  ;;  %v1401_v52 = vand.u32 4294901760, %v1400_v32  ;;  %v975_v39 = vld [vmem:[%s6949_s23] sm:$0xff] }
  0x9f   : > { %13177 = vst [vmem:[#allocation49_spill] sm:$0xff] %v7533_v41  ;;  %1229 = vmatpush.msrb.mxu0 %v13178_v28  ;;  %v7554_v37 = vsub.f32 %v5775_v31, %v5775_v31  ;;  %v5772_v28 = vsel %vm459_vm9, 1.0, %v12738_v26  ;;  %1390 = vmatpush.msrb.mxu3 %v1389_v58  ;;  %vm456_vm10 = vcmp.eq.s32.totalorder %v7533_v41, %v7003_v17  ;;  %v1407_v38 = vand.u32 4294901760, %v1406_v29 }
  0xa0   : > { %v7562_v53 = vsub.f32 %v5772_v28, %v5772_v28  ;;  %5936 = vmatpush.msk.msrb.mxu1 %vm444_vm0, %v13173_v47  ;;  %5955 = vmatpush.msk.msrb.mxu2 %vm483_vm11, %v13173_v47  ;;  %v5769_v58 = vsel %vm456_vm10, 1.0, %v12738_v26  ;;  %v7581_v31 = vadd.s32 144, %v6958_v1  ;;  %v13182_v32 = vand.u32 4294901760, %v7119_v46 }
  0xa1   : > { %13179 = vst [vmem:[#allocation50_spill] sm:$0xff] %v7554_v37  ;;  %1233 = vmatpush.msrb.mxu0 %v13180_v49  ;;  %1396 = vmatpush.msrb.mxu3 %v1395_v60  ;;  %v13183_v28 = vand.u32 4294901760, %v7517_v59  ;;  %v7589_v2 = vsub.f32 %v5769_v58, %v5769_v58  ;;  %v7592_v49 = vadd.s32 136, %v6958_v1  ;;  %v1413_v46 = vand.u32 4294901760, %v1412_v34 }
  0xa2   : > { %13181 = vst [vmem:[#allocation51_spill] sm:$0xff] %v7581_v31  ;;  %5937 = vmatpush.msk.msrb.mxu1 %vm441_vm1, %v13173_v47  ;;  %5956 = vmatpush.msk.msrb.mxu2 %vm12742_vm12, %v13173_v47  ;;  %vm453_vm0 = vcmp.eq.s32.totalorder %v7581_v31, %v7003_v17  ;;  %v7605_v60 = vadd.s32 128, %v6958_v1  ;;  %v7607_v58 = vand.u32 4294901760, %v975_v39  ;;  %v13191_v26 = vand.u32 4294901760, %v7562_v53 }
  0xa3   : > { %1237 = vmatpush.msrb.mxu0 %v13182_v32  ;;  %v1418_v42 = vsub.f32 %v7517_v59, %v13183_v28  ;;  %13184 = vst [vmem:[#allocation52_spill] sm:$0xff] %v7592_v49  ;;  %v13187_v32 = vand.u32 4294901760, %v7132_v48  ;;  %1402 = vmatpush.msrb.mxu3 %v1401_v52  ;;  %v13188_v28 = vand.u32 4294901760, %v7554_v37  ;;  %v5766_v34 = vsel %vm453_vm0, 1.0, %v13189_v3 }
  0xa4   : > { %13185 = vst [vmem:[#allocation53_spill] sm:$0xff] %v7605_v60  ;;  %vm450_vm1 = vcmp.eq.s32.totalorder %v7592_v49, %v7003_v17  ;;  %5938 = vmatpush.msk.msrb.mxu1 %vm438_vm2, %v13173_v47  ;;  %5957 = vmatpush.msk.msrb.mxu2 %vm477_vm13, %v13173_v47  ;;  %v7629_v48 = vsub.f32 %v5766_v34, %v5766_v34  ;;  %v8194_v25 = vadd.s32 272, %v6958_v1  ;;  %v8295_v33 = vadd.s32 256, %v6958_v1 }
  0xa5   : > { %13186 = vst [vmem:[#allocation54_spill] sm:$0xff] %v7607_v58  ;;  %1241 = vmatpush.msrb.mxu0 %v13187_v32  ;;  %v1424_v29 = vsub.f32 %v7554_v37, %v13188_v28  ;;  %v5763_v52 = vsel %vm450_vm1, 1.0, %v13189_v3  ;;  %vm447_vm12 = vcmp.eq.s32.totalorder %v7605_v60, %v7003_v17  ;;  %v13190_v32 = vand.u32 4294901760, %v7153_v56  ;;  %1408 = vmatpush.msrb.mxu3 %v1407_v38 }
  0xa6   : > { %v1419_v28 = vand.u32 4294901760, %v1418_v42  ;;  %v1430_v4 = vsub.f32 %v7562_v53, %v13191_v26  ;;  %v7642_v37 = vsub.f32 %v5763_v52, %v5763_v52  ;;  %v5760_v34 = vsel %vm447_vm12, 1.0, %v13189_v3  ;;  %5939 = vmatpush.msk.msrb.mxu1 %vm435_vm3, %v13173_v47  ;;  %5958 = vmatpush.msk.msrb.mxu2 %vm474_vm14, %v13173_v47  ;;  %13265 = vst [vmem:[#allocation73_spill] sm:$0xff] %v8194_v25 }
  0xa7   : > { %1245 = vmatpush.msrb.mxu0 %v13190_v32  ;;  %v1441_v56 = vand.u32 4294901760, %v7629_v48  ;;  %v7657_v26 = vsub.f32 %v5760_v34, %v5760_v34  ;;  %v7660_v42 = vsub.f32 %v975_v39, %v7607_v58  ;;  %v13193_v38 = vand.u32 4294901760, %v7174_v61  ;;  %1414 = vmatpush.msrb.mxu3 %v1413_v46  ;;  %13274 = vst [vmem:[#allocation79_spill] sm:$0xff] %v8295_v33 }
  0xa8   : > { %v1425_v52 = vand.u32 4294901760, %v1424_v29  ;;  %v13194_v32 = vand.u32 4294901760, %v7589_v2  ;;  %v1447_v3 = vand.u32 4294901760, %v7642_v37  ;;  %5940 = vmatpush.msk.msrb.mxu1 %vm432_vm4, %v13173_v47  ;;  %5959 = vmatpush.msk.msrb.mxu2 %vm471_vm15, %v13173_v47  ;;  %v13195_v61 = vand.u32 4294901760, %v7189_v12 }
  0xa9   : > { %13192 = vst [vmem:[#allocation55_spill] sm:$0xff] %v7660_v42  ;;  %1249 = vmatpush.msrb.mxu0 %v13193_v38  ;;  %1420 = vmatpush.msrb.mxu3 %v1419_v28  ;;  %v1431_v39 = vand.u32 4294901760, %v1430_v4  ;;  %v1442_v29 = vsub.f32 %v7629_v48, %v1441_v56  ;;  %v12750_v46 = vand.u32 4294901760, %v7657_v26  ;;  %v7691_v12 = vand.u32 4294901760, %v7660_v42 }
  0xaa   : > { %v1436_v5 = vsub.f32 %v7589_v2, %v13194_v32  ;;  %5941 = vmatpush.msk.msrb.mxu1 %vm429_vm5, %v13173_v47  ;;  %5960 = vmatpush.msk.msrb.mxu2 %vm468_vm7, %v13173_v47  ;;  %v13197_v4 = vand.u32 4294901760, %v7215_v43  ;;  %v1448_v34 = vsub.f32 %v7642_v37, %v1447_v3  ;;  %vm13198_vm2 = vcmp.eq.s32.totalorder %v6979_v8, %v7003_v17 }
  0xab   : > { %1253 = vmatpush.msrb.mxu0 %v13195_v61  ;;  %13196 = vst [vmem:[#allocation56_spill] sm:$0xff] %v7691_v12  ;;  %1426 = vmatpush.msrb.mxu3 %v1425_v52  ;;  %v13199_v38 = vand.u32 4294901760, %v7230_v45  ;;  %v1443_v43 = vand.u32 4294901760, %v1442_v29  ;;  %v976_v52 = vld [vmem:[%s6949_s23 + $0x8] sm:$0xff]  ;;  %vm13200_vm3 = vcmp.eq.s32.totalorder %v6982_v9, %v7003_v17  ;;  %v1014_v45 = vsub.f32 %v7660_v42, %v7691_v12 }
  0xac   : > { %v1437_v28 = vand.u32 4294901760, %v1436_v5  ;;  %5942 = vmatpush.msk.msrb.mxu1 %vm13198_vm2, %v13173_v47  ;;  %5961 = vmatpush.msk.msrb.mxu2 %vm465_vm6, %v13173_v47  ;;  %v1454_v5 = vsub.f32 %v7657_v26, %v12750_v46  ;;  %v13201_v32 = vand.u32 4294901760, %v7257_v55  ;;  %v1449_v61 = vand.u32 4294901760, %v1448_v34 }
  0xad   : > { %1257 = vmatpush.msrb.mxu0 %v13197_v4  ;;  %1432 = vmatpush.msrb.mxu3 %v1431_v39  ;;  %vm13202_vm4 = vcmp.eq.s32.totalorder %v6985_v10, %v7003_v17  ;;  %v7732_v39 = vand.u32 4294901760, %v976_v52  ;;  %v13204_v29 = vand.u32 4294901760, %v7269_v63  ;;  %vm13205_vm5 = vcmp.eq.s32.totalorder %v6988_v11, %v7003_v17 }
  0xae   : > { %5943 = vmatpush.msk.msrb.mxu1 %vm13200_vm3, %v13173_v47  ;;  %5962 = vmatpush.msk.msrb.mxu2 %vm462_vm8, %v13173_v47  ;;  %v1455_v55 = vand.u32 4294901760, %v1454_v5  ;;  %v7744_v4 = vand.u32 4294901760, %v1014_v45  ;;  %vm13208_vm2 = vcmp.eq.s32.totalorder %v6992_v13, %v7003_v17  ;;  %v13210_v34 = vand.u32 4294901760, %v7326_v54 }
  0xaf   : > { %1261 = vmatpush.msrb.mxu0 %v13199_v38  ;;  %1438 = vmatpush.msrb.mxu3 %v1437_v28  ;;  %13203 = vst [vmem:[#allocation57_spill] sm:$0xff] %v7732_v39  ;;  %v13207_v28 = vand.u32 4294901760, %v7297_v51  ;;  %v7757_v63 = vsub.f32 %v976_v52, %v7732_v39  ;;  %vm13211_vm3 = vcmp.eq.s32.totalorder %v6995_v14, %v7003_v17  ;;  %v13217_v54 = vand.u32 4294901760, %v7311_v35  ;;  %v13228_v52 = vld [vmem:[#allocation42_spill] sm:$0xff] }
  0xb0   : > { %5944 = vmatpush.msk.msrb.mxu1 %vm13202_vm4, %v13173_v47  ;;  %5963 = vmatpush.msk.msrb.mxu2 %vm459_vm9, %v13173_v47  ;;  %13206 = vst [vmem:[#allocation58_spill] sm:$0xff] %v7744_v4  ;;  %vm13212_vm4 = vcmp.eq.s32.totalorder %v7009_v19, %v7003_v17  ;;  %v8366_v14 = vadd.s32 456, %v6958_v1  ;;  %v8414_v10 = vadd.s32 448, %v6958_v1 }
  0xb1   : > { %1265 = vmatpush.msrb.mxu0 %v13201_v32  ;;  %1444 = vmatpush.msrb.mxu3 %v1443_v43  ;;  %13209 = vst [vmem:[#allocation59_spill] sm:$0xff] %v7757_v63  ;;  %v7777_v51 = vand.u32 4294901760, %v7757_v63  ;;  %v13220_v43 = vand.u32 4294901760, %v7343_v62  ;;  %v13233_v32 = vld [vmem:[#allocation46_spill] sm:$0xff] }
  0xb2   : > { %5945 = vmatpush.msk.msrb.mxu1 %vm13205_vm5, %v13173_v47  ;;  %5964 = vmatpush.msk.msrb.mxu2 %vm456_vm10, %v13173_v47  ;;  %vm13214_vm5 = vcmp.eq.s32.totalorder %v6998_v15, %v7003_v17  ;;  %13281 = vst [vmem:[#allocation85_spill] sm:$0xff] %v8366_v14 }
  0xb3   : > { %1269 = vmatpush.msrb.mxu0 %v13204_v29  ;;  %1450 = vmatpush.msrb.mxu3 %v1449_v61  ;;  %13213 = vst [vmem:[#allocation60_spill] sm:$0xff] %v7777_v51  ;;  %v1355_v38 = vsub.f32 %v7757_v63, %v7777_v51  ;;  %v13234_v61 = vand.u32 4294901760, %v7479_v30  ;;  %v7875_v29 = vadd.s32 376, %v6958_v1 }
  0xb4   : > { %5946 = vmatpush.msk.msrb.mxu1 %vm13208_vm2, %v13173_v47  ;;  %5965 = vmatpush.msk.msrb.mxu2 %vm453_vm0, %v13173_v47  ;;  %vm13215_vm2 = vcmp.eq.s32.totalorder %v7012_v20, %v7003_v17  ;;  %13286 = vst [vmem:[#allocation89_spill] sm:$0xff] %v8414_v10 }
  0xb5   : > { %1273 = vmatpush.msrb.mxu0 %v13207_v28  ;;  %1456 = vmatpush.msrb.mxu3 %v1455_v55  ;;  %v7824_v5 = vand.u32 4294901760, %v1355_v38  ;;  %v13236_v55 = vand.u32 4294901760, %v13233_v32  ;;  %v13238_v28 = vand.u32 4294901760, %v7505_v57  ;;  %v7913_v38 = vadd.s32 352, %v6958_v1 }
  0xb6   : > { %1016 = vmatmul.f32.vlgmr.msra.gmra.mxu0 %v7744_v4  ;;  %1210 = vmatmul.f32.vlgmr.msra.gmra.mxu3 %v7691_v12 }
  0xb7   : > { %1277 = vmatpush.msrb.mxu0 %v13210_v34  ;;  %5947 = vmatpush.msk.msrb.mxu1 %vm13211_vm3, %v13173_v47  ;;  %vm13216_vm3 = vcmp.eq.s32.totalorder %v7001_v16, %v7003_v17  ;;  %13223 = vst [vmem:[#allocation61_spill] sm:$0xff] %v7824_v5  ;;  %v7905_v34 = vadd.s32 360, %v6958_v1 }
  0xb8   : > { %5966 = vmatpush.msk.msrb.mxu2 %vm450_vm1, %v13173_v47  ;;  %5984 = vmatpush.msk.msra.mxu3 %vm13212_vm4, %v13173_v47  ;;  %vm13218_vm4 = vcmp.eq.s32.totalorder %v7015_v21, %v7003_v17 }
  0xb9   : > { %1464 = vmatpush.msra.mxu0 %v7311_v35  ;;  %5948 = vmatpush.msk.msrb.mxu1 %vm13214_vm5, %v13173_v47  ;;  %vm13219_vm5 = vcmp.eq.s32.totalorder %v7006_v18, %v7003_v17  ;;  %v13221_v35 = vand.u32 4294901760, %v7372_v0  ;;  %13239 = vst [vmem:[#allocation46_spill] sm:$0xff] %v7905_v34 }
  0xba   : > { %5967 = vmatpush.msk.msrb.mxu2 %vm447_vm12, %v13173_v47  ;;  %5985 = vmatpush.msk.msra.mxu3 %vm13215_vm2, %v13173_v47  ;;  %vm13222_vm2 = vcmp.eq.s32.totalorder %v6958_v1, %v7003_v17 }
  0xbb   : > { %1467 = vmatpush.msra.mxu0 %v7343_v62  ;;  %1171 = vmatmul.f32.vlgmr.msra.gmra.mxu2 %v7660_v42  ;;  %v13224_v62 = vld [vmem:[#allocation40_spill] sm:$0xff] }
  0xbc   : > { %5949 = vmatpush.msk.msrb.mxu1 %vm13216_vm3, %v13173_v47  ;;  %1558 = vmatpush.msra.mxu2 %v13217_v54  ;;  %vm13225_vm3 = vcmp.eq.s32.totalorder %v7021_v23, %v7003_v17  ;;  %v13230_v45 = vand.u32 4294901760, %v13224_v62  ;;  %13235 = vst [vmem:[#allocation40_spill] sm:$0xff] %v7875_v29  ;;  %v13240_v54 = vld [vmem:[#allocation50_spill] sm:$0xff]  ;;  %v977_v42 = vld [vmem:[%s6949_s23 + $0x10] sm:$0xff] }
  0xbd   : > { %1470 = vmatpush.msra.mxu0 %v7372_v0  ;;  %5986 = vmatpush.msk.msra.mxu3 %vm13218_vm4, %v13173_v47  ;;  %vm13226_vm4 = vcmp.eq.s32.totalorder %v7009_v19, %v7003_v17  ;;  %v13227_v0 = vand.u32 4294901760, %v7385_v40  ;;  %13241 = vst [vmem:[#allocation50_spill] sm:$0xff] %v7913_v38  ;;  %v8175_v41 = vand.u32 4294901760, %v977_v42 }
  0xbe   : > { %5950 = vmatpush.msk.msrb.mxu1 %vm13219_vm5, %v13173_v47  ;;  %1562 = vmatpush.msra.mxu2 %v13220_v43  ;;  %vm13229_vm5 = vcmp.eq.s32.totalorder %v7012_v20, %v7003_v17  ;;  %v7916_v43 = vadd.s32 344, %v6958_v1 }
  0xbf   : > { %1473 = vmatpush.msra.mxu0 %v7385_v40  ;;  %5987 = vmatpush.msk.msra.mxu3 %vm483_vm11, %v13173_v47  ;;  %v13232_v40 = vand.u32 4294901760, %v13228_v52  ;;  %13262 = vst [vmem:[#allocation71_spill] sm:$0xff] %v8175_v41 }
  0xc0   : > { %1117 = vmatmul.f32.vlgmr.msra.gmra.mxu1 %v7607_v58  ;;  %1566 = vmatpush.msra.mxu2 %v13221_v35  ;;  %13242 = vst [vmem:[#allocation62_spill] sm:$0xff] %v7916_v43  ;;  %v7925_v35 = vadd.s32 336, %v6958_v1 }
  0xc1   : > { %5951 = vmatpush.msk.msrb.mxu1 %vm13222_vm2, %v13173_v47  ;;  %1476 = vmatpush.msra.mxu0 %v13224_v62  ;;  %vm13231_vm2 = vcmp.eq.s32.totalorder %v7015_v21, %v7003_v17  ;;  %v13245_v62 = vmov 0.0  }
  0xc2   : > { %5988 = vmatpush.msk.msra.mxu3 %vm13225_vm3, %v13173_v47  ;;  %1570 = vmatpush.msra.mxu2 %v13227_v0  ;;  %13244 = vst [vmem:[#allocation63_spill] sm:$0xff] %v7925_v35 }
  0xc3   : > { %5968 = vmatpush.msk.msra.mxu1 %vm13226_vm4, %v13173_v47  ;;  %1479 = vmatpush.msra.mxu0 %v13228_v52  ;;  %v7947_v52 = vadd.s32 328, %v6958_v1  ;;  %vm531_vm4 = vcmp.eq.s32.totalorder %v7913_v38, %v7003_v17 }
  0xc4   : > { %5989 = vmatpush.msk.msra.mxu3 %vm477_vm13, %v13173_v47  ;;  %1357 = vmatmul.f32.vlgmr.msrb.gmra.mxu2 %v7824_v5 }
  0xc5   : > { %5969 = vmatpush.msk.msra.mxu1 %vm13229_vm5, %v13173_v47  ;;  %1574 = vmatpush.msra.mxu2 %v13230_v45  ;;  %13247 = vst [vmem:[#allocation64_spill] sm:$0xff] %v7947_v52  ;;  %v7959_v45 = vadd.s32 320, %v6958_v1  ;;  %vm12809_vm5 = vcmp.eq.s32.totalorder %v7925_v35, %v7003_v17 }
  0xc6   : > { %1482 = vmatpush.msra.mxu0 %v7479_v30  ;;  %5990 = vmatpush.msk.msra.mxu3 %vm474_vm14, %v13173_v47  ;;  %v7894_v30 = vadd.s32 368, %v6958_v1 }
  0xc7   : > { %1279 = vmatmul.f32.vlgmr.msrb.gmra.mxu0 %v7607_v58  ;;  %1458 = vmatmul.f32.vlgmr.msrb.gmra.mxu3 %v7732_v39  ;;  %13248 = vst [vmem:[#allocation65_spill] sm:$0xff] %v7959_v45 }
  0xc8   : > { %5970 = vmatpush.msk.msra.mxu1 %vm13231_vm2, %v13173_v47  ;;  %1578 = vmatpush.msra.mxu2 %v13232_v40  ;;  %13237 = vst [vmem:[#allocation42_spill] sm:$0xff] %v7894_v30  ;;  %v13249_v40 = vand.u32 4294901760, %v7562_v53  ;;  %vm12838_vm2 = vcmp.eq.s32.totalorder %v8194_v25, %v7003_v17 }
  0xc9   : > { %1485 = vmatpush.msra.mxu0 %v13233_v32  ;;  %5991 = vmatpush.msk.msra.mxu3 %vm471_vm15, %v13173_v47 }
  0xca   : > { %1316 = vmatmul.f32.vlgmr.msrb.gmra.mxu1 %v7607_v58  ;;  %1582 = vmatpush.msra.mxu2 %v13234_v61  ;;  %v8168_v58 = vadd.s32 280, %v6958_v1 }
  0xcb   : > { %5971 = vmatpush.msk.msra.mxu1 %vm483_vm11, %v13173_v47  ;;  %1488 = vmatpush.msra.mxu0 %v7505_v57  ;;  %vm540_vm11 = vcmp.eq.s32.totalorder %v7875_v29, %v7003_v17  ;;  %v13243_v57 = vand.u32 4294901760, %v7517_v59 }
  0xcc   : > { %5992 = vmatpush.msk.msra.mxu3 %vm468_vm7, %v13173_v47  ;;  %1586 = vmatpush.msra.mxu2 %v13236_v55  ;;  %v5853_v0 = vsel %vm540_vm11, 1.0, %v13245_v62  ;;  %v7985_v55 = vadd.s32 312, %v6958_v1  ;;  %13261 = vst [vmem:[#allocation70_spill] sm:$0xff] %v8168_v58 }
  0xcd   : > { %5972 = vmatpush.msk.msra.mxu1 %vm13225_vm3, %v13173_v47  ;;  %1491 = vmatpush.msra.mxu0 %v7517_v59  ;;  %v13246_v59 = vand.u32 4294901760, %v13240_v54  ;;  %v7967_v32 = vsub.f32 %v5853_v0, %v5853_v0  ;;  %v5838_v0 = vsel %vm12809_vm5, 1.0, %v13245_v62 }
  0xce   : > { %5993 = vmatpush.msk.msra.mxu3 %vm465_vm6, %v13173_v47  ;;  %1590 = vmatpush.msra.mxu2 %v13238_v28  ;;  %13250 = vst [vmem:[#allocation66_spill] sm:$0xff] %v7985_v55  ;;  %v13251_v28 = vand.u32 4294901760, %v7589_v2 }
  0xcf   : > { %5973 = vmatpush.msk.msra.mxu1 %vm477_vm13, %v13173_v47  ;;  %1494 = vmatpush.msra.mxu0 %v13240_v54  ;;  %vm537_vm13 = vcmp.eq.s32.totalorder %v7894_v30, %v7003_v17  ;;  %v5844_v54 = vsel %vm531_vm4, 1.0, %v13245_v62  ;;  %v13419_v30 = vld [vmem:[#allocation45_spill] sm:$0xff] }
  0xd0   : > { %5994 = vmatpush.msk.msra.mxu3 %vm462_vm8, %v13173_v47  ;;  %1594 = vmatpush.msra.mxu2 %v13243_v57  ;;  %v5850_v61 = vsel %vm537_vm13, 1.0, %v13245_v62 }
  0xd1   : > { %5974 = vmatpush.msk.msra.mxu1 %vm474_vm14, %v13173_v47  ;;  %1497 = vmatpush.msra.mxu0 %v7562_v53  ;;  %vm534_vm14 = vcmp.eq.s32.totalorder %v7905_v34, %v7003_v17 }
  0xd2   : > { %5995 = vmatpush.msk.msra.mxu3 %vm459_vm9, %v13173_v47  ;;  %1598 = vmatpush.msra.mxu2 %v13246_v59  ;;  %v5847_v53 = vsel %vm534_vm14, 1.0, %v13245_v62 }
  0xd3   : > { %5975 = vmatpush.msk.msra.mxu1 %vm471_vm15, %v13173_v47  ;;  %1500 = vmatpush.msra.mxu0 %v7589_v2  ;;  %vm528_vm15 = vcmp.eq.s32.totalorder %v7916_v43, %v7003_v17  ;;  %v8008_v2 = vsub.f32 %v5850_v61, %v5850_v61  ;;  %v8022_v59 = vsub.f32 %v5847_v53, %v5847_v53  ;;  %v8026_v61 = vadd.s32 304, %v6958_v1 }
  0xd4   : > { %5996 = vmatpush.msk.msra.mxu3 %vm456_vm10, %v13173_v47  ;;  %1602 = vmatpush.msra.mxu2 %v13249_v40  ;;  %v5841_v57 = vsel %vm528_vm15, 1.0, %v13245_v62  ;;  %v12755_v40 = vand.u32 4294901760, %v7967_v32 }
  0xd5   : > { %5976 = vmatpush.msk.msra.mxu1 %vm468_vm7, %v13173_v47  ;;  %1503 = vmatpush.msra.mxu0 %v7629_v48  ;;  %vm12797_vm7 = vcmp.eq.s32.totalorder %v7947_v52, %v7003_v17  ;;  %13252 = vst [vmem:[#allocation67_spill] sm:$0xff] %v8026_v61  ;;  %v8035_v46 = vsub.f32 %v5841_v57, %v5841_v57  ;;  %v8062_v57 = vadd.s32 296, %v6958_v1 }
  0xd6   : > { %5997 = vmatpush.msk.msra.mxu3 %vm453_vm0, %v13173_v47  ;;  %1606 = vmatpush.msra.mxu2 %v13251_v28  ;;  %v8033_v28 = vsub.f32 %v5844_v54, %v5844_v54  ;;  %v5835_v48 = vsel %vm12797_vm7, 1.0, %v13245_v62  ;;  %v13254_v54 = vand.u32 4294901760, %v7657_v26 }
  0xd7   : > { %5977 = vmatpush.msk.msra.mxu1 %vm465_vm6, %v13173_v47  ;;  %1506 = vmatpush.msra.mxu0 %v7642_v37  ;;  %vm12796_vm6 = vcmp.eq.s32.totalorder %v7959_v45, %v7003_v17  ;;  %13253 = vst [vmem:[#allocation68_spill] sm:$0xff] %v8062_v57  ;;  %v8073_v37 = vsub.f32 %v5835_v48, %v5835_v48 }
  0xd8   : > { %5998 = vmatpush.msk.msra.mxu3 %vm450_vm1, %v13173_v47  ;;  %1610 = vmatpush.msra.mxu2 %v1441_v56  ;;  %v8048_v56 = vsub.f32 %v5838_v0, %v5838_v0  ;;  %v5832_v53 = vsel %vm12796_vm6, 1.0, %v13245_v62  ;;  %v1705_v48 = vsub.f32 %v7967_v32, %v12755_v40  ;;  %v8117_v40 = vadd.s32 288, %v6958_v1 }
  0xd9   : > { %5978 = vmatpush.msk.msra.mxu1 %vm462_vm8, %v13173_v47  ;;  %1509 = vmatpush.msra.mxu0 %v7657_v26  ;;  %vm12808_vm8 = vcmp.eq.s32.totalorder %v7985_v55, %v7003_v17  ;;  %v8092_v5 = vsub.f32 %v5832_v53, %v5832_v53  ;;  %v13258_v4 = vand.u32 4294901760, %v8033_v28  ;;  %v13264_v36 = vand.u32 4294901760, %v8073_v37 }
  0xda   : > { %5999 = vmatpush.msk.msra.mxu3 %vm447_vm12, %v13173_v47  ;;  %1512 = vmatmul.f32.vlgmr.msra.gmra.mxu0 %v7757_v63  ;;  %v5829_v0 = vsel %vm12808_vm8, 1.0, %v13245_v62  ;;  %13255 = vst [vmem:[#allocation69_spill] sm:$0xff] %v8117_v40  ;;  %v13257_v63 = vand.u32 4294901760, %v8022_v59  ;;  %v1706_v12 = vand.u32 4294901760, %v1705_v48 }
  0xdb   : > { %5979 = vmatpush.msk.msra.mxu1 %vm459_vm9, %v13173_v47  ;;  %1614 = vmatpush.msra.mxu2 %v1447_v3  ;;  %vm12810_vm9 = vcmp.eq.s32.totalorder %v8026_v61, %v7003_v17  ;;  %v8108_v53 = vsub.f32 %v5829_v0, %v5829_v0  ;;  %v13256_v0 = vand.u32 4294901760, %v8008_v2  ;;  %v8140_v31 = vsub.f32 %v8033_v28, %v13258_v4 }
  0xdc   : > { %6000 = vmatpush.msk.msrb.mxu0 %vm540_vm11, %v13173_v47  ;;  %6016 = vmatpush.msk.msrb.mxu3 %vm540_vm11, %v13173_v47  ;;  %v1717_v3 = vsub.f32 %v8022_v59, %v13257_v63  ;;  %v13260_v4 = vand.u32 4294901760, %v8048_v56 }
  0xdd   : > { %5980 = vmatpush.msk.msra.mxu1 %vm456_vm10, %v13173_v47  ;;  %1618 = vmatpush.msra.mxu2 %v13254_v54  ;;  %vm12821_vm10 = vcmp.eq.s32.totalorder %v8062_v57, %v7003_v17  ;;  %v5826_v54 = vsel %vm12810_vm9, 1.0, %v13245_v62  ;;  %v1711_v26 = vsub.f32 %v8008_v2, %v13256_v0  ;;  %v13259_v0 = vand.u32 4294901760, %v8035_v46 }
  0xde   : > { %6001 = vmatpush.msk.msrb.mxu0 %vm537_vm13, %v13173_v47  ;;  %6017 = vmatpush.msk.msrb.mxu3 %vm537_vm13, %v13173_v47  ;;  %v8159_v48 = vsub.f32 %v8048_v56, %v13260_v4  ;;  %v8161_v49 = vsub.f32 %v5826_v54, %v5826_v54  ;;  %v8178_v54 = vadd.s32 504, %v6958_v1  ;;  %v1718_v50 = vand.u32 4294901760, %v1717_v3 }
  0xdf   : > { %1805 = vmatpush.msrb.mxu2 %v7967_v32  ;;  %5981 = vmatpush.msk.msra.mxu1 %vm453_vm0, %v13173_v47  ;;  %v8145_v63 = vsub.f32 %v8035_v46, %v13259_v0  ;;  %v5823_v0 = vsel %vm12821_vm10, 1.0, %v13245_v62  ;;  %vm12826_vm0 = vcmp.eq.s32.totalorder %v8117_v40, %v7003_v17  ;;  %v8191_v4 = vsub.f32 %v8073_v37, %v13264_v36 }
  0xe0   : > { %6002 = vmatpush.msk.msrb.mxu0 %vm534_vm14, %v13173_v47  ;;  %6018 = vmatpush.msk.msrb.mxu3 %vm534_vm14, %v13173_v47  ;;  %13263 = vst [vmem:[#allocation72_spill] sm:$0xff] %v8178_v54  ;;  %v1724_v60 = vand.u32 4294901760, %v8140_v31  ;;  %v13266_v3 = vand.u32 4294901760, %v8092_v5  ;;  %v8208_v36 = vsub.f32 %v5823_v0, %v5823_v0  ;;  %v5820_v31 = vsel %vm12826_vm0, 1.0, %v13245_v62 }
  0xe1   : > { %1620 = vmatmul.f32.vlgmr.msra.gmra.mxu2 %v7732_v39  ;;  %5982 = vmatpush.msk.msra.mxu1 %vm450_vm1, %v13173_v47  ;;  %v13268_v0 = vand.u32 4294901760, %v8108_v53  ;;  %vm12857_vm1 = vcmp.eq.s32.totalorder %v8178_v54, %v7003_v17  ;;  %v1742_v27 = vand.u32 4294901760, %v8191_v4  ;;  %v13272_v24 = vand.u32 4294901760, %v8161_v49 }
  0xe2   : > { %1808 = vmatpush.msrb.mxu2 %v8008_v2  ;;  %6003 = vmatpush.msk.msrb.mxu0 %vm531_vm4, %v13173_v47  ;;  %v8206_v44 = vsub.f32 %v8092_v5, %v13266_v3  ;;  %v13301_v57 = vand.u32 4294901760, %v7967_v32 }
  0xe3   : > { %6019 = vmatpush.msk.msrb.mxu3 %vm531_vm4, %v13173_v47  ;;  %5983 = vmatpush.msk.msra.mxu1 %vm447_vm12, %v13173_v47  ;;  %vm12835_vm12 = vcmp.eq.s32.totalorder %v8168_v58, %v7003_v17  ;;  %v8233_v3 = vsub.f32 %v8108_v53, %v13268_v0  ;;  %v8248_v0 = vadd.s32 488, %v6958_v1  ;;  %v8270_v23 = vsub.f32 %v8161_v49, %v13272_v24 }
  0xe4   : > { %1657 = vmatmul.f32.vlgmr.msra.gmra.mxu3 %v7732_v39  ;;  %1811 = vmatpush.msrb.mxu2 %v8022_v59  ;;  %v1712_v39 = vand.u32 4294901760, %v1711_v26  ;;  %v1730_v26 = vand.u32 4294901760, %v8145_v63  ;;  %v8236_v63 = vsub.f32 %v977_v42, %v8175_v41  ;;  %v5817_v4 = vsel %vm12835_vm12, 1.0, %v13245_v62 }
  0xe5   : > { %6004 = vmatpush.msk.msrb.mxu0 %vm528_vm15, %v13173_v47  ;;  %6020 = vmatpush.msk.msrb.mxu3 %vm528_vm15, %v13173_v47  ;;  %13271 = vst [vmem:[#allocation77_spill] sm:$0xff] %v8248_v0  ;;  %v8279_v42 = vadd.s32 480, %v6958_v1  ;;  %v8301_v18 = vsub.f32 %v5817_v4, %v5817_v4  ;;  %v8308_v24 = vadd.s32 472, %v6958_v1  ;;  %v1760_v15 = vand.u32 4294901760, %v8270_v23 }
  0xe6   : > { %1551 = vmatmul.f32.vlgmr.msra.gmra.mxu1 %v7777_v51  ;;  %1814 = vmatpush.msrb.mxu2 %v8033_v28  ;;  %v8219_v51 = vadd.s32 496, %v6958_v1  ;;  %13269 = vst [vmem:[#allocation75_spill] sm:$0xff] %v8236_v63  ;;  %v8298_v22 = vand.u32 4294901760, %v8236_v63  ;;  %v13287_v13 = vand.u32 4294901760, %v8206_v44  ;;  %v13292_v6 = vand.u32 4294901760, %v8233_v3 }
  0xe7   : > { %1707 = vmatpush.msrb.mxu1 %v1706_v12  ;;  %6005 = vmatpush.msk.msrb.mxu0 %vm12809_vm5, %v13173_v47  ;;  %v1736_v12 = vand.u32 4294901760, %v8159_v48  ;;  %v8245_v48 = vadd.s32 264, %v6958_v1  ;;  %13273 = vst [vmem:[#allocation78_spill] sm:$0xff] %v8279_v42  ;;  %v13288_v8 = vand.u32 4294901760, %v8301_v18  ;;  %v8473_v3 = vadd.s32 432, %v6958_v1 }
  0xe8   : > { %13267 = vst [vmem:[#allocation74_spill] sm:$0xff] %v8219_v51  ;;  %6021 = vmatpush.msk.msrb.mxu3 %vm12809_vm5, %v13173_v47  ;;  %1817 = vmatpush.msrb.mxu2 %v8035_v46  ;;  %vm12859_vm3 = vcmp.eq.s32.totalorder %v8219_v51, %v7003_v17  ;;  %vm12852_vm5 = vcmp.eq.s32.totalorder %v8295_v33, %v7003_v17 }
  0xe9   : > { %1713 = vmatpush.msrb.mxu1 %v1712_v39  ;;  %13270 = vst [vmem:[#allocation76_spill] sm:$0xff] %v8245_v48  ;;  %6006 = vmatpush.msk.msrb.mxu0 %vm12797_vm7, %v13173_v47  ;;  %v8259_v39 = vsub.f32 %v5820_v31, %v5820_v31  ;;  %v5901_v31 = vsel %vm12857_vm1, 1.0, %v13245_v62  ;;  %v5898_v20 = vsel %vm12859_vm3, 1.0, %v13245_v62  ;;  %v1696_v23 = vsub.f32 %v8236_v63, %v8298_v22 }
  0xea   : > { %6022 = vmatpush.msk.msrb.mxu3 %vm12797_vm7, %v13173_v47  ;;  %1820 = vmatpush.msrb.mxu2 %v8048_v56  ;;  %13275 = vst [vmem:[#allocation80_spill] sm:$0xff] %v8298_v22  ;;  %vm12863_vm7 = vcmp.eq.s32.totalorder %v8248_v0, %v7003_v17  ;;  %v8324_v16 = vsub.f32 %v5901_v31, %v5901_v31 }
  0xeb   : > { %1719 = vmatpush.msrb.mxu1 %v1718_v50  ;;  %6007 = vmatpush.msk.msrb.mxu0 %vm12796_vm6, %v13173_v47  ;;  %v5814_v50 = vsel %vm12838_vm2, 1.0, %v13245_v62  ;;  %13276 = vst [vmem:[#allocation81_spill] sm:$0xff] %v8308_v24  ;;  %v5895_v31 = vsel %vm12863_vm7, 1.0, %v13245_v62  ;;  %v8361_v21 = vsub.f32 %v5898_v20, %v5898_v20  ;;  %v13282_v20 = vand.u32 4294901760, %v8259_v39 }
  0xec   : > { %6023 = vmatpush.msk.msrb.mxu3 %vm12796_vm6, %v13173_v47  ;;  %1823 = vmatpush.msrb.mxu2 %v8073_v37  ;;  %vm12843_vm6 = vcmp.eq.s32.totalorder %v8245_v48, %v7003_v17  ;;  %13278 = vst [vmem:[#allocation82_spill] sm:$0xff] %v8324_v16  ;;  %v8332_v19 = vsub.f32 %v5814_v50, %v5814_v50 }
  0xed   : > { %1725 = vmatpush.msrb.mxu1 %v1724_v60  ;;  %6008 = vmatpush.msk.msrb.mxu0 %vm12808_vm8, %v13173_v47  ;;  %v13277_v60 = vand.u32 4294901760, %v8208_v36  ;;  %13280 = vst [vmem:[#allocation84_spill] sm:$0xff] %v8361_v21  ;;  %v8380_v50 = vsub.f32 %v8259_v39, %v13282_v20  ;;  %v8393_v9 = vsub.f32 %v5895_v31, %v5895_v31 }
  0xee   : > { %6024 = vmatpush.msk.msrb.mxu3 %vm12808_vm8, %v13173_v47  ;;  %1826 = vmatpush.msrb.mxu2 %v8092_v5  ;;  %vm579_vm8 = vcmp.eq.s32.totalorder %v8279_v42, %v7003_v17  ;;  %v13293_v40 = vand.u32 4294901760, %v8332_v19  ;;  %13294 = vst [vmem:[#allocation92_spill] sm:$0xff] %v8473_v3  ;;  %v13402_v42 = vld [vmem:[#allocation37_spill] sm:$0xff] }
  0xef   : > { %v8321_v4 = vsub.f32 %v8208_v36, %v13277_v60  ;;  %1731 = vmatpush.msrb.mxu1 %v1730_v26  ;;  %v8337_v60 = vadd.s32 464, %v6958_v1  ;;  %6009 = vmatpush.msk.msrb.mxu0 %vm12810_vm9, %v13173_v47  ;;  %v5811_v26 = vsel %vm12843_vm6, 1.0, %v13245_v62  ;;  %v5892_v11 = vsel %vm579_vm8, 1.0, %v13245_v62  ;;  %13283 = vst [vmem:[#allocation86_spill] sm:$0xff] %v8393_v9 }
  0xf0   : > { %6025 = vmatpush.msk.msrb.mxu3 %vm12810_vm9, %v13173_v47  ;;  %1829 = vmatpush.msrb.mxu2 %v8108_v53  ;;  %vm576_vm9 = vcmp.eq.s32.totalorder %v8308_v24, %v7003_v17  ;;  %v8407_v20 = vsub.f32 %v5811_v26, %v5811_v26  ;;  %v8423_v7 = vsub.f32 %v5892_v11, %v5892_v11  ;;  %v8445_v26 = vadd.s32 440, %v6958_v1  ;;  %v13399_v24 = vld [vmem:[#allocation33_spill] sm:$0xff] }
  0xf1   : > { %13279 = vst [vmem:[#allocation83_spill] sm:$0xff] %v8337_v60  ;;  %1737 = vmatpush.msrb.mxu1 %v1736_v12  ;;  %6010 = vmatpush.msk.msrb.mxu0 %vm12821_vm10, %v13173_v47  ;;  %v1766_v12 = vand.u32 4294901760, %v8321_v4  ;;  %v5808_v4 = vsel %vm12852_vm5, 1.0, %v13245_v62  ;;  %v5889_v31 = vsel %vm576_vm9, 1.0, %v13245_v62  ;;  %v1772_v58 = vand.u32 4294901760, %v8380_v50 }
  0xf2   : > { %6026 = vmatpush.msk.msrb.mxu3 %vm12821_vm10, %v13173_v47  ;;  %1832 = vmatpush.msrb.mxu2 %v8161_v49  ;;  %vm573_vm10 = vcmp.eq.s32.totalorder %v8337_v60, %v7003_v17  ;;  %13285 = vst [vmem:[#allocation88_spill] sm:$0xff] %v8407_v20  ;;  %v8438_v44 = vsub.f32 %v5808_v4, %v5808_v4  ;;  %v13397_v60 = vld [vmem:[#allocation32_spill] sm:$0xff] }
  0xf3   : > { %1743 = vmatpush.msrb.mxu1 %v1742_v27  ;;  %6011 = vmatpush.msk.msrb.mxu0 %vm12826_vm0, %v13173_v47  ;;  %v8405_v27 = vand.u32 4294901760, %v1696_v23  ;;  %v1777_v23 = vsub.f32 %v8301_v18, %v13288_v8  ;;  %13289 = vst [vmem:[#allocation90_spill] sm:$0xff] %v8423_v7  ;;  %v5886_v11 = vsel %vm573_vm10, 1.0, %v13245_v62  ;;  %v1783_v4 = vsub.f32 %v8332_v19, %v13293_v40 }
  0xf4   : > { %6027 = vmatpush.msk.msrb.mxu3 %vm12826_vm0, %v13173_v47  ;;  %1835 = vmatpush.msrb.mxu2 %v8208_v36  ;;  %vm570_vm0 = vcmp.eq.s32.totalorder %v8366_v14, %v7003_v17  ;;  %13291 = vst [vmem:[#allocation91_spill] sm:$0xff] %v8445_v26  ;;  %v8480_v25 = vsub.f32 %v5886_v11, %v5886_v11  ;;  %v13297_v11 = vand.u32 4294901760, %v8393_v9 }
  0xf5   : > { %13284 = vst [vmem:[#allocation87_spill] sm:$0xff] %v8405_v27  ;;  %1749 = vmatpush.msrb.mxu1 %v13287_v13  ;;  %6012 = vmatpush.msk.msrb.mxu0 %vm12835_vm12, %v13173_v47  ;;  %v13290_v13 = vand.u32 4294901760, %v8324_v16  ;;  %v5883_v40 = vsel %vm570_vm0, 1.0, %v13245_v62  ;;  %v1778_v50 = vand.u32 4294901760, %v1777_v23 }
  0xf6   : > { %6028 = vmatpush.msk.msrb.mxu3 %vm12835_vm12, %v13173_v47  ;;  %1838 = vmatpush.msrb.mxu2 %v8259_v39  ;;  %vm567_vm12 = vcmp.eq.s32.totalorder %v8414_v10, %v7003_v17  ;;  %v8501_v48 = vsub.f32 %v5883_v40, %v5883_v40 }
  0xf7   : > { %v2046_v8 = vsub.f32 %v8324_v16, %v13290_v13  ;;  %1755 = vmatpush.msrb.mxu1 %v13292_v6  ;;  %v8455_v16 = vsub.f32 %v5889_v31, %v5889_v31  ;;  %6013 = vmatpush.msk.msrb.mxu0 %vm12838_vm2, %v13173_v47  ;;  %v13295_v31 = vand.u32 4294901760, %v8361_v21  ;;  %v2058_v6 = vsub.f32 %v8393_v9, %v13297_v11 }
  0xf8   : > { %6029 = vmatpush.msk.msrb.mxu3 %vm12838_vm2, %v13173_v47  ;;  %1841 = vmatpush.msrb.mxu2 %v8301_v18  ;;  %vm12856_vm2 = vcmp.eq.s32.totalorder %v8445_v26, %v7003_v17  ;;  %v13298_v11 = vand.u32 4294901760, %v8407_v20  ;;  %v13300_v9 = vand.u32 4294901760, %v8423_v7 }
  0xf9   : > { %1761 = vmatpush.msrb.mxu1 %v1760_v15  ;;  %v2052_v13 = vsub.f32 %v8361_v21, %v13295_v31  ;;  %6014 = vmatpush.msk.msrb.mxu0 %vm12843_vm6, %v13173_v47  ;;  %v2047_v15 = vand.u32 4294901760, %v2046_v8  ;;  %v8494_v31 = vadd.s32 424, %v6958_v1  ;;  %v5880_v8 = vsel %vm567_vm12, 1.0, %v13245_v62 }
  0xfa   : > { %6030 = vmatpush.msk.msrb.mxu3 %vm12843_vm6, %v13173_v47  ;;  %1844 = vmatpush.msrb.mxu2 %v8332_v19  ;;  %v1789_v40 = vsub.f32 %v8407_v20, %v13298_v11  ;;  %vm561_vm6 = vcmp.eq.s32.totalorder %v8473_v3, %v7003_v17  ;;  %v8521_v21 = vadd.s32 416, %v6958_v1  ;;  %v2064_v33 = vsub.f32 %v8423_v7, %v13300_v9  ;;  %v13395_v3 = vld [vmem:[#allocation31_spill] sm:$0xff] }
  0xfb   : > { %13296 = vst [vmem:[#allocation93_spill] sm:$0xff] %v8494_v31  ;;  %1767 = vmatpush.msrb.mxu1 %v1766_v12  ;;  %6015 = vmatpush.msk.msrb.mxu0 %vm12852_vm5, %v13173_v47  ;;  %v1784_v12 = vand.u32 4294901760, %v1783_v4  ;;  %v2053_v23 = vand.u32 4294901760, %v2052_v13  ;;  %v5877_v11 = vsel %vm12856_vm2, 1.0, %v13245_v62  ;;  %v8538_v13 = vsub.f32 %v5880_v8, %v5880_v8 }
  0xfc   : > { %6031 = vmatpush.msk.msrb.mxu3 %vm12852_vm5, %v13173_v47  ;;  %13299 = vst [vmem:[#allocation94_spill] sm:$0xff] %v8521_v21  ;;  %1698 = vmatmul.f32.vlgmr.msrb.gmra.mxu0 %v8405_v27  ;;  %v13302_v27 = vand.u32 4294901760, %v8438_v44  ;;  %vm12858_vm5 = vcmp.eq.s32.totalorder %v8494_v31, %v7003_v17  ;;  %v8543_v9 = vadd.s32 408, %v6958_v1  ;;  %v2059_v4 = vand.u32 4294901760, %v2058_v6 }
  0xfd   : > { %1773 = vmatpush.msrb.mxu1 %v1772_v58  ;;  %1847 = vmatpush.msrb.mxu2 %v8407_v20  ;;  %v13304_v7 = vand.u32 4294901760, %v8455_v16  ;;  %v13305_v8 = vand.u32 4294901760, %v8008_v2  ;;  %v1790_v20 = vand.u32 4294901760, %v1789_v40  ;;  %vm555_vm2 = vcmp.eq.s32.totalorder %v8521_v21, %v7003_v17 }
  0xfe   : > { %1899 = vmatpush.msra.mxu0 %v13301_v57  ;;  %v1795_v58 = vsub.f32 %v8438_v44, %v13302_v27  ;;  %13303 = vst [vmem:[#allocation95_spill] sm:$0xff] %v8543_v9  ;;  %2048 = vmatpush.msra.mxu3 %v2047_v15  ;;  %v5874_v27 = vsel %vm561_vm6, 1.0, %v13245_v62  ;;  %v8556_v15 = vsub.f32 %v5877_v11, %v5877_v11  ;;  %v2065_v6 = vand.u32 4294901760, %v2064_v33 }
  0xff   : > { %1779 = vmatpush.msrb.mxu1 %v1778_v50  ;;  %v2070_v32 = vsub.f32 %v8455_v16, %v13304_v7  ;;  %1850 = vmatpush.msrb.mxu2 %v8438_v44  ;;  %v8561_v7 = vadd.s32 400, %v6958_v1  ;;  %v13307_v50 = vand.u32 4294901760, %v8480_v25  ;;  %v5871_v40 = vsel %vm12858_vm5, 1.0, %v13245_v62 }
 0x100   : > { %1903 = vmatpush.msra.mxu0 %v13305_v8  ;;  %2054 = vmatpush.msra.mxu3 %v2053_v23  ;;  %v13308_v11 = vand.u32 4294901760, %v8022_v59  ;;  %v12860_v23 = vand.u32 4294901760, %v8538_v13  ;;  %v8577_v8 = vsub.f32 %v5874_v27, %v5874_v27  ;;  %v8582_v33 = vadd.s32 392, %v6958_v1 }
 0x101   : > { %13306 = vst [vmem:[#allocation96_spill] sm:$0xff] %v8561_v7  ;;  %6048 = vmatpush.msk.msra.mxu2 %vm12857_vm1, %v13173_v47  ;;  %v2076_v2 = vsub.f32 %v8480_v25, %v13307_v50  ;;  %1785 = vmatpush.msrb.mxu1 %v1784_v12  ;;  %vm552_vm1 = vcmp.eq.s32.totalorder %v8543_v9, %v7003_v17  ;;  %v1796_v50 = vand.u32 4294901760, %v1795_v58  ;;  %v2071_v57 = vand.u32 4294901760, %v2070_v32 }
 0x102   : > { %1907 = vmatpush.msra.mxu0 %v13308_v11  ;;  %13309 = vst [vmem:[#allocation97_spill] sm:$0xff] %v8582_v33  ;;  %2060 = vmatpush.msra.mxu3 %v2059_v4  ;;  %v13310_v12 = vand.u32 4294901760, %v8501_v48  ;;  %v5868_v27 = vsel %vm555_vm2, 1.0, %v13245_v62  ;;  %v8597_v11 = vsub.f32 %v5871_v40, %v5871_v40  ;;  %vm549_vm5 = vcmp.eq.s32.totalorder %v8561_v7, %v7003_v17 }
 0x103   : > { %1853 = vmatmul.f32.vlgmr.msrb.gmra.mxu2 %v8236_v63  ;;  %1791 = vmatpush.msrb.mxu1 %v1790_v20  ;;  %v8602_v58 = vadd.s32 384, %v6958_v1  ;;  %v13312_v32 = vand.u32 4294901760, %v8033_v28  ;;  %v5865_v20 = vsel %vm552_vm1, 1.0, %v13245_v62  ;;  %v2088_v40 = vsub.f32 %v8538_v13, %v12860_v23 }
 0x104   : > { %v2082_v59 = vsub.f32 %v8501_v48, %v13310_v12  ;;  %6049 = vmatpush.msk.msra.mxu2 %vm12859_vm3, %v13173_v47  ;;  %2066 = vmatpush.msra.mxu3 %v2065_v6  ;;  %v2077_v12 = vand.u32 4294901760, %v2076_v2  ;;  %v8619_v6 = vsub.f32 %v5868_v27, %v5868_v27  ;;  %vm546_vm3 = vcmp.eq.s32.totalorder %v8582_v33, %v7003_v17 }
 0x105   : > { %13311 = vst [vmem:[#allocation98_spill] sm:$0xff] %v8602_v58  ;;  %1911 = vmatpush.msra.mxu0 %v13312_v32  ;;  %1892 = vmatmul.f32.vlgmr.msrb.gmra.mxu3 %v8298_v22  ;;  %v13313_v2 = vand.u32 4294901760, %v8035_v46  ;;  %v5862_v4 = vsel %vm549_vm5, 1.0, %v13245_v62  ;;  %v13314_v23 = vand.u32 4294901760, %v8556_v15  ;;  %v12864_v28 = vand.u32 4294901760, %v8597_v11 }
 0x106   : > { %6050 = vmatpush.msk.msra.mxu2 %vm12863_vm7, %v13173_v47  ;;  %1797 = vmatpush.msrb.mxu1 %v1796_v50  ;;  %v2083_v32 = vand.u32 4294901760, %v2082_v59  ;;  %v8634_v22 = vsub.f32 %v5865_v20, %v5865_v20  ;;  %vm543_vm7 = vcmp.eq.s32.totalorder %v8602_v58, %v7003_v17  ;;  %v5859_v46 = vsel %vm546_vm3, 1.0, %v13245_v62 }
 0x107   : > { %1915 = vmatpush.msra.mxu0 %v13313_v2  ;;  %2072 = vmatpush.msra.mxu3 %v2071_v57  ;;  %v2094_v27 = vsub.f32 %v8556_v15, %v13314_v23  ;;  %v13315_v57 = vand.u32 4294901760, %v8048_v56  ;;  %v2089_v23 = vand.u32 4294901760, %v2088_v40  ;;  %v13316_v50 = vand.u32 4294901760, %v8577_v8 }
 0x108   : > { %1799 = vmatmul.f32.vlgmr.msrb.gmra.mxu1 %v8175_v41  ;;  %6051 = vmatpush.msk.msra.mxu2 %vm579_vm8, %v13173_v47  ;;  %v2111_v20 = vand.u32 4294901760, %v8619_v6  ;;  %v8656_v2 = vsub.f32 %v5862_v4, %v5862_v4  ;;  %v5856_v56 = vsel %vm543_vm7, 1.0, %v13245_v62  ;;  %v2106_v40 = vsub.f32 %v8597_v11, %v12864_v28  ;;  %v978_v28 = vld [vmem:[%s6949_s23 + $0x18] sm:$0xff] }
 0x109   : > { %6032 = vmatpush.msk.msra.mxu1 %vm540_vm11, %v13173_v47  ;;  %1919 = vmatpush.msra.mxu0 %v13315_v57  ;;  %v2100_v59 = vsub.f32 %v8577_v8, %v13316_v50  ;;  %v2095_v4 = vand.u32 4294901760, %v2094_v27  ;;  %v2117_v57 = vand.u32 4294901760, %v8634_v22  ;;  %v8676_v50 = vsub.f32 %v5859_v46, %v5859_v46 }
 0x10a   : > { %2078 = vmatpush.msra.mxu3 %v2077_v12  ;;  %6052 = vmatpush.msk.msra.mxu2 %vm576_vm9, %v13173_v47  ;;  %v13317_v12 = vand.u32 4294901760, %v8073_v37  ;;  %v13318_v37 = vand.u32 4294901760, %v8092_v5  ;;  %v2112_v27 = vsub.f32 %v8619_v6, %v2111_v20  ;;  %v2123_v46 = vand.u32 4294901760, %v8656_v2 }
 0x10b   : > { %6033 = vmatpush.msk.msra.mxu1 %vm537_vm13, %v13173_v47  ;;  %v13319_v5 = vand.u32 4294901760, %v8108_v53  ;;  %v8717_v53 = vand.u32 4294901760, %v978_v28  ;;  %vm13322_vm11 = vcmp.eq.s32.totalorder %v7925_v35, %v7003_v17  ;;  %vm13323_vm13 = vcmp.eq.s32.totalorder %v8445_v26, %v7003_v17 }
 0x10c   : > { %1923 = vmatpush.msra.mxu0 %v13317_v12  ;;  %2084 = vmatpush.msra.mxu3 %v2083_v32  ;;  %v2101_v32 = vand.u32 4294901760, %v2100_v59  ;;  %v8692_v12 = vsub.f32 %v5856_v56, %v5856_v56  ;;  %v2118_v59 = vsub.f32 %v8634_v22, %v2117_v57  ;;  %v2129_v56 = vand.u32 4294901760, %v8676_v50 }
 0x10d   : > { %6034 = vmatpush.msk.msra.mxu1 %vm534_vm14, %v13173_v47  ;;  %6053 = vmatpush.msk.msra.mxu2 %vm573_vm10, %v13173_v47  ;;  %13320 = vst [vmem:[#allocation99_spill] sm:$0xff] %v8717_v53  ;;  %vm13325_vm14 = vcmp.eq.s32.totalorder %v7947_v52, %v7003_v17 }
 0x10e   : > { %1927 = vmatpush.msra.mxu0 %v13318_v37  ;;  %2090 = vmatpush.msra.mxu3 %v2089_v23  ;;  %v2107_v23 = vand.u32 4294901760, %v2106_v40  ;;  %v2113_v40 = vand.u32 4294901760, %v2112_v27  ;;  %v2124_v37 = vsub.f32 %v8656_v2, %v2123_v46  ;;  %v2130_v27 = vsub.f32 %v8676_v50, %v2129_v56 }
 0x10f   : > { %6035 = vmatpush.msk.msra.mxu1 %vm531_vm4, %v13173_v47  ;;  %6054 = vmatpush.msk.msra.mxu2 %vm570_vm0, %v13173_v47  ;;  %vm13328_vm4 = vcmp.eq.s32.totalorder %v7959_v45, %v7003_v17 }
 0x110   : > { %1931 = vmatpush.msra.mxu0 %v13319_v5  ;;  %2096 = vmatpush.msra.mxu3 %v2095_v4  ;;  %v13321_v4 = vand.u32 4294901760, %v8161_v49  ;;  %v2135_v5 = vand.u32 4294901760, %v8692_v12  ;;  %v13324_v49 = vand.u32 4294901760, %v8208_v36  ;;  %v13327_v36 = vand.u32 4294901760, %v8259_v39 }
 0x111   : > { %6036 = vmatpush.msk.msra.mxu1 %vm528_vm15, %v13173_v47  ;;  %6055 = vmatpush.msk.msra.mxu2 %vm567_vm12, %v13173_v47  ;;  %vm13329_vm15 = vcmp.eq.s32.totalorder %v8494_v31, %v7003_v17  ;;  %v2131_v39 = vand.u32 4294901760, %v2130_v27  ;;  %v13337_v27 = vld [vmem:[#allocation68_spill] sm:$0xff] }
 0x112   : > { %1935 = vmatpush.msra.mxu0 %v13321_v4  ;;  %2102 = vmatpush.msra.mxu3 %v2101_v32  ;;  %v2119_v32 = vand.u32 4294901760, %v2118_v59  ;;  %v8747_v4 = vsub.f32 %v978_v28, %v8717_v53  ;;  %v2136_v59 = vsub.f32 %v8692_v12, %v2135_v5  ;;  %v13330_v28 = vand.u32 4294901760, %v8301_v18 }
 0x113   : > { %6037 = vmatpush.msk.msra.mxu1 %vm13322_vm11, %v13173_v47  ;;  %6056 = vmatpush.msk.msra.mxu2 %vm13323_vm13, %v13173_v47  ;;  %vm13331_vm11 = vcmp.eq.s32.totalorder %v7985_v55, %v7003_v17  ;;  %vm13334_vm13 = vcmp.eq.s32.totalorder %v8026_v61, %v7003_v17 }
 0x114   : > { %1939 = vmatpush.msra.mxu0 %v13324_v49  ;;  %2108 = vmatpush.msra.mxu3 %v2107_v23  ;;  %13326 = vst [vmem:[#allocation100_spill] sm:$0xff] %v8747_v4  ;;  %v2125_v23 = vand.u32 4294901760, %v2124_v37  ;;  %v13333_v37 = vand.u32 4294901760, %v8332_v19  ;;  %v2137_v18 = vand.u32 4294901760, %v2136_v59  ;;  %v13335_v49 = vld [vmem:[#allocation88_spill] sm:$0xff]  ;;  %v13342_v59 = vld [vmem:[#allocation82_spill] sm:$0xff] }
 0x115   : > { %6038 = vmatpush.msk.msra.mxu1 %vm13325_vm14, %v13173_v47  ;;  %6057 = vmatpush.msk.msra.mxu2 %vm561_vm6, %v13173_v47  ;;  %vm13338_vm14 = vcmp.eq.s32.totalorder %v13337_v27, %v7003_v17 }
 0x116   : > { %1943 = vmatpush.msra.mxu0 %v13327_v36  ;;  %2114 = vmatpush.msra.mxu3 %v2113_v40  ;;  %v8773_v40 = vand.u32 4294901760, %v8747_v4  ;;  %v13339_v36 = vand.u32 4294901760, %v8438_v44  ;;  %v13344_v44 = vld [vmem:[#allocation70_spill] sm:$0xff] }
 0x117   : > { %6039 = vmatpush.msk.msra.mxu1 %vm13328_vm4, %v13173_v47  ;;  %6058 = vmatpush.msk.msra.mxu2 %vm13329_vm15, %v13173_v47  ;;  %vm13343_vm15 = vcmp.eq.s32.totalorder %v8178_v54, %v7003_v17 }
 0x118   : > { %1947 = vmatpush.msra.mxu0 %v13330_v28  ;;  %2120 = vmatpush.msra.mxu3 %v2119_v32  ;;  %13332 = vst [vmem:[#allocation101_spill] sm:$0xff] %v8773_v40  ;;  %v13336_v32 = vand.u32 4294901760, %v13335_v49  ;;  %v2037_v19 = vsub.f32 %v8747_v4, %v8773_v40  ;;  %v13352_v49 = vld [vmem:[#allocation86_spill] sm:$0xff] }
 0x119   : > { %6040 = vmatpush.msk.msra.mxu1 %vm13331_vm11, %v13173_v47  ;;  %6059 = vmatpush.msk.msra.mxu2 %vm555_vm2, %v13173_v47  ;;  %vm13345_vm11 = vcmp.eq.s32.totalorder %v13344_v44, %v7003_v17  ;;  %v13406_v44 = vld [vmem:[#allocation39_spill] sm:$0xff] }
 0x11a   : > { %1951 = vmatpush.msra.mxu0 %v13333_v37  ;;  %2126 = vmatpush.msra.mxu3 %v2125_v23  ;;  %v13340_v23 = vld [vmem:[#allocation69_spill] sm:$0xff]  ;;  %v8817_v28 = vand.u32 4294901760, %v2037_v19  ;;  %v13349_v37 = vand.u32 4294901760, %v13342_v59  ;;  %v13355_v19 = vld [vmem:[#allocation76_spill] sm:$0xff] }
 0x11b   : > { %6041 = vmatpush.msk.msra.mxu1 %vm13334_vm13, %v13173_v47  ;;  %6060 = vmatpush.msk.msra.mxu2 %vm552_vm1, %v13173_v47  ;;  %vm13341_vm4 = vcmp.eq.s32.totalorder %v13340_v23, %v7003_v17  ;;  %vm13348_vm13 = vcmp.eq.s32.totalorder %v8219_v51, %v7003_v17 }
 0x11c   : > { %1955 = vmatpush.msra.mxu0 %v13336_v32  ;;  %2132 = vmatpush.msra.mxu3 %v2131_v39  ;;  %13346 = vst [vmem:[#allocation88_spill] sm:$0xff] %v8817_v28  ;;  %v13347_v39 = vld [vmem:[#allocation84_spill] sm:$0xff] }
 0x11d   : > { %6042 = vmatpush.msk.msra.mxu1 %vm13338_vm14, %v13173_v47  ;;  %6061 = vmatpush.msk.msra.mxu2 %vm549_vm5, %v13173_v47  ;;  %v13354_v32 = vand.u32 4294901760, %v13347_v39 }
 0x11e   : > { %1959 = vmatpush.msra.mxu0 %v13339_v36  ;;  %2138 = vmatpush.msra.mxu3 %v2137_v18  ;;  %v13350_v18 = vld [vmem:[#allocation73_spill] sm:$0xff]  ;;  %v13357_v36 = vld [vmem:[#allocation90_spill] sm:$0xff] }
 0x11f   : > { %1961 = vmatmul.f32.vlgmr.msra.gmra.mxu0 %v8175_v41  ;;  %6043 = vmatpush.msk.msra.mxu1 %vm13341_vm4, %v13173_v47  ;;  %vm13351_vm14 = vcmp.eq.s32.totalorder %v13350_v18, %v7003_v17  ;;  %vm13353_vm4 = vcmp.eq.s32.totalorder %v8248_v0, %v7003_v17 }
 0x120   : > { %6062 = vmatpush.msk.msra.mxu2 %vm546_vm3, %v13173_v47  ;;  %2146 = vmatpush.msrb.mxu0 %v13342_v59  ;;  %v13358_v59 = vand.u32 4294901760, %v13352_v49 }
 0x121   : > { %6080 = vmatpush.msk.msrb.mxu3 %vm13343_vm15, %v13173_v47  ;;  %6044 = vmatpush.msk.msra.mxu1 %vm13345_vm11, %v13173_v47  ;;  %vm13356_vm15 = vcmp.eq.s32.totalorder %v13355_v19, %v7003_v17 }
 0x122   : > { %6063 = vmatpush.msk.msra.mxu2 %vm543_vm7, %v13173_v47  ;;  %2149 = vmatpush.msrb.mxu0 %v13347_v39  ;;  %v13359_v39 = vld [vmem:[#allocation79_spill] sm:$0xff] }
 0x123   : > { %6081 = vmatpush.msk.msrb.mxu3 %vm13348_vm13, %v13173_v47  ;;  %6045 = vmatpush.msk.msra.mxu1 %vm13351_vm14, %v13173_v47  ;;  %vm13360_vm11 = vcmp.eq.s32.totalorder %v13359_v39, %v7003_v17  ;;  %vm13361_vm13 = vcmp.eq.s32.totalorder %v8178_v54, %v7003_v17  ;;  %vm13363_vm14 = vcmp.eq.s32.totalorder %v8219_v51, %v7003_v17 }
 0x124   : > { %2240 = vmatpush.msrb.mxu2 %v13349_v37  ;;  %2152 = vmatpush.msrb.mxu0 %v13352_v49  ;;  %v13362_v37 = vand.u32 4294901760, %v13357_v36  ;;  %v13364_v49 = vand.u32 4294901760, %v8455_v16 }
 0x125   : > { %6082 = vmatpush.msk.msrb.mxu3 %vm13353_vm4, %v13173_v47  ;;  %2039 = vmatmul.f32.vlgmr.msra.gmra.mxu2 %v8817_v28 }
 0x126   : > { %2244 = vmatpush.msrb.mxu2 %v13354_v32  ;;  %6046 = vmatpush.msk.msra.mxu1 %vm13356_vm15, %v13173_v47  ;;  %v13365_v32 = vand.u32 4294901760, %v8480_v25  ;;  %vm13367_vm15 = vcmp.eq.s32.totalorder %v8445_v26, %v7003_v17 }
 0x127   : > { %2155 = vmatpush.msrb.mxu0 %v13357_v36  ;;  %6083 = vmatpush.msk.msrb.mxu3 %vm579_vm8, %v13173_v47 }
 0x128   : > { %2140 = vmatmul.f32.vlgmr.msra.gmra.mxu3 %v8717_v53  ;;  %2248 = vmatpush.msrb.mxu2 %v13358_v59  ;;  %v13368_v59 = vand.u32 4294901760, %v8538_v13 }
 0x129   : > { %6047 = vmatpush.msk.msra.mxu1 %vm13360_vm11, %v13173_v47  ;;  %2158 = vmatpush.msrb.mxu0 %v8455_v16  ;;  %v13366_v16 = vand.u32 4294901760, %v8501_v48 }
 0x12a   : > { %6084 = vmatpush.msk.msrb.mxu3 %vm576_vm9, %v13173_v47  ;;  %1998 = vmatmul.f32.vlgmr.msra.gmra.mxu1 %v8175_v41 }
 0x12b   : > { %6064 = vmatpush.msk.msrb.mxu1 %vm13361_vm13, %v13173_v47  ;;  %2252 = vmatpush.msrb.mxu2 %v13362_v37  ;;  %v13372_v37 = vld [vmem:[#allocation19_spill] sm:$0xff] }
 0x12c   : > { %2161 = vmatpush.msrb.mxu0 %v8480_v25  ;;  %6085 = vmatpush.msk.msrb.mxu3 %vm573_vm10, %v13173_v47  ;;  %v6558_v25 = vld [vmem:[%s6941_s11] sm:$0x7] }
 0x12d   : > { %6065 = vmatpush.msk.msrb.mxu1 %vm13363_vm14, %v13173_v47  ;;  %2256 = vmatpush.msrb.mxu2 %v13364_v49  ;;  %v8909_v36 = vperm.slane %v6558_v25, 1  ;;  %v13380_v25 = vld [vmem:[#allocation24_spill] sm:$0xff] }
 0x12e   : > { %2164 = vmatpush.msrb.mxu0 %v8501_v48  ;;  %6086 = vmatpush.msk.msrb.mxu3 %vm570_vm0, %v13173_v47  ;;  %v13369_v48 = vand.u32 4294901760, %v8556_v15 }
 0x12f   : > { %6066 = vmatpush.msk.msrb.mxu1 %vm13353_vm4, %v13173_v47  ;;  %2260 = vmatpush.msrb.mxu2 %v13365_v32  ;;  %v13375_v32 = vld [vmem:[#allocation21_spill] sm:$0xff]  ;;  %vm12903_vm14 = vcmp.eq.s32.totalorder %v13380_v25, %v8909_v36 }
 0x130   : > { %2167 = vmatpush.msrb.mxu0 %v8538_v13  ;;  %6087 = vmatpush.msk.msrb.mxu3 %vm567_vm12, %v13173_v47  ;;  %v13371_v13 = vand.u32 4294901760, %v8577_v8 }
 0x131   : > { %6067 = vmatpush.msk.msrb.mxu1 %vm579_vm8, %v13173_v47  ;;  %2264 = vmatpush.msrb.mxu2 %v13366_v16  ;;  %vm13370_vm8 = vcmp.eq.s32.totalorder %v8494_v31, %v7003_v17 }
 0x132   : > { %2170 = vmatpush.msrb.mxu0 %v8556_v15  ;;  %6088 = vmatpush.msk.msrb.mxu3 %vm13367_vm15, %v13173_v47  ;;  %v13373_v15 = vand.u32 4294901760, %v8597_v11  ;;  %vm13379_vm13 = vmmov %vm13370_vm8 }
 0x133   : > { %6068 = vmatpush.msk.msrb.mxu1 %vm576_vm9, %v13173_v47  ;;  %2268 = vmatpush.msrb.mxu2 %v13368_v59  ;;  %vm445_vm9 = vcmp.eq.s32.totalorder %v13372_v37, %v8909_v36 }
 0x134   : > { %2173 = vmatpush.msrb.mxu0 %v8577_v8  ;;  %6089 = vmatpush.msk.msrb.mxu3 %vm561_vm6, %v13173_v47  ;;  %v13374_v8 = vld [vmem:[#allocation20_spill] sm:$0xff]  ;;  %v5758_v49 = vsel %vm445_vm9, 1.0, %v13245_v62 }
 0x135   : > { %6069 = vmatpush.msk.msrb.mxu1 %vm573_vm10, %v13173_v47  ;;  %2272 = vmatpush.msrb.mxu2 %v13369_v48  ;;  %vm442_vm10 = vcmp.eq.s32.totalorder %v13374_v8, %v8909_v36 }
 0x136   : > { %2176 = vmatpush.msrb.mxu0 %v8597_v11  ;;  %6090 = vmatpush.msk.msrb.mxu3 %vm13370_vm8, %v13173_v47  ;;  %v5755_v11 = vsel %vm442_vm10, 1.0, %v13245_v62  ;;  %vm12932_vm8 = vcmp.eq.s32.totalorder %v13395_v3, %v8909_v36 }
 0x137   : > { %6070 = vmatpush.msk.msrb.mxu1 %vm570_vm0, %v13173_v47  ;;  %2276 = vmatpush.msrb.mxu2 %v13371_v13  ;;  %vm439_vm0 = vcmp.eq.s32.totalorder %v13375_v32, %v8909_v36 }
 0x138   : > { %2179 = vmatpush.msrb.mxu0 %v8619_v6  ;;  %6091 = vmatpush.msk.msrb.mxu3 %vm555_vm2, %v13173_v47  ;;  %v8986_v6 = vsub.f32 %v5758_v49, %v5758_v49  ;;  %v5752_v16 = vsel %vm439_vm0, 1.0, %v13245_v62  ;;  %v5743_v49 = vsel %vm12903_vm14, 1.0, %v13245_v62 }
 0x139   : > { %6071 = vmatpush.msk.msrb.mxu1 %vm567_vm12, %v13173_v47  ;;  %2280 = vmatpush.msrb.mxu2 %v13373_v15  ;;  %vm13376_vm12 = vmmov %vm13367_vm15  ;;  %v9016_v59 = vsub.f32 %v5752_v16, %v5752_v16  ;;  %v13382_v15 = vld [vmem:[#allocation26_spill] sm:$0xff] }
 0x13a   : > { %2182 = vmatpush.msrb.mxu0 %v8634_v22  ;;  %6092 = vmatpush.msk.msrb.mxu3 %vm552_vm1, %v13173_v47  ;;  %v13378_v22 = vld [vmem:[#allocation23_spill] sm:$0xff]  ;;  %v12865_v48 = vand.u32 4294901760, %v8986_v6  ;;  %vm12906_vm15 = vcmp.eq.s32.totalorder %v13382_v15, %v8909_v36 }
 0x13b   : > { %6072 = vmatpush.msk.msrb.mxu1 %vm13376_vm12, %v13173_v47  ;;  %2284 = vmatpush.msrb.mxu2 %v2111_v20  ;;  %v13377_v20 = vld [vmem:[#allocation22_spill] sm:$0xff]  ;;  %v13386_v41 = vand.u32 4294901760, %v9016_v59 }
 0x13c   : > { %2185 = vmatpush.msrb.mxu0 %v8656_v2  ;;  %6093 = vmatpush.msk.msrb.mxu3 %vm549_vm5, %v13173_v47  ;;  %vm436_vm11 = vcmp.eq.s32.totalorder %v13377_v20, %v8909_v36 }
 0x13d   : > { %6073 = vmatpush.msk.msrb.mxu1 %vm561_vm6, %v13173_v47  ;;  %2288 = vmatpush.msrb.mxu2 %v2117_v57  ;;  %vm12912_vm6 = vcmp.eq.s32.totalorder %v13378_v22, %v8909_v36  ;;  %v9007_v57 = vsub.f32 %v5755_v11, %v5755_v11  ;;  %v5749_v2 = vsel %vm436_vm11, 1.0, %v13245_v62  ;;  %v2399_v7 = vsub.f32 %v9016_v59, %v13386_v41 }
 0x13e   : > { %2188 = vmatpush.msrb.mxu0 %v8676_v50  ;;  %6094 = vmatpush.msk.msrb.mxu3 %vm546_vm3, %v13173_v47  ;;  %v5746_v13 = vsel %vm12912_vm6, 1.0, %v13245_v62  ;;  %v9054_v50 = vsub.f32 %v5749_v2, %v5749_v2  ;;  %v13383_v2 = vld [vmem:[#allocation27_spill] sm:$0xff] }
 0x13f   : > { %6074 = vmatpush.msk.msrb.mxu1 %vm13379_vm13, %v13173_v47  ;;  %2292 = vmatpush.msrb.mxu2 %v2123_v46  ;;  %v13381_v46 = vld [vmem:[#allocation25_spill] sm:$0xff]  ;;  %v9067_v16 = vsub.f32 %v5746_v13, %v5746_v13  ;;  %v2400_v17 = vand.u32 4294901760, %v2399_v7  ;;  %vm12939_vm13 = vcmp.eq.s32.totalorder %v13397_v60, %v8909_v36 }
 0x140   : > { %2191 = vmatpush.msrb.mxu0 %v8692_v12  ;;  %6095 = vmatpush.msk.msrb.mxu3 %vm543_vm7, %v13173_v47  ;;  %vm12900_vm4 = vcmp.eq.s32.totalorder %v13381_v46, %v8909_v36  ;;  %v2387_v12 = vsub.f32 %v8986_v6, %v12865_v48 }
 0x141   : > { %2194 = vmatmul.f32.vlgmr.msrb.gmra.mxu0 %v8747_v4  ;;  %6075 = vmatpush.msk.msrb.mxu1 %vm555_vm2, %v13173_v47  ;;  %v5740_v11 = vsel %vm12900_vm4, 1.0, %v13245_v62  ;;  %v13389_v58 = vand.u32 4294901760, %v9067_v16 }
 0x142   : > { %2296 = vmatpush.msrb.mxu2 %v2129_v56  ;;  %6096 = vmatpush.msk.msra.mxu0 %vm445_vm9, %v13173_v47  ;;  %v5737_v56 = vsel %vm12906_vm15, 1.0, %v13245_v62  ;;  %v9092_v13 = vsub.f32 %v5740_v11, %v5740_v11  ;;  %v13385_v11 = vld [vmem:[#allocation28_spill] sm:$0xff] }
 0x143   : > { %6112 = vmatpush.msk.msra.mxu3 %vm445_vm9, %v13173_v47  ;;  %6076 = vmatpush.msk.msrb.mxu1 %vm552_vm1, %v13173_v47  ;;  %vm12911_vm1 = vcmp.eq.s32.totalorder %v13383_v2, %v8909_v36  ;;  %v9105_v28 = vsub.f32 %v5737_v56, %v5737_v56  ;;  %v2388_v56 = vand.u32 4294901760, %v2387_v12  ;;  %v2411_v9 = vsub.f32 %v9067_v16, %v13389_v58  ;;  %v13392_v58 = vld [vmem:[#allocation34_spill] sm:$0xff] }
 0x144   : > { %2300 = vmatpush.msrb.mxu2 %v2135_v5  ;;  %6097 = vmatpush.msk.msra.mxu0 %vm442_vm10, %v13173_v47  ;;  %v9082_v5 = vsub.f32 %v5743_v49, %v5743_v49  ;;  %v13384_v49 = vand.u32 4294901760, %v9007_v57  ;;  %v5734_v41 = vsel %vm12911_vm1, 1.0, %v13245_v62 }
 0x145   : > { %6113 = vmatpush.msk.msra.mxu3 %vm442_vm10, %v13173_v47  ;;  %6077 = vmatpush.msk.msrb.mxu1 %vm549_vm5, %v13173_v47  ;;  %vm12915_vm5 = vcmp.eq.s32.totalorder %v13385_v11, %v8909_v36  ;;  %v9160_v21 = vsub.f32 %v5734_v41, %v5734_v41  ;;  %v2412_v10 = vand.u32 4294901760, %v2411_v9  ;;  %v13398_v9 = vld [vmem:[#allocation36_spill] sm:$0xff] }
 0x146   : > { %2487 = vmatpush.msra.mxu2 %v8986_v6  ;;  %6098 = vmatpush.msk.msra.mxu0 %vm439_vm0, %v13173_v47  ;;  %v2393_v48 = vsub.f32 %v9007_v57, %v13384_v49  ;;  %v13387_v49 = vld [vmem:[#allocation29_spill] sm:$0xff]  ;;  %v5731_v12 = vsel %vm12915_vm5, 1.0, %v13245_v62 }
 0x147   : > { %6114 = vmatpush.msk.msra.mxu3 %vm439_vm0, %v13173_v47  ;;  %2302 = vmatmul.f32.vlgmr.msrb.gmra.mxu2 %v8717_v53  ;;  %vm12918_vm2 = vcmp.eq.s32.totalorder %v13387_v49, %v8909_v36  ;;  %v9168_v31 = vsub.f32 %v5731_v12, %v5731_v12 }
 0x148   : > { %2490 = vmatpush.msra.mxu2 %v9007_v57  ;;  %6078 = vmatpush.msk.msrb.mxu1 %vm546_vm3, %v13173_v47  ;;  %v2394_v4 = vand.u32 4294901760, %v2393_v48  ;;  %v13390_v48 = vld [vmem:[#allocation30_spill] sm:$0xff]  ;;  %v5728_v7 = vsel %vm12918_vm2, 1.0, %v13245_v62  ;;  %vm12956_vm3 = vcmp.eq.s32.totalorder %v13392_v58, %v8909_v36 }
 0x149   : > { %6099 = vmatpush.msk.msra.mxu0 %vm436_vm11, %v13173_v47  ;;  %6115 = vmatpush.msk.msra.mxu3 %vm436_vm11, %v13173_v47  ;;  %v13403_v19 = vand.u32 4294901760, %v9168_v31 }
 0x14a   : > { %2339 = vmatmul.f32.vlgmr.msrb.gmra.mxu3 %v8717_v53  ;;  %2493 = vmatpush.msra.mxu2 %v9016_v59  ;;  %v13388_v53 = vand.u32 4294901760, %v9054_v50 }
 0x14b   : > { %6079 = vmatpush.msk.msrb.mxu1 %vm543_vm7, %v13173_v47  ;;  %6100 = vmatpush.msk.msra.mxu0 %vm12912_vm6, %v13173_v47  ;;  %vm12929_vm7 = vcmp.eq.s32.totalorder %v13390_v48, %v8909_v36  ;;  %v2441_v0 = vsub.f32 %v9168_v31, %v13403_v19 }
 0x14c   : > { %v2405_v33 = vsub.f32 %v9054_v50, %v13388_v53  ;;  %6116 = vmatpush.msk.msra.mxu3 %vm12912_vm6, %v13173_v47  ;;  %2233 = vmatmul.f32.vlgmr.msrb.gmra.mxu1 %v8773_v40  ;;  %v13391_v53 = vand.u32 4294901760, %v9082_v5  ;;  %v5725_v26 = vsel %vm12929_vm7, 1.0, %v13245_v62 }
 0x14d   : > { %2389 = vmatpush.msra.mxu1 %v2388_v56  ;;  %2496 = vmatpush.msra.mxu2 %v9054_v50  ;;  %v13393_v56 = vand.u32 4294901760, %v9092_v13  ;;  %v2442_v45 = vand.u32 4294901760, %v2441_v0 }
 0x14e   : > { %v2417_v63 = vsub.f32 %v9082_v5, %v13391_v53  ;;  %6101 = vmatpush.msk.msra.mxu0 %vm12903_vm14, %v13173_v47  ;;  %6117 = vmatpush.msk.msra.mxu3 %vm12903_vm14, %v13173_v47  ;;  %v2406_v12 = vand.u32 4294901760, %v2405_v33  ;;  %v13394_v53 = vand.u32 4294901760, %v9105_v28  ;;  %v9207_v33 = vsub.f32 %v5728_v7, %v5728_v7 }
 0x14f   : > { %v2423_v41 = vsub.f32 %v9092_v13, %v13393_v56  ;;  %2395 = vmatpush.msra.mxu1 %v2394_v4  ;;  %2499 = vmatpush.msra.mxu2 %v9067_v16  ;;  %v5806_v56 = vsel %vm12956_vm3, 1.0, %v13245_v62  ;;  %v9228_v4 = vsub.f32 %v5725_v26, %v5725_v26  ;;  %vm12944_vm14 = vcmp.eq.s32.totalorder %v13399_v24, %v8909_v36  ;;  %v13422_v24 = vld [vmem:[#allocation47_spill] sm:$0xff] }
 0x150   : > { %v9191_v40 = vsub.f32 %v9105_v28, %v13394_v53  ;;  %6102 = vmatpush.msk.msra.mxu0 %vm12900_vm4, %v13173_v47  ;;  %6118 = vmatpush.msk.msra.mxu3 %vm12900_vm4, %v13173_v47  ;;  %v13396_v53 = vld [vmem:[#allocation35_spill] sm:$0xff]  ;;  %v2418_v14 = vand.u32 4294901760, %v2417_v63  ;;  %v5722_v63 = vsel %vm12932_vm8, 1.0, %v13245_v62  ;;  %vm12958_vm4 = vcmp.eq.s32.totalorder %v13398_v9, %v8909_v36 }
 0x151   : > { %vm12957_vm12 = vcmp.eq.s32.totalorder %v13396_v53, %v8909_v36  ;;  %2401 = vmatpush.msra.mxu1 %v2400_v17  ;;  %2502 = vmatpush.msra.mxu2 %v9082_v5  ;;  %v2424_v17 = vand.u32 4294901760, %v2423_v41  ;;  %v9240_v39 = vsub.f32 %v5806_v56, %v5806_v56  ;;  %v5719_v56 = vsel %vm12939_vm13, 1.0, %v13245_v62 }
 0x152   : > { %6103 = vmatpush.msk.msra.mxu0 %vm12906_vm15, %v13173_v47  ;;  %6119 = vmatpush.msk.msra.mxu3 %vm12906_vm15, %v13173_v47  ;;  %v2430_v7 = vand.u32 4294901760, %v9191_v40  ;;  %v5803_v26 = vsel %vm12957_vm12, 1.0, %v13245_v62  ;;  %v13401_v40 = vand.u32 4294901760, %v9160_v21  ;;  %vm484_vm15 = vcmp.eq.s32.totalorder %v13402_v42, %v8909_v36 }
 0x153   : > { %2407 = vmatpush.msra.mxu1 %v2406_v12  ;;  %2505 = vmatpush.msra.mxu2 %v9092_v13  ;;  %13400 = vst [vmem:[#allocation82_spill] sm:$0xff] %v9240_v39  ;;  %v9268_v51 = vsub.f32 %v5722_v63, %v5722_v63  ;;  %v5716_v19 = vsel %vm12944_vm14, 1.0, %v13245_v62  ;;  %v9289_v63 = vsub.f32 %v5803_v26, %v5803_v26  ;;  %v13405_v12 = vld [vmem:[#allocation38_spill] sm:$0xff]  ;;  %v13407_v26 = vand.u32 4294901760, %v9207_v33 }
 0x154   : > { %6104 = vmatpush.msk.msra.mxu0 %vm12911_vm1, %v13173_v47  ;;  %6120 = vmatpush.msk.msra.mxu3 %vm12911_vm1, %v13173_v47  ;;  %v2435_v41 = vsub.f32 %v9160_v21, %v13401_v40  ;;  %vm12952_vm1 = vcmp.eq.s32.totalorder %v6958_v1, %v8909_v36  ;;  %v5800_v40 = vsel %vm12958_vm4, 1.0, %v13245_v62  ;;  %vm481_vm6 = vcmp.eq.s32.totalorder %v13405_v12, %v8909_v36  ;;  %v13518_v12 = vld [vmem:[#allocation77_spill] sm:$0xff] }
 0x155   : > { %2413 = vmatpush.msra.mxu1 %v2412_v10  ;;  %2508 = vmatpush.msra.mxu2 %v9105_v28  ;;  %13404 = vst [vmem:[#allocation84_spill] sm:$0xff] %v9289_v63  ;;  %v9294_v18 = vsub.f32 %v5719_v56, %v5719_v56  ;;  %v5797_v10 = vsel %vm484_vm15, 1.0, %v13245_v62  ;;  %v2447_v56 = vsub.f32 %v9207_v33, %v13407_v26  ;;  %v5713_v54 = vsel %vm12952_vm1, 1.0, %v13245_v62  ;;  %v13409_v26 = vld [vmem:[#allocation41_spill] sm:$0xff] }
 0x156   : > { %6105 = vmatpush.msk.msra.mxu0 %vm12915_vm5, %v13173_v47  ;;  %6121 = vmatpush.msk.msra.mxu3 %vm12915_vm5, %v13173_v47  ;;  %vm478_vm5 = vcmp.eq.s32.totalorder %v13406_v44, %v8909_v36  ;;  %v9318_v23 = vsub.f32 %v5800_v40, %v5800_v40  ;;  %v9321_v27 = vsub.f32 %v5716_v19, %v5716_v19  ;;  %v13412_v52 = vand.u32 4294901760, %v9240_v39 }
 0x157   : > { %2419 = vmatpush.msra.mxu1 %v2418_v14  ;;  %2511 = vmatpush.msra.mxu2 %v9160_v21  ;;  %v2436_v14 = vand.u32 4294901760, %v2435_v41  ;;  %v5794_v41 = vsel %vm481_vm6, 1.0, %v13245_v62  ;;  %v9342_v61 = vsub.f32 %v5797_v10, %v5797_v10  ;;  %v5791_v55 = vsel %vm478_vm5, 1.0, %v13245_v62 }
 0x158   : > { %6106 = vmatpush.msk.msra.mxu0 %vm12918_vm2, %v13173_v47  ;;  %6122 = vmatpush.msk.msra.mxu3 %vm12918_vm2, %v13173_v47  ;;  %13408 = vst [vmem:[#allocation86_spill] sm:$0xff] %v9318_v23  ;;  %vm475_vm2 = vcmp.eq.s32.totalorder %v13409_v26, %v8909_v36  ;;  %v2728_v35 = vsub.f32 %v9240_v39, %v13412_v52  ;;  %v2448_v10 = vand.u32 4294901760, %v2447_v56  ;;  %v13415_v56 = vand.u32 4294901760, %v9289_v63 }
 0x159   : > { %2425 = vmatpush.msra.mxu1 %v2424_v17  ;;  %2514 = vmatpush.msra.mxu2 %v9168_v31  ;;  %v13410_v17 = vand.u32 4294901760, %v9228_v4  ;;  %13411 = vst [vmem:[#allocation90_spill] sm:$0xff] %v9342_v61  ;;  %v9352_v43 = vsub.f32 %v5713_v54, %v5713_v54  ;;  %v5788_v52 = vsel %vm475_vm2, 1.0, %v13245_v62  ;;  %v13413_v54 = vld [vmem:[#allocation43_spill] sm:$0xff]  ;;  %v13417_v0 = vand.u32 4294901760, %v9294_v18 }
 0x15a   : > { %6107 = vmatpush.msk.msra.mxu0 %vm12929_vm7, %v13173_v47  ;;  %6123 = vmatpush.msk.msra.mxu3 %vm12929_vm7, %v13173_v47  ;;  %vm472_vm7 = vcmp.eq.s32.totalorder %v13413_v54, %v8909_v36  ;;  %v2734_v38 = vsub.f32 %v9289_v63, %v13415_v56  ;;  %v9398_v29 = vsub.f32 %v5788_v52, %v5788_v52  ;;  %v13420_v60 = vand.u32 4294901760, %v9321_v27 }
 0x15b   : > { %v2453_v40 = vsub.f32 %v9228_v4, %v13410_v17  ;;  %2431 = vmatpush.msra.mxu1 %v2430_v7  ;;  %2517 = vmatpush.msra.mxu2 %v9207_v33  ;;  %v9364_v7 = vsub.f32 %v5794_v41, %v5794_v41  ;;  %v13414_v17 = vand.u32 4294901760, %v9268_v51  ;;  %v9377_v41 = vsub.f32 %v5791_v55, %v5791_v55  ;;  %v13416_v55 = vld [vmem:[#allocation44_spill] sm:$0xff] }
 0x15c   : > { %6108 = vmatpush.msk.msra.mxu0 %vm12932_vm8, %v13173_v47  ;;  %6124 = vmatpush.msk.msra.mxu3 %vm12932_vm8, %v13173_v47  ;;  %vm469_vm8 = vcmp.eq.s32.totalorder %v13416_v55, %v8909_v36  ;;  %v2465_v34 = vsub.f32 %v9294_v18, %v13417_v0  ;;  %v13418_v0 = vand.u32 4294901760, %v9318_v23  ;;  %v2471_v63 = vsub.f32 %v9321_v27, %v13420_v60  ;;  %v13515_v55 = vld [vmem:[#allocation73_spill] sm:$0xff] }
 0x15d   : > { %2437 = vmatpush.msra.mxu1 %v2436_v14  ;;  %2520 = vmatpush.msra.mxu2 %v9228_v4  ;;  %v2459_v19 = vsub.f32 %v9268_v51, %v13414_v17  ;;  %v2454_v14 = vand.u32 4294901760, %v2453_v40  ;;  %v5785_v40 = vsel %vm472_vm7, 1.0, %v13245_v62  ;;  %v13421_v60 = vand.u32 4294901760, %v9342_v61 }
 0x15e   : > { %6109 = vmatpush.msk.msra.mxu0 %vm12939_vm13, %v13173_v47  ;;  %6125 = vmatpush.msk.msra.mxu3 %vm12939_vm13, %v13173_v47  ;;  %v2740_v52 = vsub.f32 %v9318_v23, %v13418_v0  ;;  %vm12955_vm13 = vcmp.eq.s32.totalorder %v13419_v30, %v8909_v36  ;;  %v9438_v0 = vsub.f32 %v5785_v40, %v5785_v40  ;;  %v2466_v56 = vand.u32 4294901760, %v2465_v34 }
 0x15f   : > { %2443 = vmatpush.msra.mxu1 %v2442_v45  ;;  %2523 = vmatpush.msra.mxu2 %v9268_v51  ;;  %v2729_v45 = vand.u32 4294901760, %v2728_v35  ;;  %v2460_v17 = vand.u32 4294901760, %v2459_v19  ;;  %v5782_v35 = vsel %vm469_vm8, 1.0, %v13245_v62  ;;  %v2735_v19 = vand.u32 4294901760, %v2734_v38 }
 0x160   : > { %6110 = vmatpush.msk.msra.mxu0 %vm12944_vm14, %v13173_v47  ;;  %6126 = vmatpush.msk.msra.mxu3 %vm12944_vm14, %v13173_v47  ;;  %vm463_vm14 = vcmp.eq.s32.totalorder %v13422_v24, %v8909_v36  ;;  %v13423_v23 = vand.u32 4294901760, %v9352_v43  ;;  %v5779_v38 = vsel %vm12955_vm13, 1.0, %v13245_v62  ;;  %v13424_v40 = vand.u32 4294901760, %v8986_v6 }
 0x161   : > { %2449 = vmatpush.msra.mxu1 %v2448_v10  ;;  %2526 = vmatpush.msra.mxu2 %v9294_v18  ;;  %v2746_v10 = vsub.f32 %v9342_v61, %v13421_v60  ;;  %v2741_v60 = vand.u32 4294901760, %v2740_v52  ;;  %v9456_v61 = vsub.f32 %v5782_v35, %v5782_v35  ;;  %v2472_v1 = vand.u32 4294901760, %v2471_v63  ;;  %v13429_v63 = vld [vmem:[#allocation49_spill] sm:$0xff] }
 0x162   : > { %6111 = vmatpush.msk.msra.mxu0 %vm12952_vm1, %v13173_v47  ;;  %6127 = vmatpush.msk.msra.mxu3 %vm12952_vm1, %v13173_v47  ;;  %v2477_v3 = vsub.f32 %v9352_v43, %v13423_v23  ;;  %v13426_v23 = vld [vmem:[#allocation48_spill] sm:$0xff]  ;;  %v13427_v39 = vand.u32 4294901760, %v9377_v41  ;;  %v13428_v52 = vand.u32 4294901760, %v9007_v57  ;;  %vm457_vm13 = vcmp.eq.s32.totalorder %v13429_v63, %v8909_v36  ;;  %v13511_v63 = vld [vmem:[#allocation70_spill] sm:$0xff] }
 0x163   : > { %2455 = vmatpush.msra.mxu1 %v2454_v14  ;;  %2529 = vmatpush.msra.mxu2 %v9321_v27  ;;  %v13425_v14 = vand.u32 4294901760, %v9364_v7  ;;  %vm460_vm1 = vcmp.eq.s32.totalorder %v13426_v23, %v8909_v36  ;;  %v2747_v35 = vand.u32 4294901760, %v2746_v10  ;;  %v13431_v10 = vand.u32 4294901760, %v9016_v59 }
 0x164   : > { %2581 = vmatpush.msrb.mxu0 %v13424_v40  ;;  %2730 = vmatpush.msrb.mxu3 %v2729_v45  ;;  %v2758_v6 = vsub.f32 %v9377_v41, %v13427_v39  ;;  %v5776_v45 = vsel %vm463_vm14, 1.0, %v13245_v62  ;;  %v2478_v39 = vand.u32 4294901760, %v2477_v3  ;;  %v13432_v3 = vld [vmem:[#allocation51_spill] sm:$0xff]  ;;  %v5770_v59 = vsel %vm457_vm13, 1.0, %v13245_v62 }
 0x165   : > { %v2752_v34 = vsub.f32 %v9364_v7, %v13425_v14  ;;  %2461 = vmatpush.msra.mxu1 %v2460_v17  ;;  %2532 = vmatpush.msra.mxu2 %v9352_v43  ;;  %v9471_v17 = vsub.f32 %v5779_v38, %v5779_v38  ;;  %v13430_v14 = vand.u32 4294901760, %v9398_v29  ;;  %v9489_v40 = vsub.f32 %v5776_v45, %v5776_v45 }
 0x166   : > { %2585 = vmatpush.msrb.mxu0 %v13428_v52  ;;  %2736 = vmatpush.msrb.mxu3 %v2735_v19  ;;  %v5773_v19 = vsel %vm460_vm1, 1.0, %v13245_v62  ;;  %v12959_v52 = vand.u32 4294901760, %v9456_v61 }
 0x167   : > { %6144 = vmatpush.msk.msrb.mxu2 %vm12956_vm3, %v13173_v47  ;;  %2467 = vmatpush.msra.mxu1 %v2466_v56  ;;  %v2764_v57 = vsub.f32 %v9398_v29, %v13430_v14  ;;  %v2753_v38 = vand.u32 4294901760, %v2752_v34  ;;  %vm454_vm3 = vcmp.eq.s32.totalorder %v13432_v3, %v8909_v36  ;;  %v2759_v56 = vand.u32 4294901760, %v2758_v6 }
 0x168   : > { %2589 = vmatpush.msrb.mxu0 %v13431_v10  ;;  %2742 = vmatpush.msrb.mxu3 %v2741_v60  ;;  %v13433_v60 = vand.u32 4294901760, %v9054_v50  ;;  %v13434_v34 = vand.u32 4294901760, %v9438_v0  ;;  %v12960_v14 = vand.u32 4294901760, %v9471_v17  ;;  %v9507_v10 = vsub.f32 %v5773_v19, %v5773_v19 }
 0x169   : > { %6145 = vmatpush.msk.msrb.mxu2 %vm12957_vm12, %v13173_v47  ;;  %2473 = vmatpush.msra.mxu1 %v2472_v1  ;;  %v13435_v1 = vld [vmem:[#allocation52_spill] sm:$0xff]  ;;  %v2765_v50 = vand.u32 4294901760, %v2764_v57  ;;  %v5767_v6 = vsel %vm454_vm3, 1.0, %v13245_v62  ;;  %v2776_v19 = vsub.f32 %v9456_v61, %v12959_v52  ;;  %v13438_v57 = vand.u32 4294901760, %v9082_v5 }
 0x16a   : > { %2593 = vmatpush.msrb.mxu0 %v13433_v60  ;;  %2748 = vmatpush.msrb.mxu3 %v2747_v35  ;;  %v2770_v45 = vsub.f32 %v9438_v0, %v13434_v34  ;;  %vm451_vm12 = vcmp.eq.s32.totalorder %v13435_v1, %v8909_v36  ;;  %v13436_v35 = vand.u32 4294901760, %v9067_v16  ;;  %v2787_v60 = vand.u32 4294901760, %v9489_v40  ;;  %v13510_v1 = vld [vmem:[#allocation69_spill] sm:$0xff] }
 0x16b   : > { %6146 = vmatpush.msk.msrb.mxu2 %vm12958_vm4, %v13173_v47  ;;  %2479 = vmatpush.msra.mxu1 %v2478_v39  ;;  %v9525_v34 = vsub.f32 %v5770_v59, %v5770_v59  ;;  %v13437_v39 = vld [vmem:[#allocation53_spill] sm:$0xff]  ;;  %v5764_v16 = vsel %vm451_vm12, 1.0, %v13245_v62  ;;  %v2782_v59 = vsub.f32 %v9471_v17, %v12960_v14  ;;  %v9547_v52 = vsub.f32 %v5767_v6, %v5767_v6 }
 0x16c   : > { %2597 = vmatpush.msrb.mxu0 %v13436_v35  ;;  %2754 = vmatpush.msrb.mxu3 %v2753_v38  ;;  %vm448_vm4 = vcmp.eq.s32.totalorder %v13437_v39, %v8909_v36  ;;  %v2771_v38 = vand.u32 4294901760, %v2770_v45  ;;  %v2793_v35 = vand.u32 4294901760, %v9507_v10  ;;  %v2777_v45 = vand.u32 4294901760, %v2776_v19 }
 0x16d   : > { %6128 = vmatpush.msk.msrb.mxu1 %vm445_vm9, %v13173_v47  ;;  %6147 = vmatpush.msk.msrb.mxu2 %vm484_vm15, %v13173_v47  ;;  %v5761_v5 = vsel %vm448_vm4, 1.0, %v13245_v62  ;;  %v2788_v6 = vsub.f32 %v9489_v40, %v2787_v60  ;;  %v9567_v14 = vsub.f32 %v5764_v16, %v5764_v16  ;;  %v2805_v16 = vand.u32 4294901760, %v9547_v52 }
 0x16e   : > { %2601 = vmatpush.msrb.mxu0 %v13438_v57  ;;  %2760 = vmatpush.msrb.mxu3 %v2759_v56  ;;  %v13439_v56 = vand.u32 4294901760, %v9092_v13  ;;  %v2799_v57 = vand.u32 4294901760, %v9525_v34  ;;  %v13440_v13 = vand.u32 4294901760, %v9105_v28  ;;  %v2794_v19 = vsub.f32 %v9507_v10, %v2793_v35 }
 0x16f   : > { %6129 = vmatpush.msk.msrb.mxu1 %vm442_vm10, %v13173_v47  ;;  %6148 = vmatpush.msk.msrb.mxu2 %vm481_vm6, %v13173_v47  ;;  %v13441_v28 = vand.u32 4294901760, %v9160_v21  ;;  %vm13442_vm9 = vcmp.eq.s32.totalorder %v13378_v22, %v8909_v36  ;;  %v13443_v21 = vand.u32 4294901760, %v9168_v31  ;;  %vm13444_vm10 = vcmp.eq.s32.totalorder %v13380_v25, %v8909_v36 }
 0x170   : > { %2605 = vmatpush.msrb.mxu0 %v13439_v56  ;;  %2766 = vmatpush.msrb.mxu3 %v2765_v50  ;;  %v2783_v50 = vand.u32 4294901760, %v2782_v59  ;;  %v9583_v56 = vsub.f32 %v5761_v5, %v5761_v5  ;;  %v2800_v59 = vsub.f32 %v9525_v34, %v2799_v57  ;;  %v2811_v5 = vand.u32 4294901760, %v9567_v14 }
 0x171   : > { %6130 = vmatpush.msk.msrb.mxu1 %vm439_vm0, %v13173_v47  ;;  %6149 = vmatpush.msk.msrb.mxu2 %vm478_vm5, %v13173_v47  ;;  %v13445_v31 = vand.u32 4294901760, %v9207_v33  ;;  %vm13446_vm0 = vcmp.eq.s32.totalorder %v13381_v46, %v8909_v36 }
 0x172   : > { %2609 = vmatpush.msrb.mxu0 %v13440_v13  ;;  %2772 = vmatpush.msrb.mxu3 %v2771_v38  ;;  %v2789_v38 = vand.u32 4294901760, %v2788_v6  ;;  %v2806_v6 = vsub.f32 %v9547_v52, %v2805_v16  ;;  %v2817_v13 = vand.u32 4294901760, %v9583_v56 }
 0x173   : > { %6131 = vmatpush.msk.msrb.mxu1 %vm436_vm11, %v13173_v47  ;;  %6150 = vmatpush.msk.msrb.mxu2 %vm475_vm2, %v13173_v47  ;;  %vm13447_vm11 = vcmp.eq.s32.totalorder %v13419_v30, %v8909_v36 }
 0x174   : > { %2613 = vmatpush.msrb.mxu0 %v13441_v28  ;;  %2778 = vmatpush.msrb.mxu3 %v2777_v45  ;;  %v2795_v45 = vand.u32 4294901760, %v2794_v19  ;;  %v2812_v19 = vsub.f32 %v9567_v14, %v2811_v5  ;;  %v13448_v28 = vand.u32 4294901760, %v9228_v4  ;;  %v2807_v33 = vand.u32 4294901760, %v2806_v6  ;;  %v13457_v6 = vld [vmem:[#allocation58_spill] sm:$0xff] }
 0x175   : > { %6132 = vmatpush.msk.msrb.mxu1 %vm13442_vm9, %v13173_v47  ;;  %6151 = vmatpush.msk.msrb.mxu2 %vm472_vm7, %v13173_v47  ;;  %vm13449_vm9 = vcmp.eq.s32.totalorder %v13382_v15, %v8909_v36 }
 0x176   : > { %2617 = vmatpush.msrb.mxu0 %v13443_v21  ;;  %2784 = vmatpush.msrb.mxu3 %v2783_v50  ;;  %v2801_v50 = vand.u32 4294901760, %v2800_v59  ;;  %v13450_v59 = vand.u32 4294901760, %v9268_v51  ;;  %v2813_v4 = vand.u32 4294901760, %v2812_v19  ;;  %v13452_v21 = vand.u32 4294901760, %v9294_v18  ;;  %v13466_v19 = vld [vmem:[#allocation55_spill] sm:$0xff] }
 0x177   : > { %6133 = vmatpush.msk.msrb.mxu1 %vm13444_vm10, %v13173_v47  ;;  %6152 = vmatpush.msk.msrb.mxu2 %vm469_vm8, %v13173_v47  ;;  %vm13451_vm10 = vcmp.eq.s32.totalorder %v13383_v2, %v8909_v36  ;;  %v13454_v51 = vand.u32 4294901760, %v9321_v27  ;;  %v13456_v18 = vand.u32 4294901760, %v9352_v43  ;;  %v13460_v27 = vld [vmem:[#allocation82_spill] sm:$0xff]  ;;  %v13462_v43 = vld [vmem:[#allocation31_spill] sm:$0xff] }
 0x178   : > { %2621 = vmatpush.msrb.mxu0 %v13445_v31  ;;  %2790 = vmatpush.msrb.mxu3 %v2789_v38  ;;  %v2818_v38 = vsub.f32 %v9583_v56, %v2817_v13  ;;  %v13458_v31 = vld [vmem:[#allocation56_spill] sm:$0xff] }
 0x179   : > { %6134 = vmatpush.msk.msrb.mxu1 %vm13446_vm0, %v13173_v47  ;;  %6153 = vmatpush.msk.msrb.mxu2 %vm13447_vm11, %v13173_v47  ;;  %vm13453_vm0 = vcmp.eq.s32.totalorder %v13385_v11, %v8909_v36  ;;  %vm13455_vm11 = vcmp.eq.s32.totalorder %v13387_v49, %v8909_v36 }
 0x17a   : > { %2625 = vmatpush.msrb.mxu0 %v13448_v28  ;;  %2796 = vmatpush.msrb.mxu3 %v2795_v45  ;;  %v2819_v45 = vand.u32 4294901760, %v2818_v38  ;;  %v13467_v28 = vld [vmem:[#allocation32_spill] sm:$0xff]  ;;  %v13470_v38 = vld [vmem:[#allocation86_spill] sm:$0xff] }
 0x17b   : > { %6135 = vmatpush.msk.msrb.mxu1 %vm13449_vm9, %v13173_v47  ;;  %6154 = vmatpush.msk.msrb.mxu2 %vm463_vm14, %v13173_v47  ;;  %vm13459_vm9 = vcmp.eq.s32.totalorder %v13390_v48, %v8909_v36 }
 0x17c   : > { %2629 = vmatpush.msrb.mxu0 %v13450_v59  ;;  %2802 = vmatpush.msrb.mxu3 %v2801_v50  ;;  %v13464_v50 = vld [vmem:[#allocation84_spill] sm:$0xff]  ;;  %v13472_v59 = vld [vmem:[#allocation33_spill] sm:$0xff] }
 0x17d   : > { %6136 = vmatpush.msk.msrb.mxu1 %vm13451_vm10, %v13173_v47  ;;  %6155 = vmatpush.msk.msrb.mxu2 %vm460_vm1, %v13173_v47  ;;  %vm13461_vm10 = vcmp.eq.s32.totalorder %v13392_v58, %v8909_v36 }
 0x17e   : > { %2633 = vmatpush.msrb.mxu0 %v13452_v21  ;;  %2808 = vmatpush.msrb.mxu3 %v2807_v33  ;;  %v13469_v33 = vand.u32 4294901760, %v13460_v27  ;;  %v13475_v21 = vld [vmem:[#allocation90_spill] sm:$0xff] }
 0x17f   : > { %6137 = vmatpush.msk.msrb.mxu1 %vm13453_vm0, %v13173_v47  ;;  %6156 = vmatpush.msk.msrb.mxu2 %vm457_vm13, %v13173_v47  ;;  %vm13463_vm0 = vcmp.eq.s32.totalorder %v13462_v43, %v8909_v36 }
 0x180   : > { %2637 = vmatpush.msrb.mxu0 %v13454_v51  ;;  %2814 = vmatpush.msrb.mxu3 %v2813_v4  ;;  %v13474_v4 = vand.u32 4294901760, %v13464_v50  ;;  %v13477_v51 = vand.u32 4294901760, %v13470_v38 }
 0x181   : > { %6138 = vmatpush.msk.msrb.mxu1 %vm13455_vm11, %v13173_v47  ;;  %6157 = vmatpush.msk.msrb.mxu2 %vm454_vm3, %v13173_v47  ;;  %vm13465_vm11 = vcmp.eq.s32.totalorder %v13396_v53, %v8909_v36 }
 0x182   : > { %2641 = vmatpush.msrb.mxu0 %v13456_v18  ;;  %2820 = vmatpush.msrb.mxu3 %v2819_v45  ;;  %v13476_v45 = vld [vmem:[#allocation54_spill] sm:$0xff] }
 0x183   : > { %2380 = vmatmul.f32.vlgmr.msra.gmra.mxu0 %v13457_v6  ;;  %2574 = vmatmul.f32.vlgmr.msra.gmra.mxu3 %v13458_v31  ;;  %v13478_v18 = vld [vmem:[#allocation18_spill] sm:$0xff]  ;;  %v13508_v31 = vld [vmem:[#allocation60_spill] sm:$0xff] }
 0x184   : > { %6139 = vmatpush.msk.msrb.mxu1 %vm13459_vm9, %v13173_v47  ;;  %6158 = vmatpush.msk.msrb.mxu2 %vm451_vm12, %v13173_v47  ;;  %vm13468_vm9 = vcmp.eq.s32.totalorder %v13467_v28, %v8909_v36  ;;  %v13523_v28 = vld [vmem:[#allocation79_spill] sm:$0xff] }
 0x185   : > { %2828 = vmatpush.msra.mxu0 %v13460_v27  ;;  %6176 = vmatpush.msk.msra.mxu3 %vm13461_vm10, %v13173_v47  ;;  %vm13471_vm10 = vcmp.eq.s32.totalorder %v13398_v9, %v8909_v36  ;;  %v13481_v27 = vand.u32 4294901760, %v13475_v21 }
 0x186   : > { %6140 = vmatpush.msk.msrb.mxu1 %vm13463_vm0, %v13173_v47  ;;  %6159 = vmatpush.msk.msrb.mxu2 %vm448_vm4, %v13173_v47  ;;  %vm13473_vm0 = vcmp.eq.s32.totalorder %v13472_v59, %v8909_v36  ;;  %v13521_v59 = vld [vmem:[#allocation78_spill] sm:$0xff] }
 0x187   : > { %2831 = vmatpush.msra.mxu0 %v13464_v50  ;;  %6177 = vmatpush.msk.msra.mxu3 %vm13465_vm11, %v13173_v47  ;;  %vm13479_vm11 = vcmp.eq.s32.totalorder %v13478_v18, %v8909_v36  ;;  %v13482_v50 = vld [vmem:[#allocation61_spill] sm:$0xff] }
 0x188   : > { %2535 = vmatmul.f32.vlgmr.msra.gmra.mxu2 %v13466_v19  ;;  %6141 = vmatpush.msk.msrb.mxu1 %vm13468_vm9, %v13173_v47  ;;  %vm13480_vm9 = vcmp.eq.s32.totalorder %v13392_v58, %v8909_v36 }
 0x189   : > { %2922 = vmatpush.msra.mxu2 %v13469_v33  ;;  %2834 = vmatpush.msra.mxu0 %v13470_v38  ;;  %v13484_v33 = vand.u32 4294901760, %v9364_v7  ;;  %v13485_v38 = vld [vmem:[#allocation57_spill] sm:$0xff] }
 0x18a   : > { %6178 = vmatpush.msk.msra.mxu3 %vm13471_vm10, %v13173_v47  ;;  %6142 = vmatpush.msk.msrb.mxu1 %vm13473_vm0, %v13173_v47  ;;  %vm13483_vm10 = vcmp.eq.s32.totalorder %v13396_v53, %v8909_v36  ;;  %vm13486_vm0 = vcmp.eq.s32.totalorder %v13398_v9, %v8909_v36 }
 0x18b   : > { %2926 = vmatpush.msra.mxu2 %v13474_v4  ;;  %2837 = vmatpush.msra.mxu0 %v13475_v21  ;;  %v13487_v4 = vand.u32 4294901760, %v9377_v41  ;;  %v13493_v21 = vld [vmem:[#allocation40_spill] sm:$0xff] }
 0x18c   : > { %6179 = vmatpush.msk.msra.mxu3 %vm484_vm15, %v13173_v47  ;;  %2481 = vmatmul.f32.vlgmr.msra.gmra.mxu1 %v13476_v45 }
 0x18d   : > { %2930 = vmatpush.msra.mxu2 %v13477_v51  ;;  %6143 = vmatpush.msk.msrb.mxu1 %vm13479_vm11, %v13173_v47 }
 0x18e   : > { %2840 = vmatpush.msra.mxu0 %v9364_v7  ;;  %6180 = vmatpush.msk.msra.mxu3 %vm481_vm6, %v13173_v47  ;;  %v13488_v7 = vand.u32 4294901760, %v9398_v29 }
 0x18f   : > { %6160 = vmatpush.msk.msra.mxu1 %vm13480_vm9, %v13173_v47  ;;  %2934 = vmatpush.msra.mxu2 %v13481_v27 }
 0x190   : > { %2843 = vmatpush.msra.mxu0 %v9377_v41  ;;  %6181 = vmatpush.msk.msra.mxu3 %vm478_vm5, %v13173_v47  ;;  %v13489_v41 = vand.u32 4294901760, %v9438_v0 }
 0x191   : > { %2721 = vmatmul.f32.vlgmr.msrb.gmra.mxu2 %v13482_v50  ;;  %6161 = vmatpush.msk.msra.mxu1 %vm13483_vm10, %v13173_v47  ;;  %vm12996_vm10 = vcmp.eq.s32.totalorder %v13511_v63, %v8909_v36 }
 0x192   : > { %2938 = vmatpush.msra.mxu2 %v13484_v33  ;;  %2846 = vmatpush.msra.mxu0 %v9398_v29  ;;  %v13491_v29 = vand.u32 4294901760, %v9456_v61  ;;  %v13499_v33 = vld [vmem:[#allocation59_spill] sm:$0xff]  ;;  %v5818_v24 = vsel %vm12996_vm10, 1.0, %v13245_v62 }
 0x193   : > { %6182 = vmatpush.msk.msra.mxu3 %vm475_vm2, %v13173_v47  ;;  %2643 = vmatmul.f32.vlgmr.msrb.gmra.mxu0 %v13476_v45  ;;  %v10112_v44 = vsub.f32 %v5818_v24, %v5818_v24 }
 0x194   : > { %2822 = vmatmul.f32.vlgmr.msrb.gmra.mxu3 %v13485_v38  ;;  %6162 = vmatpush.msk.msra.mxu1 %vm13486_vm0, %v13173_v47 }
 0x195   : > { %2942 = vmatpush.msra.mxu2 %v13487_v4  ;;  %2849 = vmatpush.msra.mxu0 %v9438_v0  ;;  %v13492_v0 = vand.u32 4294901760, %v9471_v17  ;;  %v13500_v4 = vld [vmem:[#allocation63_spill] sm:$0xff] }
 0x196   : > { %6183 = vmatpush.msk.msra.mxu3 %vm472_vm7, %v13173_v47  ;;  %2680 = vmatmul.f32.vlgmr.msrb.gmra.mxu1 %v13476_v45 }
 0x197   : > { %6163 = vmatpush.msk.msra.mxu1 %vm484_vm15, %v13173_v47  ;;  %2946 = vmatpush.msra.mxu2 %v13488_v7  ;;  %vm13490_vm15 = vcmp.eq.s32.totalorder %v13419_v30, %v8909_v36 }
 0x198   : > { %2852 = vmatpush.msra.mxu0 %v9456_v61  ;;  %6184 = vmatpush.msk.msra.mxu3 %vm469_vm8, %v13173_v47  ;;  %v13494_v61 = vld [vmem:[#allocation42_spill] sm:$0xff] }
 0x199   : > { %6164 = vmatpush.msk.msra.mxu1 %vm481_vm6, %v13173_v47  ;;  %2950 = vmatpush.msra.mxu2 %v13489_v41  ;;  %vm541_vm6 = vcmp.eq.s32.totalorder %v13493_v21, %v8909_v36 }
 0x19a   : > { %2855 = vmatpush.msra.mxu0 %v9471_v17  ;;  %6185 = vmatpush.msk.msra.mxu3 %vm13490_vm15, %v13173_v47  ;;  %v5854_v17 = vsel %vm541_vm6, 1.0, %v13245_v62 }
 0x19b   : > { %6165 = vmatpush.msk.msra.mxu1 %vm478_vm5, %v13173_v47  ;;  %2954 = vmatpush.msra.mxu2 %v13491_v29  ;;  %vm538_vm5 = vcmp.eq.s32.totalorder %v13494_v61, %v8909_v36  ;;  %v13501_v29 = vld [vmem:[#allocation64_spill] sm:$0xff]  ;;  %v13668_v61 = vld [vmem:[#allocation45_spill] sm:$0xff] }
 0x19c   : > { %2858 = vmatpush.msra.mxu0 %v9489_v40  ;;  %6186 = vmatpush.msk.msra.mxu3 %vm463_vm14, %v13173_v47  ;;  %v13495_v40 = vld [vmem:[#allocation46_spill] sm:$0xff] }
 0x19d   : > { %6166 = vmatpush.msk.msra.mxu1 %vm475_vm2, %v13173_v47  ;;  %2958 = vmatpush.msra.mxu2 %v13492_v0  ;;  %vm535_vm2 = vcmp.eq.s32.totalorder %v13495_v40, %v8909_v36 }
 0x19e   : > { %2861 = vmatpush.msra.mxu0 %v9507_v10  ;;  %6187 = vmatpush.msk.msra.mxu3 %vm460_vm1, %v13173_v47  ;;  %v9865_v10 = vsub.f32 %v5854_v17, %v5854_v17  ;;  %v13502_v17 = vld [vmem:[#allocation65_spill] sm:$0xff] }
 0x19f   : > { %6167 = vmatpush.msk.msra.mxu1 %vm472_vm7, %v13173_v47  ;;  %2962 = vmatpush.msra.mxu2 %v2787_v60  ;;  %v5851_v60 = vsel %vm538_vm5, 1.0, %v13245_v62  ;;  %vm13496_vm7 = vmmov %vm13490_vm15  ;;  %vm12998_vm15 = vcmp.eq.s32.totalorder %v13515_v55, %v8909_v36 }
 0x1a0   : > { %2864 = vmatpush.msra.mxu0 %v9525_v34  ;;  %6188 = vmatpush.msk.msra.mxu3 %vm457_vm13, %v13173_v47  ;;  %v9874_v51 = vsub.f32 %v5851_v60, %v5851_v60  ;;  %v5848_v34 = vsel %vm535_vm2, 1.0, %v13245_v62  ;;  %v5815_v24 = vsel %vm12998_vm15, 1.0, %v13245_v62 }
 0x1a1   : > { %6168 = vmatpush.msk.msra.mxu1 %vm469_vm8, %v13173_v47  ;;  %2966 = vmatpush.msra.mxu2 %v2793_v35  ;;  %v13497_v35 = vld [vmem:[#allocation50_spill] sm:$0xff]  ;;  %v10160_v9 = vsub.f32 %v5815_v24, %v5815_v24  ;;  %v13527_v24 = vld [vmem:[#allocation83_spill] sm:$0xff] }
 0x1a2   : > { %2867 = vmatpush.msra.mxu0 %v9547_v52  ;;  %6189 = vmatpush.msk.msra.mxu3 %vm454_vm3, %v13173_v47  ;;  %vm532_vm8 = vcmp.eq.s32.totalorder %v13497_v35, %v8909_v36  ;;  %v9902_v52 = vsub.f32 %v5848_v34, %v5848_v34  ;;  %v12962_v41 = vand.u32 4294901760, %v9874_v51 }
 0x1a3   : > { %6169 = vmatpush.msk.msra.mxu1 %vm13496_vm7, %v13173_v47  ;;  %2970 = vmatpush.msra.mxu2 %v2799_v57  ;;  %v13498_v57 = vld [vmem:[#allocation62_spill] sm:$0xff]  ;;  %v5845_v27 = vsel %vm532_vm8, 1.0, %v13245_v62  ;;  %v13537_v20 = vand.u32 4294901760, %v10160_v9 }
 0x1a4   : > { %2870 = vmatpush.msra.mxu0 %v9567_v14  ;;  %6190 = vmatpush.msk.msra.mxu3 %vm451_vm12, %v13173_v47  ;;  %vm529_vm11 = vcmp.eq.s32.totalorder %v13498_v57, %v8909_v36  ;;  %v9928_v14 = vsub.f32 %v5845_v27, %v5845_v27  ;;  %v3075_v34 = vsub.f32 %v9874_v51, %v12962_v41  ;;  %v13503_v27 = vld [vmem:[#allocation66_spill] sm:$0xff]  ;;  %v13505_v50 = vand.u32 4294901760, %v9902_v52 }
 0x1a5   : > { %6170 = vmatpush.msk.msra.mxu1 %vm463_vm14, %v13173_v47  ;;  %2974 = vmatpush.msra.mxu2 %v2805_v16  ;;  %v12961_v16 = vand.u32 4294901760, %v9865_v10  ;;  %vm12983_vm14 = vcmp.eq.s32.totalorder %v13500_v4, %v8909_v36  ;;  %v5842_v7 = vsel %vm529_vm11, 1.0, %v13245_v62  ;;  %vm12980_vm9 = vcmp.eq.s32.totalorder %v13503_v27, %v8909_v36 }
 0x1a6   : > { %2873 = vmatpush.msra.mxu0 %v9583_v56  ;;  %6191 = vmatpush.msk.msra.mxu3 %vm448_vm4, %v13173_v47  ;;  %v5839_v0 = vsel %vm12983_vm14, 1.0, %v13245_v62  ;;  %v3076_v45 = vand.u32 4294901760, %v3075_v34  ;;  %v13507_v34 = vld [vmem:[#allocation68_spill] sm:$0xff] }
 0x1a7   : > { %2876 = vmatmul.f32.vlgmr.msra.gmra.mxu0 %v13499_v33  ;;  %6171 = vmatpush.msk.msra.mxu1 %vm460_vm1, %v13173_v47  ;;  %vm12977_vm1 = vcmp.eq.s32.totalorder %v13501_v29, %v8909_v36  ;;  %v3069_v56 = vsub.f32 %v9865_v10, %v12961_v16  ;;  %v5830_v33 = vsel %vm12980_vm9, 1.0, %v13245_v62 }
 0x1a8   : > { %2978 = vmatpush.msra.mxu2 %v2811_v5  ;;  %6192 = vmatpush.msk.msrb.mxu0 %vm541_vm6, %v13173_v47  ;;  %v9936_v5 = vsub.f32 %v5842_v7, %v5842_v7  ;;  %v5836_v60 = vsel %vm12977_vm1, 1.0, %v13245_v62  ;;  %v9975_v7 = vsub.f32 %v5839_v0, %v5839_v0  ;;  %v13504_v0 = vld [vmem:[#allocation67_spill] sm:$0xff] }
 0x1a9   : > { %6208 = vmatpush.msk.msrb.mxu3 %vm541_vm6, %v13173_v47  ;;  %6172 = vmatpush.msk.msra.mxu1 %vm457_vm13, %v13173_v47  ;;  %vm12978_vm13 = vcmp.eq.s32.totalorder %v13502_v17, %v8909_v36  ;;  %v9987_v41 = vsub.f32 %v5836_v60, %v5836_v60  ;;  %v3070_v16 = vand.u32 4294901760, %v3069_v56  ;;  %v3081_v60 = vsub.f32 %v9902_v52, %v13505_v50 }
 0x1aa   : > { %2982 = vmatpush.msra.mxu2 %v2817_v13  ;;  %6193 = vmatpush.msk.msrb.mxu0 %vm538_vm5, %v13173_v47  ;;  %v5833_v13 = vsel %vm12978_vm13, 1.0, %v13245_v62  ;;  %v13506_v50 = vand.u32 4294901760, %v9928_v14  ;;  %v13509_v6 = vand.u32 4294901760, %v9936_v5 }
 0x1ab   : > { %6209 = vmatpush.msk.msrb.mxu3 %vm538_vm5, %v13173_v47  ;;  %6173 = vmatpush.msk.msra.mxu1 %vm454_vm3, %v13173_v47  ;;  %vm12982_vm3 = vcmp.eq.s32.totalorder %v13504_v0, %v8909_v36  ;;  %v10009_v19 = vsub.f32 %v5833_v13, %v5833_v13  ;;  %v3082_v3 = vand.u32 4294901760, %v3081_v60  ;;  %v13512_v60 = vld [vmem:[#allocation72_spill] sm:$0xff] }
 0x1ac   : > { %3169 = vmatpush.msrb.mxu2 %v9865_v10  ;;  %6194 = vmatpush.msk.msrb.mxu0 %vm535_vm2, %v13173_v47  ;;  %v3087_v56 = vsub.f32 %v9928_v14, %v13506_v50  ;;  %v5827_v13 = vsel %vm12982_vm3, 1.0, %v13245_v62  ;;  %v3093_v50 = vsub.f32 %v9936_v5, %v13509_v6  ;;  %vm13012_vm0 = vcmp.eq.s32.totalorder %v13512_v60, %v8909_v36 }
 0x1ad   : > { %6210 = vmatpush.msk.msrb.mxu3 %vm535_vm2, %v13173_v47  ;;  %2984 = vmatmul.f32.vlgmr.msra.gmra.mxu2 %v13485_v38  ;;  %v10053_v6 = vsub.f32 %v5827_v13, %v5827_v13 }
 0x1ae   : > { %3172 = vmatpush.msrb.mxu2 %v9874_v51  ;;  %6174 = vmatpush.msk.msra.mxu1 %vm451_vm12, %v13173_v47  ;;  %vm12987_vm12 = vcmp.eq.s32.totalorder %v13507_v34, %v8909_v36  ;;  %v3088_v39 = vand.u32 4294901760, %v3087_v56  ;;  %v13514_v56 = vand.u32 4294901760, %v9987_v41 }
 0x1af   : > { %6195 = vmatpush.msk.msrb.mxu0 %vm532_vm8, %v13173_v47  ;;  %6211 = vmatpush.msk.msrb.mxu3 %vm532_vm8, %v13173_v47 }
 0x1b0   : > { %3021 = vmatmul.f32.vlgmr.msra.gmra.mxu3 %v13485_v38  ;;  %3175 = vmatpush.msrb.mxu2 %v9902_v52  ;;  %v10037_v38 = vsub.f32 %v5830_v33, %v5830_v33 }
 0x1b1   : > { %6175 = vmatpush.msk.msra.mxu1 %vm448_vm4, %v13173_v47  ;;  %6196 = vmatpush.msk.msrb.mxu0 %vm529_vm11, %v13173_v47  ;;  %vm12990_vm4 = vcmp.eq.s32.totalorder %v13510_v1, %v8909_v36 }
 0x1b2   : > { %6212 = vmatpush.msk.msrb.mxu3 %vm529_vm11, %v13173_v47  ;;  %2915 = vmatmul.f32.vlgmr.msra.gmra.mxu1 %v13508_v31  ;;  %v13513_v31 = vand.u32 4294901760, %v9975_v7  ;;  %v5821_v13 = vsel %vm12990_vm4, 1.0, %v13245_v62  ;;  %v13520_v54 = vand.u32 4294901760, %v10037_v38 }
 0x1b3   : > { %3071 = vmatpush.msrb.mxu1 %v3070_v16  ;;  %3178 = vmatpush.msrb.mxu2 %v9928_v14  ;;  %v5824_v16 = vsel %vm12987_vm12, 1.0, %v13245_v62  ;;  %v10108_v33 = vsub.f32 %v5821_v13, %v5821_v13 }
 0x1b4   : > { %6197 = vmatpush.msk.msrb.mxu0 %vm12983_vm14, %v13173_v47  ;;  %6213 = vmatpush.msk.msrb.mxu3 %vm12983_vm14, %v13173_v47  ;;  %v3099_v23 = vsub.f32 %v9975_v7, %v13513_v31  ;;  %v3105_v31 = vsub.f32 %v9987_v41, %v13514_v56  ;;  %v10087_v30 = vsub.f32 %v5824_v16, %v5824_v16  ;;  %v13516_v56 = vld [vmem:[#allocation74_spill] sm:$0xff] }
 0x1b5   : > { %3077 = vmatpush.msrb.mxu1 %v3076_v45  ;;  %3181 = vmatpush.msrb.mxu2 %v9936_v5  ;;  %v3094_v45 = vand.u32 4294901760, %v3093_v50  ;;  %v5902_v50 = vsel %vm13012_vm0, 1.0, %v13245_v62  ;;  %vm13018_vm7 = vcmp.eq.s32.totalorder %v13516_v56, %v8909_v36  ;;  %v3117_v18 = vsub.f32 %v10037_v38, %v13520_v54 }
 0x1b6   : > { %6198 = vmatpush.msk.msrb.mxu0 %vm12977_vm1, %v13173_v47  ;;  %6214 = vmatpush.msk.msrb.mxu3 %vm12977_vm1, %v13173_v47  ;;  %v3100_v26 = vand.u32 4294901760, %v3099_v23  ;;  %vm13021_vm1 = vcmp.eq.s32.totalorder %v13518_v12, %v8909_v36  ;;  %v10130_v23 = vsub.f32 %v5902_v50, %v5902_v50  ;;  %v5899_v13 = vsel %vm13018_vm7, 1.0, %v13245_v62  ;;  %v13524_v50 = vld [vmem:[#allocation81_spill] sm:$0xff] }
 0x1b7   : > { %3083 = vmatpush.msrb.mxu1 %v3082_v3  ;;  %3184 = vmatpush.msrb.mxu2 %v9975_v7  ;;  %v13517_v3 = vand.u32 4294901760, %v10009_v19  ;;  %v5896_v42 = vsel %vm13021_vm1, 1.0, %v13245_v62  ;;  %vm577_vm14 = vcmp.eq.s32.totalorder %v13524_v50, %v8909_v36  ;;  %v3118_v53 = vand.u32 4294901760, %v3117_v18 }
 0x1b8   : > { %6199 = vmatpush.msk.msrb.mxu0 %vm12978_vm13, %v13173_v47  ;;  %6215 = vmatpush.msk.msrb.mxu3 %vm12978_vm13, %v13173_v47  ;;  %v13525_v43 = vand.u32 4294901760, %v10087_v30  ;;  %v10190_v48 = vsub.f32 %v5896_v42, %v5896_v42 }
 0x1b9   : > { %v3111_v16 = vsub.f32 %v10009_v19, %v13517_v3  ;;  %3089 = vmatpush.msrb.mxu1 %v3088_v39  ;;  %3187 = vmatpush.msrb.mxu2 %v9987_v41  ;;  %v13519_v39 = vld [vmem:[#allocation76_spill] sm:$0xff]  ;;  %v3106_v3 = vand.u32 4294901760, %v3105_v31  ;;  %v13522_v31 = vand.u32 4294901760, %v10053_v6 }
 0x1ba   : > { %6200 = vmatpush.msk.msrb.mxu0 %vm12980_vm9, %v13173_v47  ;;  %6216 = vmatpush.msk.msrb.mxu3 %vm12980_vm9, %v13173_v47  ;;  %vm13002_vm13 = vcmp.eq.s32.totalorder %v13519_v39, %v8909_v36  ;;  %vm580_vm9 = vcmp.eq.s32.totalorder %v13521_v59, %v8909_v36  ;;  %v3129_v58 = vsub.f32 %v10087_v30, %v13525_v43 }
 0x1bb   : > { %3095 = vmatpush.msrb.mxu1 %v3094_v45  ;;  %3190 = vmatpush.msrb.mxu2 %v10009_v19  ;;  %v3112_v45 = vand.u32 4294901760, %v3111_v16  ;;  %v3123_v54 = vsub.f32 %v10053_v6, %v13522_v31  ;;  %v5812_v16 = vsel %vm13002_vm13, 1.0, %v13245_v62  ;;  %v10168_v31 = vsub.f32 %v5899_v13, %v5899_v13  ;;  %13526 = vst [vmem:[#allocation82_spill] sm:$0xff] %v10190_v48 }
 0x1bc   : > { %6201 = vmatpush.msk.msrb.mxu0 %vm12982_vm3, %v13173_v47  ;;  %6217 = vmatpush.msk.msrb.mxu3 %vm12982_vm3, %v13173_v47  ;;  %vm13008_vm3 = vcmp.eq.s32.totalorder %v13523_v28, %v8909_v36  ;;  %v5893_v13 = vsel %vm580_vm9, 1.0, %v13245_v62  ;;  %v10205_v42 = vsub.f32 %v5812_v16, %v5812_v16  ;;  %v13530_v16 = vld [vmem:[#allocation85_spill] sm:$0xff]  ;;  %v3130_v46 = vand.u32 4294901760, %v3129_v58 }
 0x1bd   : > { %3101 = vmatpush.msrb.mxu1 %v3100_v26  ;;  %3193 = vmatpush.msrb.mxu2 %v10037_v38  ;;  %v3124_v18 = vand.u32 4294901760, %v3123_v54  ;;  %v5809_v26 = vsel %vm13008_vm3, 1.0, %v13245_v62  ;;  %v10213_v11 = vsub.f32 %v5893_v13, %v5893_v13  ;;  %v5890_v54 = vsel %vm577_vm14, 1.0, %v13245_v62 }
 0x1be   : > { %6202 = vmatpush.msk.msrb.mxu0 %vm12987_vm12, %v13173_v47  ;;  %6218 = vmatpush.msk.msrb.mxu3 %vm12987_vm12, %v13173_v47  ;;  %vm574_vm12 = vcmp.eq.s32.totalorder %v13527_v24, %v8909_v36  ;;  %v10241_v25 = vsub.f32 %v5809_v26, %v5809_v26  ;;  %v13534_v26 = vld [vmem:[#allocation89_spill] sm:$0xff]  ;;  %v13535_v22 = vand.u32 4294901760, %v10168_v31 }
 0x1bf   : > { %3107 = vmatpush.msrb.mxu1 %v3106_v3  ;;  %3196 = vmatpush.msrb.mxu2 %v10053_v6  ;;  %v13528_v3 = vand.u32 4294901760, %v10108_v33  ;;  %13529 = vst [vmem:[#allocation84_spill] sm:$0xff] %v10213_v11  ;;  %v5887_v15 = vsel %vm574_vm12, 1.0, %v13245_v62  ;;  %v13543_v39 = vand.u32 4294901760, %v10213_v11  ;;  %v13647_v24 = vld [vmem:[#allocation33_spill] sm:$0xff] }
 0x1c0   : > { %6203 = vmatpush.msk.msrb.mxu0 %vm12990_vm4, %v13173_v47  ;;  %6219 = vmatpush.msk.msrb.mxu3 %vm12990_vm4, %v13173_v47  ;;  %vm571_vm4 = vcmp.eq.s32.totalorder %v13530_v16, %v8909_v36  ;;  %v3416_v2 = vsub.f32 %v10168_v31, %v13535_v22  ;;  %v3147_v22 = vsub.f32 %v10160_v9, %v13537_v20  ;;  %v13540_v20 = vand.u32 4294901760, %v10205_v42  ;;  %v13645_v16 = vld [vmem:[#allocation32_spill] sm:$0xff] }
 0x1c1   : > { %v3135_v43 = vsub.f32 %v10108_v33, %v13528_v3  ;;  %3113 = vmatpush.msrb.mxu1 %v3112_v45  ;;  %3199 = vmatpush.msrb.mxu2 %v10087_v30  ;;  %v13531_v45 = vand.u32 4294901760, %v10130_v23  ;;  %v13532_v3 = vand.u32 4294901760, %v10112_v44  ;;  %v5884_v58 = vsel %vm571_vm4, 1.0, %v13245_v62 }
 0x1c2   : > { %6204 = vmatpush.msk.msrb.mxu0 %vm12996_vm10, %v13173_v47  ;;  %6220 = vmatpush.msk.msrb.mxu3 %vm12996_vm10, %v13173_v47  ;;  %vm568_vm10 = vcmp.eq.s32.totalorder %v13534_v26, %v8909_v36  ;;  %v10286_v37 = vsub.f32 %v5884_v58, %v5884_v58  ;;  %v13541_v58 = vld [vmem:[#allocation92_spill] sm:$0xff]  ;;  %v3417_v8 = vand.u32 4294901760, %v3416_v2  ;;  %v3148_v55 = vand.u32 4294901760, %v3147_v22  ;;  %v13546_v2 = vld [vmem:[#allocation93_spill] sm:$0xff] }
 0x1c3   : > { %v3410_v13 = vsub.f32 %v10130_v23, %v13531_v45  ;;  %v3141_v49 = vsub.f32 %v10112_v44, %v13532_v3  ;;  %3119 = vmatpush.msrb.mxu1 %v3118_v53  ;;  %3202 = vmatpush.msrb.mxu2 %v10108_v33  ;;  %v10253_v53 = vsub.f32 %v5890_v54, %v5890_v54  ;;  %v3136_v3 = vand.u32 4294901760, %v3135_v43  ;;  %v13538_v45 = vld [vmem:[#allocation91_spill] sm:$0xff] }
 0x1c4   : > { %6205 = vmatpush.msk.msrb.mxu0 %vm12998_vm15, %v13173_v47  ;;  %6221 = vmatpush.msk.msrb.mxu3 %vm12998_vm15, %v13173_v47  ;;  %v10266_v54 = vsub.f32 %v5887_v15, %v5887_v15  ;;  %vm13011_vm15 = vcmp.eq.s32.totalorder %v13538_v45, %v8909_v36  ;;  %v13539_v15 = vand.u32 4294901760, %v10190_v48  ;;  %v13548_v22 = vand.u32 4294901760, %v9874_v51 }
 0x1c5   : > { %13533 = vst [vmem:[#allocation86_spill] sm:$0xff] %v10253_v53  ;;  %3125 = vmatpush.msrb.mxu1 %v3124_v18  ;;  %3205 = vmatpush.msrb.mxu2 %v10112_v44  ;;  %v3411_v18 = vand.u32 4294901760, %v3410_v13  ;;  %v3142_v43 = vand.u32 4294901760, %v3141_v49  ;;  %v5881_v49 = vsel %vm568_vm10, 1.0, %v13245_v62  ;;  %v13544_v13 = vand.u32 4294901760, %v9865_v10 }
 0x1c6   : > { %13536 = vst [vmem:[#allocation90_spill] sm:$0xff] %v10266_v54  ;;  %6206 = vmatpush.msk.msrb.mxu0 %vm13002_vm13, %v13173_v47  ;;  %6222 = vmatpush.msk.msrb.mxu3 %vm13002_vm13, %v13173_v47  ;;  %v3422_v32 = vsub.f32 %v10190_v48, %v13539_v15  ;;  %vm562_vm13 = vcmp.eq.s32.totalorder %v13541_v58, %v8909_v36  ;;  %v13542_v15 = vld [vmem:[#allocation87_spill] sm:$0xff]  ;;  %v13551_v51 = vand.u32 4294901760, %v10266_v54 }
 0x1c7   : > { %3131 = vmatpush.msrb.mxu1 %v3130_v46  ;;  %3208 = vmatpush.msrb.mxu2 %v10160_v9  ;;  %v3153_v46 = vsub.f32 %v10205_v42, %v13540_v20  ;;  %v3428_v48 = vsub.f32 %v10213_v11, %v13543_v39  ;;  %v5878_v20 = vsel %vm13011_vm15, 1.0, %v13245_v62  ;;  %v5875_v10 = vsel %vm562_vm13, 1.0, %v13245_v62  ;;  %v13553_v11 = vld [vmem:[#allocation95_spill] sm:$0xff] }
 0x1c8   : > { %6207 = vmatpush.msk.msrb.mxu0 %vm13008_vm3, %v13173_v47  ;;  %6223 = vmatpush.msk.msrb.mxu3 %vm13008_vm3, %v13173_v47  ;;  %vm13017_vm3 = vcmp.eq.s32.totalorder %v13546_v2, %v8909_v36  ;;  %v3423_v39 = vand.u32 4294901760, %v3422_v32 }
 0x1c9   : > { %3062 = vmatmul.f32.vlgmr.msrb.gmra.mxu0 %v13542_v15  ;;  %3137 = vmatpush.msrb.mxu1 %v3136_v3  ;;  %v10318_v15 = vsub.f32 %v5881_v49, %v5881_v49  ;;  %v13547_v3 = vand.u32 4294901760, %v10241_v25  ;;  %v3154_v49 = vand.u32 4294901760, %v3153_v46  ;;  %v3440_v46 = vsub.f32 %v10266_v54, %v13551_v51 }
 0x1ca   : > { %3211 = vmatpush.msrb.mxu2 %v10205_v42  ;;  %3263 = vmatpush.msra.mxu0 %v13544_v13  ;;  %v13550_v13 = vld [vmem:[#allocation94_spill] sm:$0xff]  ;;  %v13555_v54 = vand.u32 4294901760, %v10286_v37 }
 0x1cb   : > { %13545 = vst [vmem:[#allocation102_spill] sm:$0xff] %v10318_v15  ;;  %3412 = vmatpush.msra.mxu3 %v3411_v18  ;;  %3143 = vmatpush.msrb.mxu1 %v3142_v43  ;;  %v3159_v28 = vsub.f32 %v10241_v25, %v13547_v3  ;;  %v13549_v18 = vand.u32 4294901760, %v10253_v53  ;;  %v10336_v43 = vsub.f32 %v5878_v20, %v5878_v20  ;;  %v3429_v3 = vand.u32 4294901760, %v3428_v48  ;;  %v13554_v48 = vld [vmem:[#allocation75_spill] sm:$0xff] }
 0x1cc   : > { %3214 = vmatpush.msrb.mxu2 %v10241_v25  ;;  %3267 = vmatpush.msra.mxu0 %v13548_v22  ;;  %vm556_vm15 = vcmp.eq.s32.totalorder %v13550_v13, %v8909_v36  ;;  %v5872_v20 = vsel %vm13017_vm3, 1.0, %v13245_v62  ;;  %v13552_v22 = vand.u32 4294901760, %v9902_v52 }
 0x1cd   : > { %v3434_v32 = vsub.f32 %v10253_v53, %v13549_v18  ;;  %3418 = vmatpush.msra.mxu3 %v3417_v8  ;;  %3149 = vmatpush.msrb.mxu1 %v3148_v55  ;;  %v10354_v18 = vsub.f32 %v5875_v10, %v5875_v10  ;;  %v3160_v51 = vand.u32 4294901760, %v3159_v28  ;;  %v3446_v53 = vsub.f32 %v10286_v37, %v13555_v54  ;;  %v13556_v28 = vld [vmem:[#allocation96_spill] sm:$0xff] }
 0x1ce   : > { %6240 = vmatpush.msk.msra.mxu2 %vm13012_vm0, %v13173_v47  ;;  %3271 = vmatpush.msra.mxu0 %v13552_v22  ;;  %vm553_vm0 = vcmp.eq.s32.totalorder %v13553_v11, %v8909_v36  ;;  %v5869_v55 = vsel %vm556_vm15, 1.0, %v13245_v62  ;;  %v10371_v10 = vsub.f32 %v5872_v20, %v5872_v20  ;;  %vm550_vm3 = vcmp.eq.s32.totalorder %v13556_v28, %v8909_v36 }
 0x1cf   : > { %3424 = vmatpush.msra.mxu3 %v3423_v39  ;;  %3217 = vmatmul.f32.vlgmr.msrb.gmra.mxu2 %v13554_v48  ;;  %v3435_v52 = vand.u32 4294901760, %v3434_v32  ;;  %v13557_v54 = vand.u32 4294901760, %v9928_v14  ;;  %v3441_v22 = vand.u32 4294901760, %v3440_v46  ;;  %v5866_v8 = vsel %vm553_vm0, 1.0, %v13245_v62  ;;  %v13558_v48 = vld [vmem:[#allocation80_spill] sm:$0xff]  ;;  %v13560_v46 = vld [vmem:[#allocation97_spill] sm:$0xff] }
 0x1d0   : > { %6241 = vmatpush.msk.msra.mxu2 %vm13018_vm7, %v13173_v47  ;;  %3155 = vmatpush.msrb.mxu1 %v3154_v49  ;;  %v13559_v49 = vand.u32 4294901760, %v10318_v15  ;;  %vm547_vm7 = vcmp.eq.s32.totalorder %v13560_v46, %v8909_v36  ;;  %v13561_v20 = vand.u32 4294901760, %v9936_v5  ;;  %v5863_v39 = vsel %vm550_vm3, 1.0, %v13245_v62  ;;  %v13564_v5 = vld [vmem:[#allocation98_spill] sm:$0xff]  ;;  %v13636_v46 = vld [vmem:[#allocation101_spill] sm:$0xff] }
 0x1d1   : > { %3275 = vmatpush.msra.mxu0 %v13557_v54  ;;  %3430 = vmatpush.msra.mxu3 %v3429_v3  ;;  %v10390_v3 = vsub.f32 %v5869_v55, %v5869_v55  ;;  %v3447_v54 = vand.u32 4294901760, %v3446_v53  ;;  %v5860_v53 = vsel %vm547_vm7, 1.0, %v13245_v62  ;;  %v10427_v14 = vsub.f32 %v5863_v39, %v5863_v39 }
 0x1d2   : > { %3256 = vmatmul.f32.vlgmr.msrb.gmra.mxu3 %v13558_v48  ;;  %6242 = vmatpush.msk.msra.mxu2 %vm13021_vm1, %v13173_v47  ;;  %v3452_v32 = vsub.f32 %v10318_v15, %v13559_v49  ;;  %v13562_v48 = vld [vmem:[#allocation71_spill] sm:$0xff]  ;;  %v13563_v49 = vand.u32 4294901760, %v10336_v43  ;;  %v10405_v15 = vsub.f32 %v5866_v8, %v5866_v8  ;;  %vm544_vm1 = vcmp.eq.s32.totalorder %v13564_v5, %v8909_v36 }
 0x1d3   : > { %3161 = vmatpush.msrb.mxu1 %v3160_v51  ;;  %3279 = vmatpush.msra.mxu0 %v13561_v20  ;;  %v13565_v8 = vand.u32 4294901760, %v9975_v7  ;;  %v5857_v7 = vsel %vm544_vm1, 1.0, %v13245_v62 }
 0x1d4   : > { %3436 = vmatpush.msra.mxu3 %v3435_v52  ;;  %3163 = vmatmul.f32.vlgmr.msrb.gmra.mxu1 %v13562_v48  ;;  %v3458_v55 = vsub.f32 %v10336_v43, %v13563_v49  ;;  %v3453_v51 = vand.u32 4294901760, %v3452_v32  ;;  %v13566_v52 = vand.u32 4294901760, %v10354_v18  ;;  %v13568_v32 = vand.u32 4294901760, %v10371_v10 }
 0x1d5   : > { %6224 = vmatpush.msk.msra.mxu1 %vm541_vm6, %v13173_v47  ;;  %6243 = vmatpush.msk.msra.mxu2 %vm580_vm9, %v13173_v47  ;;  %v10447_v49 = vsub.f32 %v5860_v53, %v5860_v53  ;;  %vm13573_vm6 = vcmp.eq.s32.totalorder %v13500_v4, %v8909_v36 }
 0x1d6   : > { %3283 = vmatpush.msra.mxu0 %v13565_v8  ;;  %3442 = vmatpush.msra.mxu3 %v3441_v22  ;;  %v3464_v20 = vsub.f32 %v10354_v18, %v13566_v52  ;;  %v13567_v22 = vand.u32 4294901760, %v9987_v41  ;;  %v3459_v39 = vand.u32 4294901760, %v3458_v55  ;;  %v3470_v8 = vsub.f32 %v10371_v10, %v13568_v32 }
 0x1d7   : > { %6225 = vmatpush.msk.msra.mxu1 %vm538_vm5, %v13173_v47  ;;  %6244 = vmatpush.msk.msra.mxu2 %vm577_vm14, %v13173_v47  ;;  %v3481_v52 = vand.u32 4294901760, %v10405_v15  ;;  %v13569_v41 = vand.u32 4294901760, %v10009_v19  ;;  %v13570_v55 = vand.u32 4294901760, %v10390_v3  ;;  %v10463_v32 = vsub.f32 %v5857_v7, %v5857_v7 }
 0x1d8   : > { %3287 = vmatpush.msra.mxu0 %v13567_v22  ;;  %3448 = vmatpush.msra.mxu3 %v3447_v54  ;;  %v3465_v54 = vand.u32 4294901760, %v3464_v20  ;;  %v3487_v22 = vand.u32 4294901760, %v10427_v14  ;;  %v13571_v19 = vand.u32 4294901760, %v10037_v38  ;;  %v3493_v7 = vand.u32 4294901760, %v10447_v49 }
 0x1d9   : > { %6226 = vmatpush.msk.msra.mxu1 %vm535_vm2, %v13173_v47  ;;  %6245 = vmatpush.msk.msra.mxu2 %vm574_vm12, %v13173_v47  ;;  %v3476_v53 = vsub.f32 %v10390_v3, %v13570_v55  ;;  %v3482_v20 = vsub.f32 %v10405_v15, %v3481_v52  ;;  %v13572_v38 = vand.u32 4294901760, %v10053_v6  ;;  %vm13574_vm5 = vcmp.eq.s32.totalorder %v13538_v45, %v8909_v36 }
 0x1da   : > { %3291 = vmatpush.msra.mxu0 %v13569_v41  ;;  %3454 = vmatpush.msra.mxu3 %v3453_v51  ;;  %v3471_v51 = vand.u32 4294901760, %v3470_v8  ;;  %v3488_v8 = vsub.f32 %v10427_v14, %v3487_v22  ;;  %v3499_v41 = vand.u32 4294901760, %v10463_v32  ;;  %v13575_v6 = vand.u32 4294901760, %v10087_v30 }
 0x1db   : > { %6227 = vmatpush.msk.msra.mxu1 %vm532_vm8, %v13173_v47  ;;  %6246 = vmatpush.msk.msra.mxu2 %vm571_vm4, %v13173_v47  ;;  %v3494_v55 = vsub.f32 %v10447_v49, %v3493_v7  ;;  %vm13576_vm2 = vcmp.eq.s32.totalorder %v13501_v29, %v8909_v36  ;;  %vm13578_vm8 = vcmp.eq.s32.totalorder %v13502_v17, %v8909_v36 }
 0x1dc   : > { %3295 = vmatpush.msra.mxu0 %v13571_v19  ;;  %3460 = vmatpush.msra.mxu3 %v3459_v39  ;;  %v3477_v39 = vand.u32 4294901760, %v3476_v53  ;;  %v13577_v53 = vand.u32 4294901760, %v10108_v33  ;;  %v3489_v30 = vand.u32 4294901760, %v3488_v8  ;;  %v3500_v19 = vsub.f32 %v10463_v32, %v3499_v41  ;;  %v13596_v8 = vld [vmem:[#allocation88_spill] sm:$0xff] }
 0x1dd   : > { %6228 = vmatpush.msk.msra.mxu1 %vm529_vm11, %v13173_v47  ;;  %6247 = vmatpush.msk.msra.mxu2 %vm568_vm10, %v13173_v47  ;;  %vm13579_vm11 = vcmp.eq.s32.totalorder %v13546_v2, %v8909_v36  ;;  %v3495_v33 = vand.u32 4294901760, %v3494_v55  ;;  %v13601_v55 = vld [vmem:[#allocation99_spill] sm:$0xff] }
 0x1de   : > { %3299 = vmatpush.msra.mxu0 %v13572_v38  ;;  %3466 = vmatpush.msra.mxu3 %v3465_v54  ;;  %v3483_v54 = vand.u32 4294901760, %v3482_v20  ;;  %v13582_v20 = vand.u32 4294901760, %v10160_v9  ;;  %v3501_v38 = vand.u32 4294901760, %v3500_v19  ;;  %v13586_v9 = vand.u32 4294901760, %v10241_v25 }
 0x1df   : > { %6229 = vmatpush.msk.msra.mxu1 %vm13573_vm6, %v13173_v47  ;;  %6248 = vmatpush.msk.msra.mxu2 %vm13574_vm5, %v13173_v47  ;;  %vm13581_vm6 = vcmp.eq.s32.totalorder %v13503_v27, %v8909_v36  ;;  %vm13583_vm5 = vcmp.eq.s32.totalorder %v13504_v0, %v8909_v36  ;;  %v13591_v25 = vand.u32 4294901760, %v10130_v23 }
 0x1e0   : > { %3303 = vmatpush.msra.mxu0 %v13575_v6  ;;  %3472 = vmatpush.msra.mxu3 %v3471_v51  ;;  %v13580_v51 = vand.u32 4294901760, %v10112_v44  ;;  %v13584_v44 = vand.u32 4294901760, %v10205_v42  ;;  %v13592_v42 = vld [vmem:[#allocation73_spill] sm:$0xff]  ;;  %v13597_v6 = vand.u32 4294901760, %v10168_v31 }
 0x1e1   : > { %6230 = vmatpush.msk.msra.mxu1 %vm13576_vm2, %v13173_v47  ;;  %6249 = vmatpush.msk.msra.mxu2 %vm562_vm13, %v13173_v47  ;;  %vm13585_vm2 = vcmp.eq.s32.totalorder %v13507_v34, %v8909_v36 }
 0x1e2   : > { %3307 = vmatpush.msra.mxu0 %v13577_v53  ;;  %3478 = vmatpush.msra.mxu3 %v3477_v39  ;;  %v13594_v39 = vld [vmem:[#allocation82_spill] sm:$0xff] }
 0x1e3   : > { %6231 = vmatpush.msk.msra.mxu1 %vm13578_vm8, %v13173_v47  ;;  %6250 = vmatpush.msk.msra.mxu2 %vm13579_vm11, %v13173_v47  ;;  %vm13587_vm8 = vcmp.eq.s32.totalorder %v13510_v1, %v8909_v36  ;;  %vm13588_vm11 = vcmp.eq.s32.totalorder %v13512_v60, %v8909_v36  ;;  %v13602_v53 = vand.u32 4294901760, %v13594_v39 }
 0x1e4   : > { %3311 = vmatpush.msra.mxu0 %v13580_v51  ;;  %3484 = vmatpush.msra.mxu3 %v3483_v54  ;;  %v13600_v54 = vld [vmem:[#allocation84_spill] sm:$0xff]  ;;  %v13608_v51 = vld [vmem:[#allocation90_spill] sm:$0xff] }
 0x1e5   : > { %6232 = vmatpush.msk.msra.mxu1 %vm13581_vm6, %v13173_v47  ;;  %6251 = vmatpush.msk.msra.mxu2 %vm556_vm15, %v13173_v47  ;;  %vm13589_vm6 = vcmp.eq.s32.totalorder %v13511_v63, %v8909_v36  ;;  %v13607_v19 = vand.u32 4294901760, %v13600_v54  ;;  %v13655_v63 = vld [vmem:[#allocation39_spill] sm:$0xff] }
 0x1e6   : > { %3315 = vmatpush.msra.mxu0 %v13582_v20  ;;  %3490 = vmatpush.msra.mxu3 %v3489_v30  ;;  %v13605_v30 = vld [vmem:[#allocation86_spill] sm:$0xff]  ;;  %v13611_v20 = vand.u32 4294901760, %v13608_v51 }
 0x1e7   : > { %6233 = vmatpush.msk.msra.mxu1 %vm13583_vm5, %v13173_v47  ;;  %6252 = vmatpush.msk.msra.mxu2 %vm553_vm0, %v13173_v47  ;;  %vm13590_vm5 = vcmp.eq.s32.totalorder %v13516_v56, %v8909_v36 }
 0x1e8   : > { %3319 = vmatpush.msra.mxu0 %v13584_v44  ;;  %3496 = vmatpush.msra.mxu3 %v3495_v33  ;;  %v13610_v33 = vand.u32 4294901760, %v13605_v30  ;;  %v13613_v44 = vand.u32 4294901760, %v10286_v37 }
 0x1e9   : > { %6234 = vmatpush.msk.msra.mxu1 %vm13585_vm2, %v13173_v47  ;;  %6253 = vmatpush.msk.msra.mxu2 %vm550_vm3, %v13173_v47  ;;  %vm13593_vm2 = vcmp.eq.s32.totalorder %v13592_v42, %v8909_v36 }
 0x1ea   : > { %3323 = vmatpush.msra.mxu0 %v13586_v9  ;;  %3502 = vmatpush.msra.mxu3 %v3501_v38  ;;  %v13612_v38 = vld [vmem:[#allocation102_spill] sm:$0xff]  ;;  %v6559_v9 = vld [vmem:[%s6941_s11] sm:$0x7] }
 0x1eb   : > { %3325 = vmatmul.f32.vlgmr.msra.gmra.mxu0 %v13562_v48  ;;  %6235 = vmatpush.msk.msra.mxu1 %vm13587_vm8, %v13173_v47  ;;  %vm13595_vm8 = vcmp.eq.s32.totalorder %v13518_v12, %v8909_v36 }
 0x1ec   : > { %6254 = vmatpush.msk.msra.mxu2 %vm547_vm7, %v13173_v47  ;;  %3510 = vmatpush.msrb.mxu0 %v10130_v23  ;;  %v13598_v23 = vld [vmem:[#allocation76_spill] sm:$0xff] }
 0x1ed   : > { %6272 = vmatpush.msk.msrb.mxu3 %vm13588_vm11, %v13173_v47  ;;  %6236 = vmatpush.msk.msra.mxu1 %vm13589_vm6, %v13173_v47  ;;  %vm13599_vm11 = vcmp.eq.s32.totalorder %v13598_v23, %v8909_v36 }
 0x1ee   : > { %6255 = vmatpush.msk.msra.mxu2 %vm544_vm1, %v13173_v47  ;;  %3513 = vmatpush.msrb.mxu0 %v10168_v31  ;;  %v13603_v31 = vld [vmem:[#allocation79_spill] sm:$0xff] }
 0x1ef   : > { %6273 = vmatpush.msk.msrb.mxu3 %vm13590_vm5, %v13173_v47  ;;  %6237 = vmatpush.msk.msra.mxu1 %vm13593_vm2, %v13173_v47  ;;  %vm13604_vm6 = vcmp.eq.s32.totalorder %v13603_v31, %v8909_v36  ;;  %vm13606_vm5 = vcmp.eq.s32.totalorder %v13512_v60, %v8909_v36  ;;  %vm13609_vm2 = vcmp.eq.s32.totalorder %v13516_v56, %v8909_v36  ;;  %v13650_v31 = vld [vmem:[#allocation37_spill] sm:$0xff]  ;;  %v13654_v56 = vld [vmem:[#allocation38_spill] sm:$0xff] }
 0x1f0   : > { %3604 = vmatpush.msrb.mxu2 %v13591_v25  ;;  %3516 = vmatpush.msrb.mxu0 %v13594_v39  ;;  %v10667_v25 = vperm.slane %v6559_v9, 2  ;;  %v13615_v39 = vand.u32 4294901760, %v13612_v38 }
 0x1f1   : > { %6274 = vmatpush.msk.msrb.mxu3 %vm13595_vm8, %v13173_v47  ;;  %3403 = vmatmul.f32.vlgmr.msra.gmra.mxu2 %v13596_v8 }
 0x1f2   : > { %3608 = vmatpush.msrb.mxu2 %v13597_v6  ;;  %6238 = vmatpush.msk.msra.mxu1 %vm13599_vm11, %v13173_v47  ;;  %vm13614_vm11 = vcmp.eq.s32.totalorder %v13538_v45, %v8909_v36  ;;  %v13618_v6 = vand.u32 4294901760, %v10354_v18 }
 0x1f3   : > { %3519 = vmatpush.msrb.mxu0 %v13600_v54  ;;  %6275 = vmatpush.msk.msrb.mxu3 %vm580_vm9, %v13173_v47  ;;  %v13619_v54 = vld [vmem:[#allocation19_spill] sm:$0xff] }
 0x1f4   : > { %3504 = vmatmul.f32.vlgmr.msra.gmra.mxu3 %v13601_v55  ;;  %3612 = vmatpush.msrb.mxu2 %v13602_v53 }
 0x1f5   : > { %6239 = vmatpush.msk.msra.mxu1 %vm13604_vm6, %v13173_v47  ;;  %3522 = vmatpush.msrb.mxu0 %v13605_v30  ;;  %v13622_v30 = vld [vmem:[#allocation21_spill] sm:$0xff] }
 0x1f6   : > { %6276 = vmatpush.msk.msrb.mxu3 %vm577_vm14, %v13173_v47  ;;  %3362 = vmatmul.f32.vlgmr.msra.gmra.mxu1 %v13562_v48 }
 0x1f7   : > { %6256 = vmatpush.msk.msrb.mxu1 %vm13606_vm5, %v13173_v47  ;;  %3616 = vmatpush.msrb.mxu2 %v13607_v19 }
 0x1f8   : > { %3525 = vmatpush.msrb.mxu0 %v13608_v51  ;;  %6277 = vmatpush.msk.msrb.mxu3 %vm574_vm12, %v13173_v47  ;;  %v13625_v51 = vld [vmem:[#allocation22_spill] sm:$0xff] }
 0x1f9   : > { %6257 = vmatpush.msk.msrb.mxu1 %vm13609_vm2, %v13173_v47  ;;  %3620 = vmatpush.msrb.mxu2 %v13610_v33  ;;  %vm437_vm6 = vcmp.eq.s32.totalorder %v13625_v51, %v10667_v25 }
 0x1fa   : > { %3528 = vmatpush.msrb.mxu0 %v10286_v37  ;;  %6278 = vmatpush.msk.msrb.mxu3 %vm571_vm4, %v13173_v47  ;;  %v13616_v37 = vand.u32 4294901760, %v10336_v43 }
 0x1fb   : > { %6258 = vmatpush.msk.msrb.mxu1 %vm13595_vm8, %v13173_v47  ;;  %3624 = vmatpush.msrb.mxu2 %v13611_v20  ;;  %v13628_v20 = vld [vmem:[#allocation24_spill] sm:$0xff] }
 0x1fc   : > { %3531 = vmatpush.msrb.mxu0 %v13612_v38  ;;  %6279 = vmatpush.msk.msrb.mxu3 %vm568_vm10, %v13173_v47  ;;  %vm13039_vm2 = vcmp.eq.s32.totalorder %v13628_v20, %v10667_v25 }
 0x1fd   : > { %6259 = vmatpush.msk.msrb.mxu1 %vm580_vm9, %v13173_v47  ;;  %3628 = vmatpush.msrb.mxu2 %v13613_v44  ;;  %vm446_vm9 = vcmp.eq.s32.totalorder %v13619_v54, %v10667_v25  ;;  %v13630_v44 = vld [vmem:[#allocation100_spill] sm:$0xff] }
 0x1fe   : > { %3534 = vmatpush.msrb.mxu0 %v10336_v43  ;;  %6280 = vmatpush.msk.msrb.mxu3 %vm13614_vm11, %v13173_v47  ;;  %v13620_v43 = vand.u32 4294901760, %v10371_v10  ;;  %v5759_v53 = vsel %vm446_vm9, 1.0, %v13245_v62 }
 0x1ff   : > { %6260 = vmatpush.msk.msrb.mxu1 %vm577_vm14, %v13173_v47  ;;  %3632 = vmatpush.msrb.mxu2 %v13615_v39  ;;  %vm13617_vm14 = vcmp.eq.s32.totalorder %v13546_v2, %v8909_v36  ;;  %v13643_v2 = vld [vmem:[#allocation31_spill] sm:$0xff] }
 0x200   : > { %3537 = vmatpush.msrb.mxu0 %v10354_v18  ;;  %6281 = vmatpush.msk.msrb.mxu3 %vm562_vm13, %v13173_v47  ;;  %v13621_v18 = vld [vmem:[#allocation20_spill] sm:$0xff]  ;;  %vm13627_vm5 = vmmov %vm13617_vm14 }
 0x201   : > { %6261 = vmatpush.msk.msrb.mxu1 %vm574_vm12, %v13173_v47  ;;  %3636 = vmatpush.msrb.mxu2 %v13616_v37  ;;  %vm443_vm12 = vcmp.eq.s32.totalorder %v13621_v18, %v10667_v25  ;;  %v13631_v37 = vld [vmem:[#allocation26_spill] sm:$0xff] }
 0x202   : > { %3540 = vmatpush.msrb.mxu0 %v10371_v10  ;;  %6282 = vmatpush.msk.msrb.mxu3 %vm13617_vm14, %v13173_v47  ;;  %v13624_v10 = vand.u32 4294901760, %v10390_v3  ;;  %v5756_v19 = vsel %vm443_vm12, 1.0, %v13245_v62  ;;  %vm13061_vm14 = vcmp.eq.s32.totalorder %v13643_v2, %v10667_v25 }
 0x203   : > { %6262 = vmatpush.msk.msrb.mxu1 %vm571_vm4, %v13173_v47  ;;  %3640 = vmatpush.msrb.mxu2 %v13618_v6  ;;  %vm440_vm4 = vcmp.eq.s32.totalorder %v13622_v30, %v10667_v25  ;;  %v5744_v6 = vsel %vm13039_vm2, 1.0, %v13245_v62  ;;  %v11343_v30 = vpop.f32.mrf.mxu1 }
 0x204   : > { %3543 = vmatpush.msrb.mxu0 %v10390_v3  ;;  %6283 = vmatpush.msk.msrb.mxu3 %vm556_vm15, %v13173_v47  ;;  %v10744_v3 = vsub.f32 %v5759_v53, %v5759_v53  ;;  %v5753_v33 = vsel %vm440_vm4, 1.0, %v13245_v62 }
 0x205   : > { %6263 = vmatpush.msk.msrb.mxu1 %vm568_vm10, %v13173_v47  ;;  %3644 = vmatpush.msrb.mxu2 %v13620_v43  ;;  %vm13623_vm10 = vmmov %vm13614_vm11  ;;  %v10774_v38 = vsub.f32 %v5753_v33, %v5753_v33  ;;  %vm13041_vm11 = vcmp.eq.s32.totalorder %v13631_v37, %v10667_v25 }
 0x206   : > { %3546 = vmatpush.msrb.mxu0 %v10405_v15  ;;  %6284 = vmatpush.msk.msrb.mxu3 %vm553_vm0, %v13173_v47  ;;  %v13626_v15 = vld [vmem:[#allocation23_spill] sm:$0xff]  ;;  %v13022_v9 = vand.u32 4294901760, %v10744_v3 }
 0x207   : > { %6264 = vmatpush.msk.msrb.mxu1 %vm13623_vm10, %v13173_v47  ;;  %3648 = vmatpush.msrb.mxu2 %v13624_v10  ;;  %v13024_v10 = vand.u32 4294901760, %v10774_v38 }
 0x208   : > { %3549 = vmatpush.msrb.mxu0 %v10427_v14  ;;  %6285 = vmatpush.msk.msrb.mxu3 %vm550_vm3, %v13173_v47  ;;  %v5750_v14 = vsel %vm437_vm6, 1.0, %v13245_v62 }
 0x209   : > { %6265 = vmatpush.msk.msrb.mxu1 %vm562_vm13, %v13173_v47  ;;  %3652 = vmatpush.msrb.mxu2 %v3481_v52  ;;  %vm13046_vm13 = vcmp.eq.s32.totalorder %v13626_v15, %v10667_v25  ;;  %v10765_v52 = vsub.f32 %v5756_v19, %v5756_v19  ;;  %v5738_v19 = vsel %vm13041_vm11, 1.0, %v13245_v62 }
 0x20a   : > { %3552 = vmatpush.msrb.mxu0 %v10447_v49  ;;  %6286 = vmatpush.msk.msrb.mxu3 %vm547_vm7, %v13173_v47  ;;  %v5747_v39 = vsel %vm13046_vm13, 1.0, %v13245_v62  ;;  %v10812_v49 = vsub.f32 %v5750_v14, %v5750_v14  ;;  %v13632_v14 = vld [vmem:[#allocation27_spill] sm:$0xff] }
 0x20b   : > { %6266 = vmatpush.msk.msrb.mxu1 %vm13627_vm5, %v13173_v47  ;;  %3656 = vmatpush.msrb.mxu2 %v3487_v22  ;;  %v13629_v22 = vld [vmem:[#allocation25_spill] sm:$0xff]  ;;  %v10825_v53 = vsub.f32 %v5747_v39, %v5747_v39  ;;  %vm13065_vm5 = vcmp.eq.s32.totalorder %v13645_v16, %v10667_v25 }
 0x20c   : > { %3555 = vmatpush.msrb.mxu0 %v10463_v32  ;;  %6287 = vmatpush.msk.msrb.mxu3 %vm544_vm1, %v13173_v47  ;;  %vm13037_vm8 = vcmp.eq.s32.totalorder %v13629_v22, %v10667_v25  ;;  %v3751_v32 = vsub.f32 %v10744_v3, %v13022_v9  ;;  %v10863_v9 = vsub.f32 %v5738_v19, %v5738_v19 }
 0x20d   : > { %3558 = vmatmul.f32.vlgmr.msrb.gmra.mxu0 %v13630_v44  ;;  %6267 = vmatpush.msk.msrb.mxu1 %vm556_vm15, %v13173_v47  ;;  %v5741_v43 = vsel %vm13037_vm8, 1.0, %v13245_v62  ;;  %v3763_v44 = vsub.f32 %v10774_v38, %v13024_v10  ;;  %v13637_v5 = vand.u32 4294901760, %v10825_v53 }
 0x20e   : > { %3660 = vmatpush.msrb.mxu2 %v3493_v7  ;;  %6288 = vmatpush.msk.msra.mxu0 %vm446_vm9, %v13173_v47  ;;  %v13023_v7 = vand.u32 4294901760, %v10765_v52  ;;  %v10850_v33 = vsub.f32 %v5741_v43, %v5741_v43  ;;  %v13633_v43 = vld [vmem:[#allocation28_spill] sm:$0xff]  ;;  %v3752_v19 = vand.u32 4294901760, %v3751_v32 }
 0x20f   : > { %6304 = vmatpush.msk.msra.mxu3 %vm446_vm9, %v13173_v47  ;;  %6268 = vmatpush.msk.msrb.mxu1 %vm553_vm0, %v13173_v47  ;;  %vm13044_vm0 = vcmp.eq.s32.totalorder %v13632_v14, %v10667_v25  ;;  %v3764_v36 = vand.u32 4294901760, %v3763_v44  ;;  %v3775_v28 = vsub.f32 %v10825_v53, %v13637_v5  ;;  %v13640_v5 = vld [vmem:[#allocation34_spill] sm:$0xff] }
 0x210   : > { %3664 = vmatpush.msrb.mxu2 %v3499_v41  ;;  %6289 = vmatpush.msk.msra.mxu0 %vm443_vm12, %v13173_v47  ;;  %v10840_v41 = vsub.f32 %v5744_v6, %v5744_v6  ;;  %v3757_v39 = vsub.f32 %v10765_v52, %v13023_v7  ;;  %v5735_v10 = vsel %vm13044_vm0, 1.0, %v13245_v62  ;;  %v13634_v7 = vld [vmem:[#allocation29_spill] sm:$0xff] }
 0x211   : > { %6305 = vmatpush.msk.msra.mxu3 %vm443_vm12, %v13173_v47  ;;  %6269 = vmatpush.msk.msrb.mxu1 %vm550_vm3, %v13173_v47  ;;  %vm13049_vm3 = vcmp.eq.s32.totalorder %v13633_v43, %v10667_v25  ;;  %vm13053_vm15 = vcmp.eq.s32.totalorder %v13634_v7, %v10667_v25  ;;  %v10918_v11 = vsub.f32 %v5735_v10, %v5735_v10  ;;  %v13641_v10 = vand.u32 4294901760, %v10850_v33 }
 0x212   : > { %3851 = vmatpush.msra.mxu2 %v10744_v3  ;;  %6290 = vmatpush.msk.msra.mxu0 %vm440_vm4, %v13173_v47  ;;  %v5732_v32 = vsel %vm13049_vm3, 1.0, %v13245_v62  ;;  %v3758_v6 = vand.u32 4294901760, %v3757_v39  ;;  %v13638_v39 = vld [vmem:[#allocation30_spill] sm:$0xff]  ;;  %v5729_v44 = vsel %vm13053_vm15, 1.0, %v13245_v62  ;;  %v3776_v45 = vand.u32 4294901760, %v3775_v28  ;;  %v13646_v28 = vld [vmem:[#allocation36_spill] sm:$0xff] }
 0x213   : > { %6306 = vmatpush.msk.msra.mxu3 %vm440_vm4, %v13173_v47  ;;  %3666 = vmatmul.f32.vlgmr.msrb.gmra.mxu2 %v13601_v55  ;;  %v10926_v13 = vsub.f32 %v5732_v32, %v5732_v32 }
 0x214   : > { %3854 = vmatpush.msra.mxu2 %v10765_v52  ;;  %6270 = vmatpush.msk.msrb.mxu1 %vm547_vm7, %v13173_v47  ;;  %vm13081_vm7 = vcmp.eq.s32.totalorder %v13640_v5, %v10667_v25 }
 0x215   : > { %6291 = vmatpush.msk.msra.mxu0 %vm437_vm6, %v13173_v47  ;;  %6307 = vmatpush.msk.msra.mxu3 %vm437_vm6, %v13173_v47  ;;  %v13651_v59 = vand.u32 4294901760, %v10926_v13 }
 0x216   : > { %3703 = vmatmul.f32.vlgmr.msrb.gmra.mxu3 %v13601_v55  ;;  %3857 = vmatpush.msra.mxu2 %v10774_v38  ;;  %v13635_v55 = vand.u32 4294901760, %v10812_v49 }
 0x217   : > { %6271 = vmatpush.msk.msrb.mxu1 %vm544_vm1, %v13173_v47  ;;  %6292 = vmatpush.msk.msra.mxu0 %vm13046_vm13, %v13173_v47  ;;  %vm13059_vm1 = vcmp.eq.s32.totalorder %v13638_v39, %v10667_v25  ;;  %v3805_v23 = vsub.f32 %v10926_v13, %v13651_v59 }
 0x218   : > { %v3769_v8 = vsub.f32 %v10812_v49, %v13635_v55  ;;  %6308 = vmatpush.msk.msra.mxu3 %vm13046_vm13, %v13173_v47  ;;  %3597 = vmatmul.f32.vlgmr.msrb.gmra.mxu1 %v13636_v46  ;;  %v13639_v55 = vand.u32 4294901760, %v10840_v41  ;;  %v5726_v58 = vsel %vm13059_vm1, 1.0, %v13245_v62  ;;  %vm482_vm13 = vcmp.eq.s32.totalorder %v13654_v56, %v10667_v25 }
 0x219   : > { %3753 = vmatpush.msra.mxu1 %v3752_v19  ;;  %3860 = vmatpush.msra.mxu2 %v10812_v49  ;;  %v3787_v19 = vsub.f32 %v10850_v33, %v13641_v10  ;;  %v5807_v10 = vsel %vm13081_vm7, 1.0, %v13245_v62  ;;  %v3806_v17 = vand.u32 4294901760, %v3805_v23 }
 0x21a   : > { %v3781_v48 = vsub.f32 %v10840_v41, %v13639_v55  ;;  %6293 = vmatpush.msk.msra.mxu0 %vm13039_vm2, %v13173_v47  ;;  %6309 = vmatpush.msk.msra.mxu3 %vm13039_vm2, %v13173_v47  ;;  %v3770_v32 = vand.u32 4294901760, %v3769_v8  ;;  %v13642_v55 = vand.u32 4294901760, %v10863_v9  ;;  %v10965_v8 = vsub.f32 %v5729_v44, %v5729_v44 }
 0x21b   : > { %3759 = vmatpush.msra.mxu1 %v3758_v6  ;;  %3863 = vmatpush.msra.mxu2 %v10825_v53  ;;  %v10986_v6 = vsub.f32 %v5726_v58, %v5726_v58  ;;  %vm13070_vm2 = vcmp.eq.s32.totalorder %v13647_v24, %v10667_v25  ;;  %v10998_v50 = vsub.f32 %v5807_v10, %v5807_v10  ;;  %v5720_v10 = vsel %vm13065_vm5, 1.0, %v13245_v62  ;;  %v13671_v24 = vld [vmem:[#allocation47_spill] sm:$0xff] }
 0x21c   : > { %v10949_v46 = vsub.f32 %v10863_v9, %v13642_v55  ;;  %6294 = vmatpush.msk.msra.mxu0 %vm13037_vm8, %v13173_v47  ;;  %6310 = vmatpush.msk.msra.mxu3 %vm13037_vm8, %v13173_v47  ;;  %v13644_v55 = vld [vmem:[#allocation35_spill] sm:$0xff]  ;;  %v3782_v26 = vand.u32 4294901760, %v3781_v48  ;;  %v5723_v48 = vsel %vm13061_vm14, 1.0, %v13245_v62  ;;  %vm13083_vm8 = vcmp.eq.s32.totalorder %v13646_v28, %v10667_v25 }
 0x21d   : > { %vm13082_vm10 = vcmp.eq.s32.totalorder %v13644_v55, %v10667_v25  ;;  %3765 = vmatpush.msra.mxu1 %v3764_v36  ;;  %3866 = vmatpush.msra.mxu2 %v10840_v41  ;;  %v3788_v36 = vand.u32 4294901760, %v3787_v19  ;;  %13648 = vst [vmem:[#allocation82_spill] sm:$0xff] %v10998_v50  ;;  %v11026_v12 = vsub.f32 %v5723_v48, %v5723_v48  ;;  %v13661_v29 = vand.u32 4294901760, %v10998_v50 }
 0x21e   : > { %6295 = vmatpush.msk.msra.mxu0 %vm13041_vm11, %v13173_v47  ;;  %6311 = vmatpush.msk.msra.mxu3 %vm13041_vm11, %v13173_v47  ;;  %v3794_v44 = vand.u32 4294901760, %v10949_v46  ;;  %v5804_v58 = vsel %vm13082_vm10, 1.0, %v13245_v62  ;;  %v13649_v46 = vand.u32 4294901760, %v10918_v11  ;;  %vm485_vm11 = vcmp.eq.s32.totalorder %v13650_v31, %v10667_v25 }
 0x21f   : > { %3771 = vmatpush.msra.mxu1 %v3770_v32  ;;  %3869 = vmatpush.msra.mxu2 %v10850_v33  ;;  %v5801_v32 = vsel %vm13083_vm8, 1.0, %v13245_v62  ;;  %v11047_v48 = vsub.f32 %v5804_v58, %v5804_v58  ;;  %v11052_v42 = vsub.f32 %v5720_v10, %v5720_v10  ;;  %v5798_v59 = vsel %vm485_vm11, 1.0, %v13245_v62 }
 0x220   : > { %6296 = vmatpush.msk.msra.mxu0 %vm13044_vm0, %v13173_v47  ;;  %6312 = vmatpush.msk.msra.mxu3 %vm13044_vm0, %v13173_v47  ;;  %v3799_v19 = vsub.f32 %v10918_v11, %v13649_v46  ;;  %v13652_v46 = vld [vmem:[#allocation18_spill] sm:$0xff]  ;;  %v13656_v58 = vand.u32 4294901760, %v10965_v8  ;;  %v11076_v1 = vsub.f32 %v5801_v32, %v5801_v32  ;;  %v11100_v0 = vsub.f32 %v5798_v59, %v5798_v59 }
 0x221   : > { %3777 = vmatpush.msra.mxu1 %v3776_v45  ;;  %3872 = vmatpush.msra.mxu2 %v10863_v9  ;;  %vm13077_vm0 = vcmp.eq.s32.totalorder %v13652_v46, %v10667_v25  ;;  %v5717_v45 = vsel %vm13070_vm2, 1.0, %v13245_v62  ;;  %13653 = vst [vmem:[#allocation84_spill] sm:$0xff] %v11047_v48  ;;  %v4092_v4 = vsub.f32 %v10998_v50, %v13661_v29  ;;  %v13666_v23 = vand.u32 4294901760, %v11052_v42 }
 0x222   : > { %6297 = vmatpush.msk.msra.mxu0 %vm13049_vm3, %v13173_v47  ;;  %6313 = vmatpush.msk.msra.mxu3 %vm13049_vm3, %v13173_v47  ;;  %vm479_vm3 = vcmp.eq.s32.totalorder %v13655_v63, %v10667_v25  ;;  %v3811_v10 = vsub.f32 %v10965_v8, %v13656_v58  ;;  %v5714_v60 = vsel %vm13077_vm0, 1.0, %v13245_v62  ;;  %13657 = vst [vmem:[#allocation86_spill] sm:$0xff] %v11076_v1  ;;  %v13658_v58 = vld [vmem:[#allocation41_spill] sm:$0xff]  ;;  %v13747_v63 = vld [vmem:[#allocation40_spill] sm:$0xff] }
 0x223   : > { %3783 = vmatpush.msra.mxu1 %v3782_v26  ;;  %3875 = vmatpush.msra.mxu2 %v10918_v11  ;;  %v3800_v26 = vand.u32 4294901760, %v3799_v19  ;;  %v11079_v34 = vsub.f32 %v5717_v45, %v5717_v45  ;;  %v5795_v19 = vsel %vm482_vm13, 1.0, %v13245_v62  ;;  %13660 = vst [vmem:[#allocation90_spill] sm:$0xff] %v11100_v0  ;;  %v5792_v27 = vsel %vm479_vm3, 1.0, %v13245_v62 }
 0x224   : > { %6298 = vmatpush.msk.msra.mxu0 %vm13053_vm15, %v13173_v47  ;;  %6314 = vmatpush.msk.msra.mxu3 %vm13053_vm15, %v13173_v47  ;;  %vm476_vm15 = vcmp.eq.s32.totalorder %v13658_v58, %v10667_v25  ;;  %v11110_v57 = vsub.f32 %v5714_v60, %v5714_v60  ;;  %v13662_v60 = vld [vmem:[#allocation43_spill] sm:$0xff]  ;;  %v3812_v59 = vand.u32 4294901760, %v3811_v10  ;;  %v13664_v10 = vand.u32 4294901760, %v11047_v48 }
 0x225   : > { %3789 = vmatpush.msra.mxu1 %v3788_v36  ;;  %3878 = vmatpush.msra.mxu2 %v10926_v13  ;;  %v13659_v36 = vand.u32 4294901760, %v10986_v6  ;;  %v5789_v29 = vsel %vm476_vm15, 1.0, %v13245_v62  ;;  %v3829_v40 = vsub.f32 %v11052_v42, %v13666_v23  ;;  %v13667_v23 = vand.u32 4294901760, %v11076_v1 }
 0x226   : > { %6299 = vmatpush.msk.msra.mxu0 %vm13059_vm1, %v13173_v47  ;;  %6315 = vmatpush.msk.msra.mxu3 %vm13059_vm1, %v13173_v47  ;;  %vm473_vm1 = vcmp.eq.s32.totalorder %v13662_v60, %v10667_v25  ;;  %v4098_v35 = vsub.f32 %v11047_v48, %v13664_v10  ;;  %v11156_v21 = vsub.f32 %v5789_v29, %v5789_v29  ;;  %v13669_v16 = vand.u32 4294901760, %v11079_v34  ;;  %v13751_v60 = vld [vmem:[#allocation46_spill] sm:$0xff] }
 0x227   : > { %v3817_v32 = vsub.f32 %v10986_v6, %v13659_v36  ;;  %3795 = vmatpush.msra.mxu1 %v3794_v44  ;;  %3881 = vmatpush.msra.mxu2 %v10965_v8  ;;  %v11122_v44 = vsub.f32 %v5795_v19, %v5795_v19  ;;  %v13663_v36 = vand.u32 4294901760, %v11026_v12  ;;  %v11135_v19 = vsub.f32 %v5792_v27, %v5792_v27  ;;  %v13665_v27 = vld [vmem:[#allocation44_spill] sm:$0xff] }
 0x228   : > { %6300 = vmatpush.msk.msra.mxu0 %vm13061_vm14, %v13173_v47  ;;  %6316 = vmatpush.msk.msra.mxu3 %vm13061_vm14, %v13173_v47  ;;  %vm470_vm14 = vcmp.eq.s32.totalorder %v13665_v27, %v10667_v25  ;;  %v4104_v29 = vsub.f32 %v11076_v1, %v13667_v23  ;;  %v3835_v48 = vsub.f32 %v11079_v34, %v13669_v16  ;;  %v13670_v16 = vand.u32 4294901760, %v11100_v0 }
 0x229   : > { %3801 = vmatpush.msra.mxu1 %v3800_v26  ;;  %3884 = vmatpush.msra.mxu2 %v10986_v6  ;;  %v3823_v45 = vsub.f32 %v11026_v12, %v13663_v36  ;;  %v3818_v26 = vand.u32 4294901760, %v3817_v32  ;;  %v5786_v32 = vsel %vm473_vm1, 1.0, %v13245_v62  ;;  %v3830_v10 = vand.u32 4294901760, %v3829_v40 }
 0x22a   : > { %6301 = vmatpush.msk.msra.mxu0 %vm13065_vm5, %v13173_v47  ;;  %6317 = vmatpush.msk.msra.mxu3 %vm13065_vm5, %v13173_v47  ;;  %vm13080_vm5 = vcmp.eq.s32.totalorder %v13668_v61, %v10667_v25  ;;  %v11196_v23 = vsub.f32 %v5786_v32, %v5786_v32  ;;  %v13672_v1 = vand.u32 4294901760, %v11110_v57  ;;  %v13673_v32 = vand.u32 4294901760, %v10744_v3 }
 0x22b   : > { %3807 = vmatpush.msra.mxu1 %v3806_v17  ;;  %3887 = vmatpush.msra.mxu2 %v11026_v12  ;;  %v4093_v17 = vand.u32 4294901760, %v4092_v4  ;;  %v3824_v36 = vand.u32 4294901760, %v3823_v45  ;;  %v5783_v4 = vsel %vm470_vm14, 1.0, %v13245_v62  ;;  %v4099_v45 = vand.u32 4294901760, %v4098_v35 }
 0x22c   : > { %6302 = vmatpush.msk.msra.mxu0 %vm13070_vm2, %v13173_v47  ;;  %6318 = vmatpush.msk.msra.mxu3 %vm13070_vm2, %v13173_v47  ;;  %vm464_vm2 = vcmp.eq.s32.totalorder %v13671_v24, %v10667_v25  ;;  %v3841_v2 = vsub.f32 %v11110_v57, %v13672_v1  ;;  %v5780_v35 = vsel %vm13080_vm5, 1.0, %v13245_v62  ;;  %v13675_v1 = vld [vmem:[#allocation48_spill] sm:$0xff]  ;;  %v3836_v46 = vand.u32 4294901760, %v3835_v48  ;;  %v13678_v48 = vld [vmem:[#allocation49_spill] sm:$0xff]  ;;  %v13756_v24 = vld [vmem:[#allocation59_spill] sm:$0xff] }
 0x22d   : > { %3813 = vmatpush.msra.mxu1 %v3812_v59  ;;  %3890 = vmatpush.msra.mxu2 %v11052_v42  ;;  %v4110_v59 = vsub.f32 %v11100_v0, %v13670_v16  ;;  %v4105_v16 = vand.u32 4294901760, %v4104_v29  ;;  %v11214_v0 = vsub.f32 %v5783_v4, %v5783_v4  ;;  %v13676_v50 = vand.u32 4294901760, %v11135_v19 }
 0x22e   : > { %6303 = vmatpush.msk.msra.mxu0 %vm13077_vm0, %v13173_v47  ;;  %6319 = vmatpush.msk.msra.mxu3 %vm13077_vm0, %v13173_v47  ;;  %vm461_vm0 = vcmp.eq.s32.totalorder %v13675_v1, %v10667_v25  ;;  %v13677_v29 = vand.u32 4294901760, %v10765_v52  ;;  %vm458_vm5 = vcmp.eq.s32.totalorder %v13678_v48, %v10667_v25  ;;  %v13743_v31 = vand.u32 4294901760, %v11196_v23  ;;  %v13759_v48 = vld [vmem:[#allocation65_spill] sm:$0xff] }
 0x22f   : > { %3819 = vmatpush.msra.mxu1 %v3818_v26  ;;  %3893 = vmatpush.msra.mxu2 %v11079_v34  ;;  %v13674_v26 = vand.u32 4294901760, %v11122_v44  ;;  %v4122_v3 = vsub.f32 %v11135_v19, %v13676_v50  ;;  %v4111_v4 = vand.u32 4294901760, %v4110_v59  ;;  %v3842_v50 = vand.u32 4294901760, %v3841_v2  ;;  %v13681_v2 = vld [vmem:[#allocation51_spill] sm:$0xff] }
 0x230   : > { %3945 = vmatpush.msrb.mxu0 %v13673_v32  ;;  %4094 = vmatpush.msrb.mxu3 %v4093_v17  ;;  %v5777_v17 = vsel %vm464_vm2, 1.0, %v13245_v62  ;;  %v13680_v59 = vand.u32 4294901760, %v10774_v38  ;;  %v5771_v38 = vsel %vm458_vm5, 1.0, %v13245_v62 }
 0x231   : > { %v4116_v40 = vsub.f32 %v11122_v44, %v13674_v26  ;;  %3825 = vmatpush.msra.mxu1 %v3824_v36  ;;  %3896 = vmatpush.msra.mxu2 %v11110_v57  ;;  %v11229_v36 = vsub.f32 %v5780_v35, %v5780_v35  ;;  %v13679_v26 = vand.u32 4294901760, %v11156_v21  ;;  %v11247_v32 = vsub.f32 %v5777_v17, %v5777_v17 }
 0x232   : > { %3949 = vmatpush.msrb.mxu0 %v13677_v29  ;;  %4100 = vmatpush.msrb.mxu3 %v4099_v45  ;;  %v5774_v45 = vsel %vm461_vm0, 1.0, %v13245_v62  ;;  %v4139_v29 = vand.u32 4294901760, %v11214_v0 }
 0x233   : > { %6336 = vmatpush.msk.msrb.mxu2 %vm13081_vm7, %v13173_v47  ;;  %3831 = vmatpush.msra.mxu1 %v3830_v10  ;;  %v4128_v52 = vsub.f32 %v11156_v21, %v13679_v26  ;;  %v4117_v35 = vand.u32 4294901760, %v4116_v40  ;;  %vm455_vm7 = vcmp.eq.s32.totalorder %v13681_v2, %v10667_v25  ;;  %v4123_v10 = vand.u32 4294901760, %v4122_v3 }
 0x234   : > { %3953 = vmatpush.msrb.mxu0 %v13680_v59  ;;  %4106 = vmatpush.msrb.mxu3 %v4105_v16  ;;  %v13682_v16 = vand.u32 4294901760, %v10812_v49  ;;  %v13683_v40 = vand.u32 4294901760, %v11196_v23  ;;  %v4145_v26 = vand.u32 4294901760, %v11229_v36  ;;  %v11265_v59 = vsub.f32 %v5774_v45, %v5774_v45 }
 0x235   : > { %6337 = vmatpush.msk.msrb.mxu2 %vm13082_vm10, %v13173_v47  ;;  %3837 = vmatpush.msra.mxu1 %v3836_v46  ;;  %v13684_v46 = vld [vmem:[#allocation52_spill] sm:$0xff]  ;;  %v4129_v49 = vand.u32 4294901760, %v4128_v52  ;;  %v5768_v3 = vsel %vm455_vm7, 1.0, %v13245_v62  ;;  %v4140_v45 = vsub.f32 %v11214_v0, %v4139_v29  ;;  %v13687_v52 = vand.u32 4294901760, %v10840_v41 }
 0x236   : > { %3957 = vmatpush.msrb.mxu0 %v13682_v16  ;;  %4112 = vmatpush.msrb.mxu3 %v4111_v4  ;;  %v4134_v17 = vsub.f32 %v11196_v23, %v13683_v40  ;;  %vm452_vm10 = vcmp.eq.s32.totalorder %v13684_v46, %v10667_v25  ;;  %v13685_v4 = vand.u32 4294901760, %v10825_v53  ;;  %v4151_v16 = vand.u32 4294901760, %v11247_v32 }
 0x237   : > { %6338 = vmatpush.msk.msrb.mxu2 %vm13083_vm8, %v13173_v47  ;;  %3843 = vmatpush.msra.mxu1 %v3842_v50  ;;  %v11283_v40 = vsub.f32 %v5771_v38, %v5771_v38  ;;  %v13686_v50 = vld [vmem:[#allocation53_spill] sm:$0xff]  ;;  %v5765_v53 = vsel %vm452_vm10, 1.0, %v13245_v62  ;;  %v4146_v54 = vsub.f32 %v11229_v36, %v4145_v26  ;;  %v4157_v38 = vand.u32 4294901760, %v11265_v59 }
 0x238   : > { %3961 = vmatpush.msrb.mxu0 %v13685_v4  ;;  %4118 = vmatpush.msrb.mxu3 %v4117_v35  ;;  %vm449_vm8 = vcmp.eq.s32.totalorder %v13686_v50, %v10667_v25  ;;  %v4135_v35 = vand.u32 4294901760, %v4134_v17  ;;  %v11305_v4 = vsub.f32 %v5768_v3, %v5768_v3  ;;  %v4141_v17 = vand.u32 4294901760, %v4140_v45 }
 0x239   : > { %6320 = vmatpush.msk.msrb.mxu1 %vm446_vm9, %v13173_v47  ;;  %6339 = vmatpush.msk.msrb.mxu2 %vm485_vm11, %v13173_v47  ;;  %v5762_v41 = vsel %vm449_vm8, 1.0, %v13245_v62  ;;  %v4152_v18 = vsub.f32 %v11247_v32, %v4151_v16  ;;  %v4163_v3 = vand.u32 4294901760, %v11283_v40  ;;  %v4158_v45 = vsub.f32 %v11265_v59, %v4157_v38 }
 0x23a   : > { %3965 = vmatpush.msrb.mxu0 %v13687_v52  ;;  %4124 = vmatpush.msrb.mxu3 %v4123_v10  ;;  %v13688_v10 = vand.u32 4294901760, %v10850_v33  ;;  %v11325_v52 = vsub.f32 %v5765_v53, %v5765_v53  ;;  %v13689_v33 = vand.u32 4294901760, %v10863_v9  ;;  %v4169_v53 = vand.u32 4294901760, %v11305_v4 }
 0x23b   : > { %6321 = vmatpush.msk.msrb.mxu1 %vm443_vm12, %v13173_v47  ;;  %6340 = vmatpush.msk.msrb.mxu2 %vm482_vm13, %v13173_v47  ;;  %v13690_v9 = vand.u32 4294901760, %v10918_v11  ;;  %vm13691_vm9 = vcmp.eq.s32.totalorder %v13626_v15, %v10667_v25  ;;  %v13692_v11 = vand.u32 4294901760, %v10926_v13  ;;  %v4159_v51 = vand.u32 4294901760, %v4158_v45 }
 0x23c   : > { %3969 = vmatpush.msrb.mxu0 %v13688_v10  ;;  %4130 = vmatpush.msrb.mxu3 %v4129_v49  ;;  %v4147_v49 = vand.u32 4294901760, %v4146_v54  ;;  %v11341_v10 = vsub.f32 %v5762_v41, %v5762_v41  ;;  %v4164_v54 = vsub.f32 %v11283_v40, %v4163_v3  ;;  %v4175_v41 = vand.u32 4294901760, %v11325_v52 }
 0x23d   : > { %6322 = vmatpush.msk.msrb.mxu1 %vm440_vm4, %v13173_v47  ;;  %6341 = vmatpush.msk.msrb.mxu2 %vm479_vm3, %v13173_v47  ;;  %vm13693_vm12 = vcmp.eq.s32.totalorder %v13628_v20, %v10667_v25  ;;  %v13694_v13 = vand.u32 4294901760, %v10965_v8  ;;  %vm13695_vm4 = vcmp.eq.s32.totalorder %v13629_v22, %v10667_v25  ;;  %v13697_v20 = vand.u32 4294901760, %v10986_v6 }
 0x23e   : > { %3973 = vmatpush.msrb.mxu0 %v13689_v33  ;;  %4136 = vmatpush.msrb.mxu3 %v4135_v35  ;;  %v4153_v35 = vand.u32 4294901760, %v4152_v18  ;;  %v11359_v33 = vpop.f32.mrf.mxu0  ;;  %v4181_v18 = vand.u32 4294901760, %v11341_v10  ;;  %v4165_v15 = vand.u32 4294901760, %v4164_v54  ;;  %v13699_v22 = vand.u32 4294901760, %v11026_v12  ;;  %v11415_v54 = vpop.f32.mrf.mxu1 }
 0x23f   : > { %6323 = vmatpush.msk.msrb.mxu1 %vm437_vm6, %v13173_v47  ;;  %6342 = vmatpush.msk.msrb.mxu2 %vm476_vm15, %v13173_v47  ;;  %vm13696_vm6 = vcmp.eq.s32.totalorder %v13668_v61, %v10667_v25 }
 0x240   : > { %3977 = vmatpush.msrb.mxu0 %v13690_v9  ;;  %4142 = vmatpush.msrb.mxu3 %v4141_v17  ;;  %v4170_v17 = vsub.f32 %v11305_v4, %v4169_v53  ;;  %v11375_v9 = vpop.f32.mrf.mxu2  ;;  %v4182_v45 = vsub.f32 %v11341_v10, %v4181_v18 }
 0x241   : > { %6324 = vmatpush.msk.msrb.mxu1 %vm13691_vm9, %v13173_v47  ;;  %6343 = vmatpush.msk.msrb.mxu2 %vm473_vm1, %v13173_v47  ;;  %vm13698_vm9 = vcmp.eq.s32.totalorder %v13631_v37, %v10667_v25  ;;  %v13701_v37 = vand.u32 4294901760, %v11052_v42 }
 0x242   : > { %3981 = vmatpush.msrb.mxu0 %v13692_v11  ;;  %4148 = vmatpush.msrb.mxu3 %v4147_v49  ;;  %v4176_v49 = vsub.f32 %v11325_v52, %v4175_v41  ;;  %v4171_v8 = vand.u32 4294901760, %v4170_v17  ;;  %v4183_v12 = vand.u32 4294901760, %v4182_v45 }
 0x243   : > { %6325 = vmatpush.msk.msrb.mxu1 %vm13693_vm12, %v13173_v47  ;;  %6344 = vmatpush.msk.msrb.mxu2 %vm470_vm14, %v13173_v47  ;;  %vm13700_vm12 = vcmp.eq.s32.totalorder %v13632_v14, %v10667_v25  ;;  %v13703_v14 = vand.u32 4294901760, %v11079_v34  ;;  %v13707_v34 = vld [vmem:[#allocation56_spill] sm:$0xff] }
 0x244   : > { %3985 = vmatpush.msrb.mxu0 %v13694_v13  ;;  %4154 = vmatpush.msrb.mxu3 %v4153_v35  ;;  %v11403_v35 = vpop.f32.mrf.mxu3  ;;  %v4177_v6 = vand.u32 4294901760, %v4176_v49  ;;  %v13711_v13 = vld [vmem:[#allocation31_spill] sm:$0xff] }
 0x245   : > { %6326 = vmatpush.msk.msrb.mxu1 %vm13695_vm4, %v13173_v47  ;;  %6345 = vmatpush.msk.msrb.mxu2 %vm13696_vm6, %v13173_v47  ;;  %vm13702_vm4 = vcmp.eq.s32.totalorder %v13633_v43, %v10667_v25  ;;  %vm13704_vm6 = vcmp.eq.s32.totalorder %v13634_v7, %v10667_v25  ;;  %v13705_v43 = vand.u32 4294901760, %v11110_v57  ;;  %v13709_v57 = vld [vmem:[#allocation82_spill] sm:$0xff]  ;;  %v13715_v49 = vld [vmem:[#allocation55_spill] sm:$0xff] }
 0x246   : > { %3989 = vmatpush.msrb.mxu0 %v13697_v20  ;;  %4160 = vmatpush.msrb.mxu3 %v4159_v51  ;;  %v11427_v11 = vpop.f32.mrf.mxu0  ;;  %v13706_v51 = vld [vmem:[#allocation58_spill] sm:$0xff]  ;;  %v11463_v17 = vpop.f32.mrf.mxu1  ;;  %v13716_v20 = vld [vmem:[#allocation32_spill] sm:$0xff]  ;;  %v13718_v45 = vand.u32 4294901760, %v13709_v57 }
 0x247   : > { %6327 = vmatpush.msk.msrb.mxu1 %vm13698_vm9, %v13173_v47  ;;  %6346 = vmatpush.msk.msrb.mxu2 %vm464_vm2, %v13173_v47  ;;  %vm13708_vm9 = vcmp.eq.s32.totalorder %v13638_v39, %v10667_v25 }
 0x248   : > { %3993 = vmatpush.msrb.mxu0 %v13699_v22  ;;  %4166 = vmatpush.msrb.mxu3 %v4165_v15  ;;  %v11439_v42 = vpop.f32.mrf.mxu2  ;;  %v13713_v15 = vld [vmem:[#allocation84_spill] sm:$0xff]  ;;  %v13719_v22 = vld [vmem:[#allocation86_spill] sm:$0xff] }
 0x249   : > { %6328 = vmatpush.msk.msrb.mxu1 %vm13700_vm12, %v13173_v47  ;;  %6347 = vmatpush.msk.msrb.mxu2 %vm461_vm0, %v13173_v47  ;;  %vm13710_vm12 = vcmp.eq.s32.totalorder %v13640_v5, %v10667_v25 }
 0x24a   : > { %3997 = vmatpush.msrb.mxu0 %v13701_v37  ;;  %4172 = vmatpush.msrb.mxu3 %v4171_v8  ;;  %v13723_v37 = vand.u32 4294901760, %v13713_v15 }
 0x24b   : > { %6329 = vmatpush.msk.msrb.mxu1 %vm13702_vm4, %v13173_v47  ;;  %6348 = vmatpush.msk.msrb.mxu2 %vm458_vm5, %v13173_v47  ;;  %vm13712_vm4 = vcmp.eq.s32.totalorder %v13711_v13, %v10667_v25 }
 0x24c   : > { %4001 = vmatpush.msrb.mxu0 %v13703_v14  ;;  %4178 = vmatpush.msrb.mxu3 %v4177_v6  ;;  %v11461_v7 = vpop.f32.mrf.mxu3  ;;  %v13721_v6 = vld [vmem:[#allocation33_spill] sm:$0xff]  ;;  %v13725_v14 = vld [vmem:[#allocation54_spill] sm:$0xff] }
 0x24d   : > { %6330 = vmatpush.msk.msrb.mxu1 %vm13704_vm6, %v13173_v47  ;;  %6349 = vmatpush.msk.msrb.mxu2 %vm455_vm7, %v13173_v47  ;;  %vm13714_vm6 = vcmp.eq.s32.totalorder %v13644_v55, %v10667_v25 }
 0x24e   : > { %4005 = vmatpush.msrb.mxu0 %v13705_v43  ;;  %4184 = vmatpush.msrb.mxu3 %v4183_v12  ;;  %v11478_v39 = vpop.f32.mrf.mxu0  ;;  %v13724_v12 = vld [vmem:[#allocation90_spill] sm:$0xff] }
 0x24f   : > { %3744 = vmatmul.f32.vlgmr.msra.gmra.mxu0 %v13706_v51  ;;  %3938 = vmatmul.f32.vlgmr.msra.gmra.mxu3 %v13707_v34  ;;  %v11513_v51 = vpop.f32.mrf.mxu1  ;;  %v13726_v34 = vand.u32 4294901760, %v13719_v22 }
 0x250   : > { %6331 = vmatpush.msk.msrb.mxu1 %vm13708_vm9, %v13173_v47  ;;  %6350 = vmatpush.msk.msrb.mxu2 %vm452_vm10, %v13173_v47  ;;  %vm13717_vm9 = vcmp.eq.s32.totalorder %v13716_v20, %v10667_v25  ;;  %v11490_v8 = vpop.f32.mrf.mxu2  ;;  %v13732_v20 = vld [vmem:[#allocation61_spill] sm:$0xff] }
 0x251   : > { %4192 = vmatpush.msra.mxu0 %v13709_v57  ;;  %6368 = vmatpush.msk.msra.mxu3 %vm13710_vm12, %v13173_v47  ;;  %vm13720_vm12 = vcmp.eq.s32.totalorder %v13646_v28, %v10667_v25  ;;  %v13727_v57 = vld [vmem:[#allocation18_spill] sm:$0xff] }
 0x252   : > { %6332 = vmatpush.msk.msrb.mxu1 %vm13712_vm4, %v13173_v47  ;;  %6351 = vmatpush.msk.msrb.mxu2 %vm449_vm8, %v13173_v47  ;;  %vm13722_vm4 = vcmp.eq.s32.totalorder %v13721_v6, %v10667_v25 }
 0x253   : > { %4195 = vmatpush.msra.mxu0 %v13713_v15  ;;  %6369 = vmatpush.msk.msra.mxu3 %vm13714_vm6, %v13173_v47  ;;  %vm13728_vm6 = vcmp.eq.s32.totalorder %v13727_v57, %v10667_v25  ;;  %v13730_v15 = vand.u32 4294901760, %v13724_v12 }
 0x254   : > { %3899 = vmatmul.f32.vlgmr.msra.gmra.mxu2 %v13715_v49  ;;  %6333 = vmatpush.msk.msrb.mxu1 %vm13717_vm9, %v13173_v47  ;;  %v11511_v43 = vpop.f32.mrf.mxu3  ;;  %vm13729_vm9 = vcmp.eq.s32.totalorder %v13640_v5, %v10667_v25  ;;  %v13734_v5 = vand.u32 4294901760, %v11122_v44 }
 0x255   : > { %4286 = vmatpush.msra.mxu2 %v13718_v45  ;;  %4198 = vmatpush.msra.mxu0 %v13719_v22  ;;  %v13735_v45 = vld [vmem:[#allocation57_spill] sm:$0xff]  ;;  %v13739_v22 = vand.u32 4294901760, %v11135_v19 }
 0x256   : > { %6370 = vmatpush.msk.msra.mxu3 %vm13720_vm12, %v13173_v47  ;;  %6334 = vmatpush.msk.msrb.mxu1 %vm13722_vm4, %v13173_v47  ;;  %v11526_v13 = vpop.f32.mrf.mxu0  ;;  %vm13733_vm12 = vcmp.eq.s32.totalorder %v13644_v55, %v10667_v25  ;;  %vm13736_vm4 = vcmp.eq.s32.totalorder %v13646_v28, %v10667_v25  ;;  %v13741_v28 = vand.u32 4294901760, %v11156_v21 }
 0x257   : > { %4290 = vmatpush.msra.mxu2 %v13723_v37  ;;  %4201 = vmatpush.msra.mxu0 %v13724_v12 }
 0x258   : > { %6371 = vmatpush.msk.msra.mxu3 %vm485_vm11, %v13173_v47  ;;  %3845 = vmatmul.f32.vlgmr.msra.gmra.mxu1 %v13725_v14  ;;  %v11539_v49 = vpop.f32.mrf.mxu2 }
 0x259   : > { %4294 = vmatpush.msra.mxu2 %v13726_v34  ;;  %6335 = vmatpush.msk.msrb.mxu1 %vm13728_vm6, %v13173_v47  ;;  %13731 = vst [vmem:[#allocation102_spill] sm:$0xff] %v11539_v49 }
 0x25a   : > { %4204 = vmatpush.msra.mxu0 %v11122_v44  ;;  %6372 = vmatpush.msk.msra.mxu3 %vm482_vm13, %v13173_v47  ;;  %v11561_v44 = vpop.f32.mrf.mxu1 }
 0x25b   : > { %6352 = vmatpush.msk.msra.mxu1 %vm13729_vm9, %v13173_v47  ;;  %4298 = vmatpush.msra.mxu2 %v13730_v15  ;;  %13738 = vst [vmem:[#allocation20_spill] sm:$0xff] %v11561_v44 }
 0x25c   : > { %4207 = vmatpush.msra.mxu0 %v11135_v19  ;;  %6373 = vmatpush.msk.msra.mxu3 %vm479_vm3, %v13173_v47  ;;  %v11559_v55 = vpop.f32.mrf.mxu3 }
 0x25d   : > { %4085 = vmatmul.f32.vlgmr.msrb.gmra.mxu2 %v13732_v20  ;;  %6353 = vmatpush.msk.msra.mxu1 %vm13733_vm12, %v13173_v47  ;;  %13737 = vst [vmem:[#allocation19_spill] sm:$0xff] %v11559_v55 }
 0x25e   : > { %4302 = vmatpush.msra.mxu2 %v13734_v5  ;;  %4210 = vmatpush.msra.mxu0 %v11156_v21  ;;  %v11571_v6 = vpop.f32.mrf.mxu0 }
 0x25f   : > { %6374 = vmatpush.msk.msra.mxu3 %vm476_vm15, %v13173_v47  ;;  %4007 = vmatmul.f32.vlgmr.msrb.gmra.mxu0 %v13725_v14  ;;  %13740 = vst [vmem:[#allocation21_spill] sm:$0xff] %v11571_v6 }
 0x260   : > { %4186 = vmatmul.f32.vlgmr.msrb.gmra.mxu3 %v13735_v45  ;;  %6354 = vmatpush.msk.msra.mxu1 %vm13736_vm4, %v13173_v47  ;;  %v11584_v19 = vpop.f32.mrf.mxu2 }
 0x261   : > { %4306 = vmatpush.msra.mxu2 %v13739_v22  ;;  %4213 = vmatpush.msra.mxu0 %v11196_v23  ;;  %13742 = vst [vmem:[#allocation22_spill] sm:$0xff] %v11584_v19 }
 0x262   : > { %6375 = vmatpush.msk.msra.mxu3 %vm473_vm1, %v13173_v47  ;;  %4044 = vmatmul.f32.vlgmr.msrb.gmra.mxu1 %v13725_v14  ;;  %v11610_v56 = vpop.f32.mrf.mxu1  ;;  %v13758_v14 = vld [vmem:[#allocation64_spill] sm:$0xff] }
 0x263   : > { %6355 = vmatpush.msk.msra.mxu1 %vm485_vm11, %v13173_v47  ;;  %4310 = vmatpush.msra.mxu2 %v13741_v28  ;;  %vm13744_vm11 = vcmp.eq.s32.totalorder %v13668_v61, %v10667_v25  ;;  %13746 = vst [vmem:[#allocation24_spill] sm:$0xff] %v11610_v56  ;;  %v13760_v28 = vld [vmem:[#allocation66_spill] sm:$0xff] }
 0x264   : > { %4216 = vmatpush.msra.mxu0 %v11214_v0  ;;  %6376 = vmatpush.msk.msra.mxu3 %vm470_vm14, %v13173_v47  ;;  %v11608_v21 = vpop.f32.mrf.mxu3  ;;  %v13748_v0 = vld [vmem:[#allocation42_spill] sm:$0xff]  ;;  %vm13094_vm9 = vcmp.eq.s32.totalorder %v13760_v28, %v10667_v25 }
 0x265   : > { %6356 = vmatpush.msk.msra.mxu1 %vm482_vm13, %v13173_v47  ;;  %4314 = vmatpush.msra.mxu2 %v13743_v31  ;;  %13745 = vst [vmem:[#allocation23_spill] sm:$0xff] %v11608_v21  ;;  %vm542_vm13 = vcmp.eq.s32.totalorder %v13747_v63, %v10667_v25 }
 0x266   : > { %4219 = vmatpush.msra.mxu0 %v11229_v36  ;;  %6377 = vmatpush.msk.msra.mxu3 %vm13744_vm11, %v13173_v47  ;;  %v11627_v23 = vpop.f32.mrf.mxu0  ;;  %v5855_v58 = vsel %vm542_vm13, 1.0, %v13245_v62 }
 0x267   : > { %6357 = vmatpush.msk.msra.mxu1 %vm479_vm3, %v13173_v47  ;;  %4318 = vmatpush.msra.mxu2 %v4139_v29  ;;  %vm539_vm3 = vcmp.eq.s32.totalorder %v13748_v0, %v10667_v25  ;;  %13749 = vst [vmem:[#allocation25_spill] sm:$0xff] %v11627_v23  ;;  %v1119_v29 = vadd.f32 %v11343_v30, %v11359_v33  ;;  %v13778_v23 = vld [vmem:[#allocation79_spill] sm:$0xff] }
 0x268   : > { %4222 = vmatpush.msra.mxu0 %v11247_v32  ;;  %6378 = vmatpush.msk.msra.mxu3 %vm464_vm2, %v13173_v47  ;;  %v11644_v36 = vpop.f32.mrf.mxu2  ;;  %v5852_v32 = vsel %vm539_vm3, 1.0, %v13245_v62  ;;  %v11671_v27 = vsub.f32 %v5855_v58, %v5855_v58 }
 0x269   : > { %6358 = vmatpush.msk.msra.mxu1 %vm476_vm15, %v13173_v47  ;;  %4322 = vmatpush.msra.mxu2 %v4145_v26  ;;  %13750 = vst [vmem:[#allocation26_spill] sm:$0xff] %v11644_v36  ;;  %vm536_vm15 = vcmp.eq.s32.totalorder %v13751_v60, %v10667_v25  ;;  %v13753_v26 = vld [vmem:[#allocation50_spill] sm:$0xff] }
 0x26a   : > { %4225 = vmatpush.msra.mxu0 %v11265_v59  ;;  %6379 = vmatpush.msk.msra.mxu3 %vm461_vm0, %v13173_v47  ;;  %v11680_v59 = vsub.f32 %v5852_v32, %v5852_v32  ;;  %v5849_v61 = vsel %vm536_vm15, 1.0, %v13245_v62  ;;  %v13775_v36 = vld [vmem:[#allocation78_spill] sm:$0xff] }
 0x26b   : > { %6359 = vmatpush.msk.msra.mxu1 %vm473_vm1, %v13173_v47  ;;  %4326 = vmatpush.msra.mxu2 %v4151_v16  ;;  %vm13752_vm1 = vmmov %vm13744_vm11  ;;  %v13754_v16 = vld [vmem:[#allocation62_spill] sm:$0xff] }
 0x26c   : > { %4228 = vmatpush.msra.mxu0 %v11283_v40  ;;  %6380 = vmatpush.msk.msra.mxu3 %vm458_vm5, %v13173_v47  ;;  %vm530_vm6 = vcmp.eq.s32.totalorder %v13754_v16, %v10667_v25  ;;  %v11688_v40 = vpop.f32.mrf.mxu3  ;;  %v13088_v1 = vand.u32 4294901760, %v11680_v59 }
 0x26d   : > { %6360 = vmatpush.msk.msra.mxu1 %vm470_vm14, %v13173_v47  ;;  %4330 = vmatpush.msra.mxu2 %v4157_v38  ;;  %vm533_vm14 = vcmp.eq.s32.totalorder %v13753_v26, %v10667_v25  ;;  %13755 = vst [vmem:[#allocation27_spill] sm:$0xff] %v11688_v40  ;;  %v2482_v38 = vpop.f32.mrf.mxu1  ;;  %v5843_v37 = vsel %vm530_vm6, 1.0, %v13245_v62  ;;  %v13771_v40 = vld [vmem:[#allocation77_spill] sm:$0xff] }
 0x26e   : > { %4231 = vmatpush.msra.mxu0 %v11305_v4  ;;  %6381 = vmatpush.msk.msra.mxu3 %vm455_vm7, %v13173_v47  ;;  %v5846_v30 = vsel %vm533_vm14, 1.0, %v13245_v62  ;;  %v2381_v33 = vpop.f32.mrf.mxu0  ;;  %v11711_v4 = vsub.f32 %v5849_v61, %v5849_v61 }
 0x26f   : > { %6361 = vmatpush.msk.msra.mxu1 %vm13752_vm1, %v13173_v47  ;;  %4334 = vmatpush.msra.mxu2 %v4163_v3  ;;  %v1173_v3 = vadd.f32 %v11375_v9, %v1119_v29  ;;  %v13757_v9 = vld [vmem:[#allocation63_spill] sm:$0xff]  ;;  %v2483_v12 = vadd.f32 %v2482_v38, %v2381_v33 }
 0x270   : > { %4234 = vmatpush.msra.mxu0 %v11325_v52  ;;  %6382 = vmatpush.msk.msra.mxu3 %vm452_vm10, %v13173_v47  ;;  %v2536_v34 = vpop.f32.mrf.mxu2  ;;  %v11737_v52 = vsub.f32 %v5846_v30, %v5846_v30  ;;  %v13761_v38 = vld [vmem:[#allocation67_spill] sm:$0xff] }
 0x271   : > { %6362 = vmatpush.msk.msra.mxu1 %vm464_vm2, %v13173_v47  ;;  %4338 = vmatpush.msra.mxu2 %v4169_v53  ;;  %v13090_v53 = vand.u32 4294901760, %v11671_v27  ;;  %vm13096_vm2 = vcmp.eq.s32.totalorder %v13757_v9, %v10667_v25  ;;  %v1212_v20 = vadd.f32 %v11403_v35, %v1173_v3  ;;  %v2537_v22 = vadd.f32 %v2536_v34, %v2483_v12  ;;  %v13762_v34 = vld [vmem:[#allocation68_spill] sm:$0xff] }
 0x272   : > { %4237 = vmatpush.msra.mxu0 %v11341_v10  ;;  %6383 = vmatpush.msk.msra.mxu3 %vm449_vm8, %v13173_v47  ;;  %v5840_v15 = vsel %vm13096_vm2, 1.0, %v13245_v62  ;;  %v4439_v35 = vsub.f32 %v11680_v59, %v13088_v1  ;;  %v13084_v58 = vand.u32 4294901760, %v11737_v52  ;;  %v13767_v1 = vld [vmem:[#allocation73_spill] sm:$0xff] }
 0x273   : > { %4240 = vmatmul.f32.vlgmr.msra.gmra.mxu0 %v13756_v24  ;;  %6363 = vmatpush.msk.msra.mxu1 %vm461_vm0, %v13173_v47  ;;  %vm13091_vm0 = vcmp.eq.s32.totalorder %v13758_v14, %v10667_v25  ;;  %v4433_v10 = vsub.f32 %v11671_v27, %v13090_v53  ;;  %v11785_v2 = vsub.f32 %v5840_v15, %v5840_v15 }
 0x274   : > { %4342 = vmatpush.msra.mxu2 %v4175_v41  ;;  %6384 = vmatpush.msk.msrb.mxu0 %vm542_vm13, %v13173_v47  ;;  %v11745_v41 = vsub.f32 %v5843_v37, %v5843_v37  ;;  %v5837_v5 = vsel %vm13091_vm0, 1.0, %v13245_v62  ;;  %v2575_v31 = vpop.f32.mrf.mxu3  ;;  %v1281_v3 = vadd.f32 %v11427_v11, %v1212_v20  ;;  %v5831_v11 = vsel %vm13094_vm9, 1.0, %v13245_v62  ;;  %v13763_v20 = vld [vmem:[#allocation60_spill] sm:$0xff] }
 0x275   : > { %6400 = vmatpush.msk.msrb.mxu3 %vm542_vm13, %v13173_v47  ;;  %6364 = vmatpush.msk.msra.mxu1 %vm458_vm5, %v13173_v47  ;;  %vm13092_vm5 = vcmp.eq.s32.totalorder %v13759_v48, %v10667_v25  ;;  %v11797_v29 = vsub.f32 %v5837_v5, %v5837_v5  ;;  %v4434_v46 = vand.u32 4294901760, %v4433_v10  ;;  %v2576_v33 = vadd.f32 %v2575_v31, %v2537_v22 }
 0x276   : > { %4346 = vmatpush.msra.mxu2 %v4181_v18  ;;  %6385 = vmatpush.msk.msrb.mxu0 %vm539_vm3, %v13173_v47  ;;  %v13086_v18 = vand.u32 4294901760, %v11711_v4  ;;  %v5834_v32 = vsel %vm13092_vm5, 1.0, %v13245_v62  ;;  %v13085_v61 = vand.u32 4294901760, %v11745_v41  ;;  %v4440_v24 = vand.u32 4294901760, %v4439_v35  ;;  %v2644_v15 = vpop.f32.mrf.mxu0  ;;  %v13764_v35 = vld [vmem:[#allocation69_spill] sm:$0xff] }
 0x277   : > { %6401 = vmatpush.msk.msrb.mxu3 %vm539_vm3, %v13173_v47  ;;  %6365 = vmatpush.msk.msra.mxu1 %vm455_vm7, %v13173_v47  ;;  %vm13095_vm7 = vcmp.eq.s32.totalorder %v13761_v38, %v10667_v25  ;;  %v11820_v37 = vsub.f32 %v5834_v32, %v5834_v32  ;;  %v4451_v12 = vsub.f32 %v11737_v52, %v13084_v58  ;;  %v13089_v22 = vand.u32 4294901760, %v11797_v29  ;;  %v13765_v58 = vld [vmem:[#allocation70_spill] sm:$0xff] }
 0x278   : > { %4533 = vmatpush.msrb.mxu2 %v11671_v27  ;;  %6386 = vmatpush.msk.msrb.mxu0 %vm536_vm15, %v13173_v47  ;;  %v4445_v30 = vsub.f32 %v11711_v4, %v13086_v18  ;;  %v5828_v50 = vsel %vm13095_vm7, 1.0, %v13245_v62  ;;  %v4457_v10 = vsub.f32 %v11745_v41, %v13085_v61  ;;  %v11848_v5 = vsub.f32 %v5831_v11, %v5831_v11  ;;  %v2681_v18 = vpop.f32.mrf.mxu1 }
 0x279   : > { %6402 = vmatpush.msk.msrb.mxu3 %vm536_vm15, %v13173_v47  ;;  %4348 = vmatmul.f32.vlgmr.msra.gmra.mxu2 %v13735_v45  ;;  %v1318_v31 = vadd.f32 %v11415_v54, %v1281_v3  ;;  %vm13105_vm12 = vcmp.eq.s32.totalorder %v13765_v58, %v10667_v25  ;;  %v11865_v11 = vsub.f32 %v5828_v50, %v5828_v50  ;;  %v13093_v54 = vand.u32 4294901760, %v11820_v37 }
 0x27a   : > { %4536 = vmatpush.msrb.mxu2 %v11680_v59  ;;  %6366 = vmatpush.msk.msra.mxu1 %vm452_vm10, %v13173_v47  ;;  %vm13097_vm10 = vcmp.eq.s32.totalorder %v13762_v34, %v10667_v25  ;;  %v4446_v32 = vand.u32 4294901760, %v4445_v30  ;;  %v2645_v30 = vadd.f32 %v2644_v15, %v2576_v33  ;;  %v4458_v33 = vand.u32 4294901760, %v4457_v10 }
 0x27b   : > { %6387 = vmatpush.msk.msrb.mxu0 %vm533_vm14, %v13173_v47  ;;  %6403 = vmatpush.msk.msrb.mxu3 %vm533_vm14, %v13173_v47  ;;  %v5825_v3 = vsel %vm13097_vm10, 1.0, %v13245_v62  ;;  %v5819_v15 = vsel %vm13105_vm12, 1.0, %v13245_v62  ;;  %vm13107_vm11 = vcmp.eq.s32.totalorder %v13767_v1, %v10667_v25  ;;  %v11910_v53 = vadd.f32 %v11439_v42, %v1318_v31 }
 0x27c   : > { %4385 = vmatmul.f32.vlgmr.msra.gmra.mxu3 %v13735_v45  ;;  %4539 = vmatpush.msrb.mxu2 %v11711_v4  ;;  %v13087_v45 = vand.u32 4294901760, %v11785_v2  ;;  %v2682_v42 = vadd.f32 %v2681_v18, %v2645_v30  ;;  %v11927_v57 = vsub.f32 %v5819_v15, %v5819_v15  ;;  %v13772_v18 = vld [vmem:[#allocation76_spill] sm:$0xff]  ;;  %v13774_v15 = vand.u32 4294901760, %v11848_v5 }
 0x27d   : > { %6367 = vmatpush.msk.msra.mxu1 %vm449_vm8, %v13173_v47  ;;  %6388 = vmatpush.msk.msrb.mxu0 %vm530_vm6, %v13173_v47  ;;  %vm13100_vm8 = vcmp.eq.s32.totalorder %v13764_v35, %v10667_v25 }
 0x27e   : > { %6404 = vmatpush.msk.msrb.mxu3 %vm530_vm6, %v13173_v47  ;;  %4279 = vmatmul.f32.vlgmr.msra.gmra.mxu1 %v13763_v20  ;;  %v4452_v20 = vand.u32 4294901760, %v4451_v12  ;;  %v4463_v50 = vsub.f32 %v11785_v2, %v13087_v45  ;;  %v5822_v61 = vsel %vm13100_vm8, 1.0, %v13245_v62  ;;  %v11899_v45 = vsub.f32 %v5825_v3, %v5825_v3  ;;  %13770 = vst [vmem:[#allocation29_spill] sm:$0xff] %v11927_v57 }
 0x27f   : > { %4435 = vmatpush.msrb.mxu1 %v4434_v46  ;;  %4542 = vmatpush.msrb.mxu2 %v11737_v52  ;;  %v13766_v46 = vld [vmem:[#allocation72_spill] sm:$0xff]  ;;  %v11923_v3 = vsub.f32 %v5822_v61, %v5822_v61  ;;  %v5816_v61 = vsel %vm13107_vm11, 1.0, %v13245_v62 }
 0x280   : > { %6389 = vmatpush.msk.msrb.mxu0 %vm13096_vm2, %v13173_v47  ;;  %6405 = vmatpush.msk.msrb.mxu3 %vm13096_vm2, %v13173_v47  ;;  %vm13124_vm4 = vcmp.eq.s32.totalorder %v13766_v46, %v10667_v25  ;;  %v4464_v31 = vand.u32 4294901760, %v4463_v50  ;;  %v11975_v56 = vsub.f32 %v5816_v61, %v5816_v61  ;;  %v13781_v19 = vand.u32 4294901760, %v11899_v45  ;;  %v13783_v61 = vld [vmem:[#allocation83_spill] sm:$0xff] }
 0x281   : > { %4441 = vmatpush.msrb.mxu1 %v4440_v24  ;;  %4545 = vmatpush.msrb.mxu2 %v11745_v41  ;;  %v4469_v24 = vsub.f32 %v11797_v29, %v13089_v22  ;;  %v5903_v10 = vsel %vm13124_vm4, 1.0, %v13245_v62  ;;  %v13768_v22 = vld [vmem:[#allocation74_spill] sm:$0xff]  ;;  %13769 = vst [vmem:[#allocation28_spill] sm:$0xff] %v11923_v3 }
 0x282   : > { %6390 = vmatpush.msk.msrb.mxu0 %vm13091_vm0, %v13173_v47  ;;  %6406 = vmatpush.msk.msrb.mxu3 %vm13091_vm0, %v13173_v47  ;;  %vm13129_vm1 = vcmp.eq.s32.totalorder %v13768_v22, %v10667_v25  ;;  %vm13130_vm0 = vcmp.eq.s32.totalorder %v13771_v40, %v10667_v25  ;;  %v11945_v30 = vsub.f32 %v5903_v10, %v5903_v10  ;;  %v13792_v1 = vand.u32 4294901760, %v11975_v56 }
 0x283   : > { %4447 = vmatpush.msrb.mxu1 %v4446_v32  ;;  %4548 = vmatpush.msrb.mxu2 %v11785_v2  ;;  %v4475_v32 = vsub.f32 %v11820_v37, %v13093_v54  ;;  %v4470_v50 = vand.u32 4294901760, %v4469_v24  ;;  %v4481_v54 = vsub.f32 %v11848_v5, %v13774_v15  ;;  %v13776_v24 = vand.u32 4294901760, %v11865_v11  ;;  %13777 = vst [vmem:[#allocation34_spill] sm:$0xff] %v11975_v56  ;;  %v13780_v15 = vld [vmem:[#allocation81_spill] sm:$0xff] }
 0x284   : > { %6391 = vmatpush.msk.msrb.mxu0 %vm13092_vm5, %v13173_v47  ;;  %6407 = vmatpush.msk.msrb.mxu3 %vm13092_vm5, %v13173_v47  ;;  %vm13114_vm5 = vcmp.eq.s32.totalorder %v13772_v18, %v10667_v25  ;;  %13773 = vst [vmem:[#allocation30_spill] sm:$0xff] %v11945_v30  ;;  %v5897_v12 = vsel %vm13130_vm0, 1.0, %v13245_v62  ;;  %vm578_vm2 = vcmp.eq.s32.totalorder %v13780_v15, %v10667_v25 }
 0x285   : > { %4453 = vmatpush.msrb.mxu1 %v4452_v20  ;;  %4551 = vmatpush.msrb.mxu2 %v11797_v29  ;;  %v5900_v20 = vsel %vm13129_vm1, 1.0, %v13245_v62  ;;  %v4487_v10 = vsub.f32 %v11865_v11, %v13776_v24  ;;  %v4482_v21 = vand.u32 4294901760, %v4481_v54  ;;  %v4493_v44 = vsub.f32 %v11899_v45, %v13781_v19 }
 0x286   : > { %6392 = vmatpush.msk.msrb.mxu0 %vm13094_vm9, %v13173_v47  ;;  %6408 = vmatpush.msk.msrb.mxu3 %vm13094_vm9, %v13173_v47  ;;  %vm581_vm9 = vcmp.eq.s32.totalorder %v13775_v36, %v10667_v25  ;;  %v11983_v24 = vsub.f32 %v5900_v20, %v5900_v20  ;;  %v12005_v6 = vsub.f32 %v5897_v12, %v5897_v12 }
 0x287   : > { %4459 = vmatpush.msrb.mxu1 %v4458_v33  ;;  %4554 = vmatpush.msrb.mxu2 %v11820_v37  ;;  %v4476_v33 = vand.u32 4294901760, %v4475_v32  ;;  %v5813_v32 = vsel %vm13114_vm5, 1.0, %v13245_v62  ;;  %v5894_v20 = vsel %vm581_vm9, 1.0, %v13245_v62  ;;  %v4488_v54 = vand.u32 4294901760, %v4487_v10 }
 0x288   : > { %6393 = vmatpush.msk.msrb.mxu0 %vm13095_vm7, %v13173_v47  ;;  %6409 = vmatpush.msk.msrb.mxu3 %vm13095_vm7, %v13173_v47  ;;  %vm13120_vm7 = vcmp.eq.s32.totalorder %v13778_v23, %v10667_v25  ;;  %13779 = vst [vmem:[#allocation35_spill] sm:$0xff] %v11983_v24  ;;  %v12020_v12 = vsub.f32 %v5813_v32, %v5813_v32  ;;  %v5891_v10 = vsel %vm578_vm2, 1.0, %v13245_v62  ;;  %v13786_v32 = vld [vmem:[#allocation85_spill] sm:$0xff]  ;;  %v4494_v58 = vand.u32 4294901760, %v4493_v44 }
 0x289   : > { %4465 = vmatpush.msrb.mxu1 %v4464_v31  ;;  %4557 = vmatpush.msrb.mxu2 %v11848_v5  ;;  %13782 = vst [vmem:[#allocation36_spill] sm:$0xff] %v12005_v6  ;;  %v2722_v31 = vpop.f32.mrf.mxu2  ;;  %v5810_v55 = vsel %vm13120_vm7, 1.0, %v13245_v62  ;;  %v12028_v38 = vsub.f32 %v5894_v20, %v5894_v20  ;;  %v13789_v44 = vld [vmem:[#allocation89_spill] sm:$0xff] }
 0x28a   : > { %6394 = vmatpush.msk.msrb.mxu0 %vm13097_vm10, %v13173_v47  ;;  %6410 = vmatpush.msk.msrb.mxu3 %vm13097_vm10, %v13173_v47  ;;  %vm575_vm10 = vcmp.eq.s32.totalorder %v13783_v61, %v10667_v25  ;;  %v2723_v28 = vadd.f32 %v2722_v31, %v2682_v42  ;;  %v12056_v48 = vsub.f32 %v5810_v55, %v5810_v55  ;;  %v2823_v31 = vpop.f32.mrf.mxu3 }
 0x28b   : > { %4471 = vmatpush.msrb.mxu1 %v4470_v50  ;;  %4560 = vmatpush.msrb.mxu2 %v11865_v11  ;;  %v13784_v50 = vand.u32 4294901760, %v11923_v3  ;;  %13785 = vst [vmem:[#allocation37_spill] sm:$0xff] %v12028_v38  ;;  %v5888_v49 = vsel %vm575_vm10, 1.0, %v13245_v62  ;;  %v13798_v18 = vand.u32 4294901760, %v12028_v38 }
 0x28c   : > { %6395 = vmatpush.msk.msrb.mxu0 %vm13100_vm8, %v13173_v47  ;;  %6411 = vmatpush.msk.msrb.mxu3 %vm13100_vm8, %v13173_v47  ;;  %vm572_vm8 = vcmp.eq.s32.totalorder %v13786_v32, %v10667_v25  ;;  %v12081_v42 = vsub.f32 %v5888_v49, %v5888_v49  ;;  %v2877_v49 = vpop.f32.mrf.mxu0  ;;  %v13801_v23 = vand.u32 4294901760, %v12056_v48 }
 0x28d   : > { %v4499_v19 = vsub.f32 %v11923_v3, %v13784_v50  ;;  %4477 = vmatpush.msrb.mxu1 %v4476_v33  ;;  %4563 = vmatpush.msrb.mxu2 %v11899_v45  ;;  %v13787_v33 = vand.u32 4294901760, %v11945_v30  ;;  %v13788_v50 = vand.u32 4294901760, %v11927_v57  ;;  %v5885_v55 = vsel %vm572_vm8, 1.0, %v13245_v62 }
 0x28e   : > { %6396 = vmatpush.msk.msrb.mxu0 %vm13105_vm12, %v13173_v47  ;;  %6412 = vmatpush.msk.msrb.mxu3 %vm13105_vm12, %v13173_v47  ;;  %vm569_vm12 = vcmp.eq.s32.totalorder %v13789_v44, %v10667_v25  ;;  %13791 = vst [vmem:[#allocation38_spill] sm:$0xff] %v12081_v42 }
 0x28f   : > { %v4774_v20 = vsub.f32 %v11945_v30, %v13787_v33  ;;  %v4505_v34 = vsub.f32 %v11927_v57, %v13788_v50  ;;  %4483 = vmatpush.msrb.mxu1 %v4482_v21  ;;  %4566 = vmatpush.msrb.mxu2 %v11923_v3  ;;  %v12068_v21 = vsub.f32 %v5891_v10, %v5891_v10  ;;  %v4500_v50 = vand.u32 4294901760, %v4499_v19  ;;  %v13793_v10 = vld [vmem:[#allocation91_spill] sm:$0xff] }
 0x290   : > { %6397 = vmatpush.msk.msrb.mxu0 %vm13107_vm11, %v13173_v47  ;;  %6413 = vmatpush.msk.msrb.mxu3 %vm13107_vm11, %v13173_v47  ;;  %v13790_v33 = vand.u32 4294901760, %v11983_v24  ;;  %vm13123_vm11 = vcmp.eq.s32.totalorder %v13793_v10, %v10667_v25  ;;  %v13799_v3 = vand.u32 4294901760, %v11671_v27 }
 0x291   : > { %4489 = vmatpush.msrb.mxu1 %v4488_v54  ;;  %4569 = vmatpush.msrb.mxu2 %v11927_v57  ;;  %v4775_v54 = vand.u32 4294901760, %v4774_v20  ;;  %v4506_v19 = vand.u32 4294901760, %v4505_v34  ;;  %v12101_v57 = vsub.f32 %v5885_v55, %v5885_v55  ;;  %v2824_v34 = vadd.f32 %v2823_v31, %v2723_v28  ;;  %v13796_v55 = vld [vmem:[#allocation92_spill] sm:$0xff]  ;;  %v13797_v28 = vld [vmem:[#allocation87_spill] sm:$0xff]  ;;  %v2916_v20 = vpop.f32.mrf.mxu1 }
 0x292   : > { %v4780_v35 = vsub.f32 %v11983_v24, %v13790_v33  ;;  %6398 = vmatpush.msk.msrb.mxu0 %vm13114_vm5, %v13173_v47  ;;  %6414 = vmatpush.msk.msrb.mxu3 %vm13114_vm5, %v13173_v47  ;;  %v4511_v33 = vsub.f32 %v11975_v56, %v13792_v1  ;;  %v13794_v24 = vand.u32 4294901760, %v12005_v6  ;;  %v5882_v1 = vsel %vm569_vm12, 1.0, %v13245_v62 }
 0x293   : > { %4495 = vmatpush.msrb.mxu1 %v4494_v58  ;;  %4572 = vmatpush.msrb.mxu2 %v11975_v56  ;;  %v13795_v58 = vand.u32 4294901760, %v12020_v12  ;;  %vm563_vm5 = vcmp.eq.s32.totalorder %v13796_v55, %v10667_v25  ;;  %v2878_v56 = vadd.f32 %v2877_v49, %v2824_v34  ;;  %v13128_v49 = vand.u32 4294901760, %v12101_v57  ;;  %v13890_v55 = vld [vmem:[#allocation100_spill] sm:$0xff] }
 0x294   : > { %v4786_v30 = vsub.f32 %v12005_v6, %v13794_v24  ;;  %6399 = vmatpush.msk.msrb.mxu0 %vm13120_vm7, %v13173_v47  ;;  %6415 = vmatpush.msk.msrb.mxu3 %vm13120_vm7, %v13173_v47  ;;  %v4781_v31 = vand.u32 4294901760, %v4780_v35  ;;  %v4792_v6 = vsub.f32 %v12028_v38, %v13798_v18  ;;  %v12133_v35 = vsub.f32 %v5882_v1, %v5882_v1 }
 0x295   : > { %v4517_v24 = vsub.f32 %v12020_v12, %v13795_v58  ;;  %4426 = vmatmul.f32.vlgmr.msrb.gmra.mxu0 %v13797_v28  ;;  %4501 = vmatpush.msrb.mxu1 %v4500_v50  ;;  %v5879_v58 = vsel %vm13123_vm11, 1.0, %v13245_v62  ;;  %v4512_v50 = vand.u32 4294901760, %v4511_v33  ;;  %v13800_v28 = vld [vmem:[#allocation93_spill] sm:$0xff]  ;;  %v4523_v38 = vsub.f32 %v12056_v48, %v13801_v23  ;;  %v13804_v23 = vld [vmem:[#allocation94_spill] sm:$0xff] }
 0x296   : > { %4575 = vmatpush.msrb.mxu2 %v12020_v12  ;;  %4627 = vmatpush.msra.mxu0 %v13799_v3  ;;  %vm13127_vm7 = vcmp.eq.s32.totalorder %v13800_v28, %v10667_v25  ;;  %v4787_v18 = vand.u32 4294901760, %v4786_v30  ;;  %v5876_v27 = vsel %vm563_vm5, 1.0, %v13245_v62  ;;  %v13802_v3 = vand.u32 4294901760, %v11680_v59 }
 0x297   : > { %4776 = vmatpush.msra.mxu3 %v4775_v54  ;;  %4507 = vmatpush.msrb.mxu1 %v4506_v19  ;;  %v4518_v33 = vand.u32 4294901760, %v4517_v24  ;;  %v13803_v54 = vand.u32 4294901760, %v12068_v21  ;;  %v12151_v19 = vsub.f32 %v5879_v58, %v5879_v58  ;;  %vm557_vm11 = vcmp.eq.s32.totalorder %v13804_v23, %v10667_v25 }
 0x298   : > { %4578 = vmatpush.msrb.mxu2 %v12056_v48  ;;  %4631 = vmatpush.msra.mxu0 %v13802_v3  ;;  %v2917_v1 = vadd.f32 %v2916_v20, %v2878_v56  ;;  %v4793_v34 = vand.u32 4294901760, %v4792_v6  ;;  %v13805_v59 = vand.u32 4294901760, %v12081_v42  ;;  %v5873_v58 = vsel %vm13127_vm7, 1.0, %v13245_v62  ;;  %v2985_v3 = vpop.f32.mrf.mxu2  ;;  %v13807_v6 = vld [vmem:[#allocation95_spill] sm:$0xff] }
 0x299   : > { %v4798_v30 = vsub.f32 %v12068_v21, %v13803_v54  ;;  %4782 = vmatpush.msra.mxu3 %v4781_v31  ;;  %4513 = vmatpush.msrb.mxu1 %v4512_v50  ;;  %v13806_v56 = vand.u32 4294901760, %v11711_v4  ;;  %v12169_v31 = vsub.f32 %v5876_v27, %v5876_v27  ;;  %v13808_v54 = vld [vmem:[#allocation75_spill] sm:$0xff]  ;;  %v5870_v4 = vsel %vm557_vm11, 1.0, %v13245_v62 }
 0x29a   : > { %6432 = vmatpush.msk.msra.mxu2 %vm13124_vm4, %v13173_v47  ;;  %v4804_v24 = vsub.f32 %v12081_v42, %v13805_v59  ;;  %vm554_vm4 = vcmp.eq.s32.totalorder %v13807_v6, %v10667_v25  ;;  %v4524_v59 = vand.u32 4294901760, %v4523_v38  ;;  %v4810_v42 = vsub.f32 %v12101_v57, %v13128_v49  ;;  %v13809_v38 = vld [vmem:[#allocation96_spill] sm:$0xff] }
 0x29b   : > { %4635 = vmatpush.msra.mxu0 %v13806_v56  ;;  %4788 = vmatpush.msra.mxu3 %v4787_v18  ;;  %v4799_v50 = vand.u32 4294901760, %v4798_v30  ;;  %v13131_v18 = vand.u32 4294901760, %v12151_v19  ;;  %v12186_v27 = vsub.f32 %v5873_v58, %v5873_v58  ;;  %vm551_vm7 = vcmp.eq.s32.totalorder %v13809_v38, %v10667_v25  ;;  %v3022_v30 = vpop.f32.mrf.mxu3  ;;  %v13811_v58 = vld [vmem:[#allocation80_spill] sm:$0xff]  ;;  %v13891_v38 = vld [vmem:[#allocation101_spill] sm:$0xff] }
 0x29c   : > { %4581 = vmatmul.f32.vlgmr.msrb.gmra.mxu2 %v13808_v54  ;;  %4519 = vmatpush.msrb.mxu1 %v4518_v33  ;;  %v1460_v56 = vadd.f32 %v11461_v7, %v11910_v53  ;;  %v2986_v54 = vadd.f32 %v2985_v3, %v2917_v1  ;;  %v13810_v49 = vand.u32 4294901760, %v11737_v52  ;;  %v4805_v20 = vand.u32 4294901760, %v4804_v24  ;;  %v13813_v1 = vld [vmem:[#allocation97_spill] sm:$0xff]  ;;  %v13815_v52 = vld [vmem:[#allocation71_spill] sm:$0xff] }
 0x29d   : > { %6433 = vmatpush.msk.msra.mxu2 %vm13129_vm1, %v13173_v47  ;;  %4794 = vmatpush.msra.mxu3 %v4793_v34  ;;  %v5867_v33 = vsel %vm554_vm4, 1.0, %v13245_v62  ;;  %v13812_v7 = vand.u32 4294901760, %v12133_v35  ;;  %vm548_vm1 = vcmp.eq.s32.totalorder %v13813_v1, %v10667_v25  ;;  %v13814_v24 = vand.u32 4294901760, %v11745_v41  ;;  %v13816_v41 = vld [vmem:[#allocation98_spill] sm:$0xff] }
 0x29e   : > { %4639 = vmatpush.msra.mxu0 %v13810_v49  ;;  %4620 = vmatmul.f32.vlgmr.msrb.gmra.mxu3 %v13811_v58  ;;  %v12207_v49 = vsub.f32 %v5870_v4, %v5870_v4  ;;  %v1514_v34 = vadd.f32 %v11478_v39, %v1460_v56  ;;  %v4811_v3 = vand.u32 4294901760, %v4810_v42  ;;  %v5864_v58 = vsel %vm551_vm7, 1.0, %v13245_v62 }
 0x29f   : > { %6434 = vmatpush.msk.msra.mxu2 %vm13130_vm0, %v13173_v47  ;;  %v4816_v53 = vsub.f32 %v12133_v35, %v13812_v7  ;;  %4525 = vmatpush.msrb.mxu1 %v4524_v59  ;;  %v3063_v7 = vpop.f32.mrf.mxu0  ;;  %v4822_v4 = vsub.f32 %v12151_v19, %v13131_v18  ;;  %v4833_v39 = vand.u32 4294901760, %v12186_v27  ;;  %v12223_v59 = vsub.f32 %v5867_v33, %v5867_v33  ;;  %v3164_v33 = vpop.f32.mrf.mxu1 }
 0x2a0   : > { %4643 = vmatpush.msra.mxu0 %v13814_v24  ;;  %4800 = vmatpush.msra.mxu3 %v4799_v50  ;;  %vm545_vm0 = vcmp.eq.s32.totalorder %v13816_v41, %v10667_v25  ;;  %v1553_v42 = vadd.f32 %v11463_v17, %v1514_v34  ;;  %v3023_v56 = vadd.f32 %v3022_v30, %v2986_v54  ;;  %v5861_v50 = vsel %vm548_vm1, 1.0, %v13245_v62  ;;  %v3218_v60 = vpop.f32.mrf.mxu2 }
 0x2a1   : > { %4527 = vmatmul.f32.vlgmr.msrb.gmra.mxu1 %v13815_v52  ;;  %6435 = vmatpush.msk.msra.mxu2 %vm581_vm9, %v13173_v47  ;;  %v13817_v24 = vand.u32 4294901760, %v11785_v2  ;;  %v4817_v17 = vand.u32 4294901760, %v4816_v53  ;;  %v13818_v54 = vand.u32 4294901760, %v12169_v31  ;;  %v4839_v30 = vand.u32 4294901760, %v12207_v49 }
 0x2a2   : > { %6416 = vmatpush.msk.msra.mxu1 %vm542_vm13, %v13173_v47  ;;  %4806 = vmatpush.msra.mxu3 %v4805_v20  ;;  %v12246_v34 = vsub.f32 %v5864_v58, %v5864_v58  ;;  %v3064_v18 = vadd.f32 %v3063_v7, %v3023_v56  ;;  %v5858_v2 = vsel %vm545_vm0, 1.0, %v13245_v62  ;;  %v13819_v20 = vand.u32 4294901760, %v11797_v29 }
 0x2a3   : > { %4647 = vmatpush.msra.mxu0 %v13817_v24  ;;  %v4828_v63 = vsub.f32 %v12169_v31, %v13818_v54  ;;  %6436 = vmatpush.msk.msra.mxu2 %vm578_vm2, %v13173_v47  ;;  %v4823_v53 = vand.u32 4294901760, %v4822_v4  ;;  %v4834_v0 = vsub.f32 %v12186_v27, %v4833_v39  ;;  %v4845_v58 = vand.u32 4294901760, %v12223_v59 }
 0x2a4   : > { %6417 = vmatpush.msk.msra.mxu1 %vm539_vm3, %v13173_v47  ;;  %4812 = vmatpush.msra.mxu3 %v4811_v3  ;;  %v12266_v7 = vsub.f32 %v5861_v50, %v5861_v50  ;;  %v1622_v56 = vadd.f32 %v11490_v8, %v1553_v42  ;;  %v3165_v24 = vadd.f32 %v3164_v33, %v3064_v18  ;;  %v13820_v62 = vand.u32 4294901760, %v11820_v37 }
 0x2a5   : > { %4651 = vmatpush.msra.mxu0 %v13819_v20  ;;  %6437 = vmatpush.msk.msra.mxu2 %vm575_vm10, %v13173_v47  ;;  %v4829_v29 = vand.u32 4294901760, %v4828_v63  ;;  %v4840_v8 = vsub.f32 %v12207_v49, %v4839_v30  ;;  %v4851_v18 = vand.u32 4294901760, %v12246_v34  ;;  %v12283_v3 = vsub.f32 %v5858_v2, %v5858_v2  ;;  %v3257_v63 = vpop.f32.mrf.mxu3 }
 0x2a6   : > { %6418 = vmatpush.msk.msra.mxu1 %vm536_vm15, %v13173_v47  ;;  %4818 = vmatpush.msra.mxu3 %v4817_v17  ;;  %v13821_v37 = vand.u32 4294901760, %v11848_v5  ;;  %v4835_v4 = vand.u32 4294901760, %v4834_v0  ;;  %v4846_v42 = vsub.f32 %v12223_v59, %v4845_v58  ;;  %v4857_v50 = vand.u32 4294901760, %v12266_v7 }
 0x2a7   : > { %4655 = vmatpush.msra.mxu0 %v13820_v62  ;;  %6438 = vmatpush.msk.msra.mxu2 %vm572_vm8, %v13173_v47  ;;  %v1659_v33 = vadd.f32 %v11511_v43, %v1622_v56  ;;  %v3219_v26 = vadd.f32 %v3218_v60, %v3165_v24  ;;  %v13822_v5 = vand.u32 4294901760, %v11865_v11  ;;  %v4841_v17 = vand.u32 4294901760, %v4840_v8  ;;  %v3363_v62 = vpop.f32.mrf.mxu1 }
 0x2a8   : > { %6419 = vmatpush.msk.msra.mxu1 %vm533_vm14, %v13173_v47  ;;  %4824 = vmatpush.msra.mxu3 %v4823_v53  ;;  %v4852_v43 = vsub.f32 %v12246_v34, %v4851_v18  ;;  %v4863_v54 = vand.u32 4294901760, %v12283_v3  ;;  %vm13823_vm13 = vcmp.eq.s32.totalorder %v13757_v9, %v10667_v25  ;;  %vm13824_vm3 = vcmp.eq.s32.totalorder %v13793_v10, %v10667_v25  ;;  %v3326_v53 = vpop.f32.mrf.mxu0 }
 0x2a9   : > { %4659 = vmatpush.msra.mxu0 %v13821_v37  ;;  %6439 = vmatpush.msk.msra.mxu2 %vm569_vm12, %v13173_v47  ;;  %v1700_v16 = vadd.f32 %v11526_v13, %v1659_v33  ;;  %v13825_v11 = vand.u32 4294901760, %v11899_v45  ;;  %v4847_v2 = vand.u32 4294901760, %v4846_v42  ;;  %v4858_v20 = vsub.f32 %v12266_v7, %v4857_v50  ;;  %v13827_v45 = vld [vmem:[#allocation28_spill] sm:$0xff]  ;;  %v13834_v37 = vld [vmem:[#allocation66_spill] sm:$0xff] }
 0x2aa   : > { %6420 = vmatpush.msk.msra.mxu1 %vm530_vm6, %v13173_v47  ;;  %4830 = vmatpush.msra.mxu3 %v4829_v29  ;;  %vm13826_vm15 = vcmp.eq.s32.totalorder %v13758_v14, %v10667_v25  ;;  %v3258_v9 = vadd.f32 %v3257_v63, %v3219_v26  ;;  %v13828_v0 = vand.u32 4294901760, %v13827_v45  ;;  %v4853_v56 = vand.u32 4294901760, %v4852_v43  ;;  %v13829_v14 = vld [vmem:[#allocation65_spill] sm:$0xff]  ;;  %v13837_v26 = vld [vmem:[#allocation34_spill] sm:$0xff]  ;;  %v3404_v43 = vpop.f32.mrf.mxu2  ;;  %v13839_v63 = vld [vmem:[#allocation67_spill] sm:$0xff] }
 0x2ab   : > { %4663 = vmatpush.msra.mxu0 %v13822_v5  ;;  %6440 = vmatpush.msk.msra.mxu2 %vm13824_vm3, %v13173_v47  ;;  %v1801_v13 = vadd.f32 %v11513_v51, %v1700_v16  ;;  %v4864_v24 = vsub.f32 %v12283_v3, %v4863_v54  ;;  %vm13830_vm14 = vcmp.eq.s32.totalorder %v13829_v14, %v10667_v25  ;;  %v13832_v29 = vld [vmem:[#allocation29_spill] sm:$0xff]  ;;  %v4859_v60 = vand.u32 4294901760, %v4858_v20 }
 0x2ac   : > { %6421 = vmatpush.msk.msra.mxu1 %vm13823_vm13, %v13173_v47  ;;  %4836 = vmatpush.msra.mxu3 %v4835_v4  ;;  %vm13831_vm6 = vcmp.eq.s32.totalorder %v13800_v28, %v10667_v25  ;;  %v3327_v51 = vadd.f32 %v3326_v53, %v3258_v9  ;;  %v13833_v8 = vand.u32 4294901760, %v13832_v29  ;;  %vm13835_vm13 = vcmp.eq.s32.totalorder %v13834_v37, %v10667_v25  ;;  %v13836_v4 = vld [vmem:[#allocation102_spill] sm:$0xff]  ;;  %v13846_v9 = vld [vmem:[#allocation69_spill] sm:$0xff]  ;;  %v13854_v29 = vld [vmem:[#allocation35_spill] sm:$0xff] }
 0x2ad   : > { %4667 = vmatpush.msra.mxu0 %v13825_v11  ;;  %6441 = vmatpush.msk.msra.mxu2 %vm563_vm5, %v13173_v47  ;;  %v1855_v42 = vadd.f32 %v13836_v4, %v1801_v13  ;;  %v13838_v5 = vand.u32 4294901760, %v13837_v26  ;;  %vm13840_vm3 = vcmp.eq.s32.totalorder %v13839_v63, %v10667_v25  ;;  %v13841_v16 = vand.u32 4294901760, %v12020_v12  ;;  %v13842_v11 = vld [vmem:[#allocation68_spill] sm:$0xff]  ;;  %v3505_v12 = vpop.f32.mrf.mxu3  ;;  %v13848_v45 = vld [vmem:[#allocation21_spill] sm:$0xff]  ;;  %v13862_v26 = vld [vmem:[#allocation22_spill] sm:$0xff] }
 0x2ae   : > { %6422 = vmatpush.msk.msra.mxu1 %vm13826_vm15, %v13173_v47  ;;  %4842 = vmatpush.msra.mxu3 %v4841_v17  ;;  %v3364_v33 = vadd.f32 %v3363_v62, %v3327_v51  ;;  %v4865_v17 = vand.u32 4294901760, %v4864_v24  ;;  %vm13843_vm15 = vcmp.eq.s32.totalorder %v13842_v11, %v10667_v25  ;;  %v13845_v13 = vand.u32 4294901760, %v12056_v48  ;;  %v13851_v24 = vld [vmem:[#allocation70_spill] sm:$0xff]  ;;  %v13853_v62 = vld [vmem:[#allocation20_spill] sm:$0xff]  ;;  %v13857_v4 = vld [vmem:[#allocation73_spill] sm:$0xff] }
 0x2af   : > { %4671 = vmatpush.msra.mxu0 %v13828_v0  ;;  %6442 = vmatpush.msk.msra.mxu2 %vm13831_vm6, %v13173_v47  ;;  %vm13850_vm6 = vcmp.eq.s32.totalorder %v13766_v46, %v10667_v25  ;;  %v13864_v63 = vld [vmem:[#allocation76_spill] sm:$0xff]  ;;  %v13866_v11 = vld [vmem:[#allocation37_spill] sm:$0xff]  ;;  %v13884_v36 = vand.u32 4294901760, %v12151_v19  ;;  %v13887_v61 = vand.u32 4294901760, %v12169_v31 }
 0x2b0   : > { %6423 = vmatpush.msk.msra.mxu1 %vm13830_vm14, %v13173_v47  ;;  %4848 = vmatpush.msra.mxu3 %v4847_v2  ;;  %v13844_v2 = vld [vmem:[#allocation19_spill] sm:$0xff]  ;;  %v3405_v53 = vadd.f32 %v3404_v43, %v3364_v33  ;;  %vm13847_vm14 = vcmp.eq.s32.totalorder %v13846_v9, %v10667_v25  ;;  %v3559_v48 = vpop.f32.mrf.mxu0  ;;  %v13861_v33 = vld [vmem:[#allocation88_spill] sm:$0xff]  ;;  %v13863_v43 = vand.u32 4294901760, %v13854_v29 }
 0x2b1   : > { %4675 = vmatpush.msra.mxu0 %v13833_v8  ;;  %6443 = vmatpush.msk.msra.mxu2 %vm557_vm11, %v13173_v47  ;;  %v1894_v20 = vadd.f32 %v13844_v2, %v1855_v42  ;;  %v3598_v8 = vpop.f32.mrf.mxu1  ;;  %v13859_v42 = vld [vmem:[#allocation36_spill] sm:$0xff]  ;;  %v13867_v2 = vld [vmem:[#allocation99_spill] sm:$0xff] }
 0x2b2   : > { %6424 = vmatpush.msk.msra.mxu1 %vm13835_vm13, %v13173_v47  ;;  %4854 = vmatpush.msra.mxu3 %v4853_v56  ;;  %v13849_v56 = vld [vmem:[#allocation30_spill] sm:$0xff]  ;;  %vm13852_vm13 = vcmp.eq.s32.totalorder %v13851_v24, %v10667_v25  ;;  %v3506_v51 = vadd.f32 %v3505_v12, %v3405_v53  ;;  %v13869_v53 = vld [vmem:[#allocation79_spill] sm:$0xff] }
 0x2b3   : > { %4679 = vmatpush.msra.mxu0 %v13838_v5  ;;  %6444 = vmatpush.msk.msra.mxu2 %vm554_vm4, %v13173_v47  ;;  %v1963_v0 = vadd.f32 %v13848_v45, %v1894_v20  ;;  %v13868_v20 = vand.u32 4294901760, %v13859_v42  ;;  %v13875_v24 = vld [vmem:[#allocation38_spill] sm:$0xff] }
 0x2b4   : > { %6425 = vmatpush.msk.msra.mxu1 %vm13840_vm3, %v13173_v47  ;;  %4860 = vmatpush.msra.mxu3 %v4859_v60  ;;  %vm13855_vm3 = vcmp.eq.s32.totalorder %v13768_v22, %v10667_v25  ;;  %v13856_v60 = vand.u32 4294901760, %v13849_v56  ;;  %v3560_v37 = vadd.f32 %v3559_v48, %v3506_v51  ;;  %v13881_v51 = vld [vmem:[#allocation26_spill] sm:$0xff] }
 0x2b5   : > { %4683 = vmatpush.msra.mxu0 %v13841_v16  ;;  %6445 = vmatpush.msk.msra.mxu2 %vm551_vm7, %v13173_v47  ;;  %v2000_v14 = vadd.f32 %v13853_v62, %v1963_v0  ;;  %v3667_v16 = vpop.f32.mrf.mxu2  ;;  %v3704_v45 = vpop.f32.mrf.mxu3  ;;  %v13873_v0 = vand.u32 4294901760, %v13866_v11 }
 0x2b6   : > { %6426 = vmatpush.msk.msra.mxu1 %vm13843_vm15, %v13173_v47  ;;  %4866 = vmatpush.msra.mxu3 %v4865_v17  ;;  %vm13858_vm15 = vcmp.eq.s32.totalorder %v13857_v4, %v10667_v25  ;;  %v3599_v17 = vadd.f32 %v3598_v8, %v3560_v37  ;;  %v13885_v37 = vld [vmem:[#allocation27_spill] sm:$0xff] }
 0x2b7   : > { %4687 = vmatpush.msra.mxu0 %v13845_v13  ;;  %6446 = vmatpush.msk.msra.mxu2 %vm548_vm1, %v13173_v47  ;;  %v2041_v5 = vadd.f32 %v13862_v26, %v2000_v14  ;;  %v13871_v13 = vld [vmem:[#allocation23_spill] sm:$0xff] }
 0x2b8   : > { %4689 = vmatmul.f32.vlgmr.msra.gmra.mxu0 %v13815_v52  ;;  %6427 = vmatpush.msk.msra.mxu1 %vm13847_vm14, %v13173_v47  ;;  %vm13860_vm14 = vcmp.eq.s32.totalorder %v13771_v40, %v10667_v25  ;;  %v3668_v9 = vadd.f32 %v3667_v16, %v3599_v17  ;;  %v13880_v40 = vand.u32 4294901760, %v12101_v57 }
 0x2b9   : > { %4874 = vmatpush.msrb.mxu0 %v13849_v56  ;;  %6464 = vmatpush.msk.msrb.mxu3 %vm13850_vm6, %v13173_v47  ;;  %vm13865_vm6 = vcmp.eq.s32.totalorder %v13864_v63, %v10667_v25  ;;  %v2142_v12 = vadd.f32 %v13871_v13, %v2041_v5  ;;  %v13874_v56 = vld [vmem:[#allocation25_spill] sm:$0xff] }
 0x2ba   : > { %6428 = vmatpush.msk.msra.mxu1 %vm13852_vm13, %v13173_v47  ;;  %6447 = vmatpush.msk.msra.mxu2 %vm545_vm0, %v13173_v47  ;;  %vm13870_vm13 = vcmp.eq.s32.totalorder %v13869_v53, %v10667_v25  ;;  %v3705_v14 = vadd.f32 %v3704_v45, %v3668_v9 }
 0x2bb   : > { %4877 = vmatpush.msrb.mxu0 %v13854_v29  ;;  %6465 = vmatpush.msk.msrb.mxu3 %vm13855_vm3, %v13173_v47  ;;  %vm13872_vm3 = vcmp.eq.s32.totalorder %v13766_v46, %v10667_v25  ;;  %v2196_v48 = vadd.f32 %v13874_v56, %v2142_v12  ;;  %v13877_v46 = vand.u32 4294901760, %v12068_v21 }
 0x2bc   : > { %4968 = vmatpush.msrb.mxu2 %v13856_v60  ;;  %6429 = vmatpush.msk.msra.mxu1 %vm13858_vm15, %v13173_v47  ;;  %vm13876_vm15 = vcmp.eq.s32.totalorder %v13768_v22, %v10667_v25  ;;  %v13879_v22 = vand.u32 4294901760, %v13875_v24  ;;  %v12494_v8 = vand.u32 4294901760, %v3705_v14 }
 0x2bd   : > { %4880 = vmatpush.msrb.mxu0 %v13859_v42  ;;  %6466 = vmatpush.msk.msrb.mxu3 %vm13860_vm14, %v13173_v47 }
 0x2be   : > { %4767 = vmatmul.f32.vlgmr.msra.gmra.mxu2 %v13861_v33  ;;  %6430 = vmatpush.msk.msra.mxu1 %vm13865_vm6, %v13173_v47  ;;  %vm5072_vm6 = vcmask 64512   ;;  %v5264_v4 = vsub.f32 %v3705_v14, %v12494_v8 }
 0x2bf   : > { %4972 = vmatpush.msrb.mxu2 %v13863_v43  ;;  %4883 = vmatpush.msrb.mxu0 %v13866_v11 }
 0x2c0   : > { %6467 = vmatpush.msk.msrb.mxu3 %vm581_vm9, %v13173_v47  ;;  %6431 = vmatpush.msk.msra.mxu1 %vm13870_vm13, %v13173_v47  ;;  %vm13882_vm13 = vcmp.eq.s32.totalorder %v13793_v10, %v10667_v25 }
 0x2c1   : > { %4868 = vmatmul.f32.vlgmr.msra.gmra.mxu3 %v13867_v2  ;;  %4976 = vmatpush.msrb.mxu2 %v13868_v20 }
 0x2c2   : > { %4886 = vmatpush.msrb.mxu0 %v12068_v21  ;;  %6468 = vmatpush.msk.msrb.mxu3 %vm578_vm2, %v13173_v47  ;;  %v5071_v21 = vld [vmem:[%s6952_s1] sm:$0xff] }
 0x2c3   : > { %4726 = vmatmul.f32.vlgmr.msra.gmra.mxu1 %v13815_v52  ;;  %4980 = vmatpush.msrb.mxu2 %v13873_v0  ;;  %v13878_v52 = vld [vmem:[#allocation24_spill] sm:$0xff]  ;;  %v5074_v60 = vsel %vm5072_vm6, %v5071_v21, 0 }
 0x2c4   : > { %6448 = vmatpush.msk.msrb.mxu1 %vm13872_vm3, %v13173_v47  ;;  %4889 = vmatpush.msrb.mxu0 %v13875_v24  ;;  %v2235_v62 = vadd.f32 %v13878_v52, %v2196_v48  ;;  %v12518_v15 = vand.u32 4294901760, %v5074_v60 }
 0x2c5   : > { %6469 = vmatpush.msk.msrb.mxu3 %vm575_vm10, %v13173_v47  ;;  %4984 = vmatpush.msrb.mxu2 %v13877_v46 }
 0x2c6   : > { %6449 = vmatpush.msk.msrb.mxu1 %vm13876_vm15, %v13173_v47  ;;  %4892 = vmatpush.msrb.mxu0 %v12101_v57  ;;  %v2304_v29 = vadd.f32 %v13881_v51, %v2235_v62  ;;  %v13883_v57 = vand.u32 4294901760, %v12133_v35  ;;  %v12545_v32 = vsub.f32 %v5074_v60, %v12518_v15  ;;  %v5514_v51 = vld [vmem:[%s6934_s8] sm:$0x7] }
 0x2c7   : > { %6470 = vmatpush.msk.msrb.mxu3 %vm572_vm8, %v13173_v47  ;;  %4988 = vmatpush.msrb.mxu2 %v13879_v22 }
 0x2c8   : > { %6450 = vmatpush.msk.msrb.mxu1 %vm13860_vm14, %v13173_v47  ;;  %4895 = vmatpush.msrb.mxu0 %v12133_v35  ;;  %v2341_v35 = vadd.f32 %v13885_v37, %v2304_v29  ;;  %v12570_v44 = vand.u32 4294901760, %v12545_v32 }
 0x2c9   : > { %6471 = vmatpush.msk.msrb.mxu3 %vm569_vm12, %v13173_v47  ;;  %4992 = vmatpush.msrb.mxu2 %v13880_v40 }
 0x2ca   : > { %6451 = vmatpush.msk.msrb.mxu1 %vm581_vm9, %v13173_v47  ;;  %4898 = vmatpush.msrb.mxu0 %v12151_v19  ;;  %v5091_v19 = vand.u32 4294901760, %v2341_v35  ;;  %vm13888_vm9 = vmmov %vm13882_vm13 }
 0x2cb   : > { %6472 = vmatpush.msk.msrb.mxu3 %vm13882_vm13, %v13173_v47  ;;  %4996 = vmatpush.msrb.mxu2 %v13883_v57 }
 0x2cc   : > { %6452 = vmatpush.msk.msrb.mxu1 %vm578_vm2, %v13173_v47  ;;  %4901 = vmatpush.msrb.mxu0 %v12169_v31  ;;  %vm13886_vm2 = vcmp.eq.s32.totalorder %v13800_v28, %v10667_v25  ;;  %v5265_v31 = vand.u32 4294901760, %v5264_v4  ;;  %v5118_v10 = vsub.f32 %v2341_v35, %v5091_v19  ;;  %v5096_v28 = vsub.f32 %v12545_v32, %v12570_v44  ;;  %v3745_v25 = vpop.f32.mrf.mxu0 }
 0x2cd   : > { %6473 = vmatpush.msk.msrb.mxu3 %vm563_vm5, %v13173_v47  ;;  %5000 = vmatpush.msrb.mxu2 %v13884_v36 }
 0x2ce   : > { %6453 = vmatpush.msk.msrb.mxu1 %vm575_vm10, %v13173_v47  ;;  %4904 = vmatpush.msrb.mxu0 %v12186_v27  ;;  %v5266_v27 = vsub.f32 %v5264_v4, %v5265_v31  ;;  %vm13889_vm10 = vmmov %vm13886_vm2  ;;  %v12604_v23 = vand.u32 4294901760, %v5096_v28 }
 0x2cf   : > { %6474 = vmatpush.msk.msrb.mxu3 %vm13886_vm2, %v13173_v47  ;;  %5004 = vmatpush.msrb.mxu2 %v13887_v61 }
 0x2d0   : > { %6454 = vmatpush.msk.msrb.mxu1 %vm572_vm8, %v13173_v47  ;;  %4907 = vmatpush.msrb.mxu0 %v12207_v49  ;;  %v5119_v49 = vand.u32 4294901760, %v5118_v10 }
 0x2d1   : > { %6475 = vmatpush.msk.msrb.mxu3 %vm557_vm11, %v13173_v47  ;;  %5008 = vmatpush.msrb.mxu2 %v4833_v39  ;;  %v5267_v39 = vand.u32 4294901760, %v5266_v27 }
 0x2d2   : > { %6455 = vmatpush.msk.msrb.mxu1 %vm569_vm12, %v13173_v47  ;;  %4910 = vmatpush.msrb.mxu0 %v12223_v59  ;;  %v5120_v59 = vsub.f32 %v5118_v10, %v5119_v49 }
 0x2d3   : > { %6476 = vmatpush.msk.msrb.mxu3 %vm554_vm4, %v13173_v47  ;;  %5012 = vmatpush.msrb.mxu2 %v4839_v30 }
 0x2d4   : > { %6456 = vmatpush.msk.msrb.mxu1 %vm13888_vm9, %v13173_v47  ;;  %4913 = vmatpush.msrb.mxu0 %v12246_v34  ;;  %v5121_v6 = vand.u32 4294901760, %v5120_v59  ;;  %v3939_v34 = vpop.f32.mrf.mxu3 }
 0x2d5   : > { %6477 = vmatpush.msk.msrb.mxu3 %vm551_vm7, %v13173_v47  ;;  %5016 = vmatpush.msrb.mxu2 %v4845_v58 }
 0x2d6   : > { %6457 = vmatpush.msk.msrb.mxu1 %vm563_vm5, %v13173_v47  ;;  %4916 = vmatpush.msrb.mxu0 %v12266_v7 }
 0x2d7   : > { %6478 = vmatpush.msk.msrb.mxu3 %vm548_vm1, %v13173_v47  ;;  %5020 = vmatpush.msrb.mxu2 %v4851_v18  ;;  %v3900_v41 = vpop.f32.mrf.mxu2 }
 0x2d8   : > { %6458 = vmatpush.msk.msrb.mxu1 %vm13889_vm10, %v13173_v47  ;;  %4919 = vmatpush.msrb.mxu0 %v12283_v3 }
 0x2d9   : > { %6479 = vmatpush.msk.msrb.mxu3 %vm545_vm0, %v13173_v47  ;;  %4922 = vmatmul.f32.vlgmr.msrb.gmra.mxu0 %v13890_v55 }
 0x2da   : > { %6459 = vmatpush.msk.msrb.mxu1 %vm557_vm11, %v13173_v47  ;;  %5024 = vmatpush.msrb.mxu2 %v4857_v50 }
 0x2db   : > { %5067 = vmatmul.f32.vlgmr.msrb.gmra.mxu3 %v13867_v2  ;;  %5092 = vmatpush.msra.mxu0 %v5091_v19 }
 0x2dc   : > { %5168 = vmatpush.msra.mxu3 %v5091_v19  ;;  %6460 = vmatpush.msk.msrb.mxu1 %vm554_vm4, %v13173_v47  ;;  %v4008_v7 = vpop.f32.mrf.mxu0 }
 0x2dd   : > { %5194 = vmatpush.msrb.mxu0 %v5119_v49  ;;  %5028 = vmatpush.msrb.mxu2 %v4863_v54 }
 0x2de   : > { %5268 = vmatpush.msrb.mxu3 %v5267_v39  ;;  %5030 = vmatmul.f32.vlgmr.msrb.gmra.mxu2 %v13867_v2 }
 0x2df   : > { %5145 = vmatpush.msra.mxu2 %v5118_v10  ;;  %6461 = vmatpush.msk.msrb.mxu1 %vm551_vm7, %v13173_v47 }
 0x2e0   : > { %v4086_v54 = vpop.f32.mrf.mxu2 }
 0x2e1   : > { %5238 = vmatpush.msrb.mxu2 %v12494_v8  ;;  %6462 = vmatpush.msk.msrb.mxu1 %vm548_vm1, %v13173_v47 }
 0x2e2   : > { %5098 = vmatmul.f32.vlgmr.msra.gmra.mxu0 %v12604_v23 }
 0x2e3   : > { %5172 = vmatmul.f32.vlgmr.msra.gmra.mxu3 %v12570_v44  ;;  %5291 = vmatpush.msra.mxu0 %v5264_v4  ;;  %v4187_v33 = vpop.f32.mrf.mxu3 }
 0x2e4   : > { %6463 = vmatpush.msk.msrb.mxu1 %vm545_vm0, %v13173_v47  ;;  %5362 = vmatpush.msra.mxu3 %v12494_v8  ;;  %v3846_v47 = vpop.f32.mrf.mxu1 }
 0x2e5   : > { %4961 = vmatmul.f32.vlgmr.msrb.gmra.mxu1 %v13891_v38  ;;  %v3847_v1 = vadd.f32 %v3846_v47, %v3745_v25 }
 0x2e6   : > { %5122 = vmatpush.msra.mxu1 %v5121_v6  ;;  %5148 = vmatmul.f32.vlgmr.msra.gmra.mxu2 %v12545_v32 }
 0x2e7   : > { %5340 = vmatpush.msra.mxu2 %v5265_v31  ;;  %v3901_v30 = vadd.f32 %v3900_v41, %v3847_v1 }
 0x2e8   : > { %5216 = vmatpush.msrb.mxu1 %v5091_v19 }
 0x2e9   : > { %v3940_v58 = vadd.f32 %v3939_v34, %v3901_v30 }
 0x2ea   : > { %5196 = vmatmul.f32.vlgmr.msrb.gmra.mxu0 %v12518_v15 }
 0x2eb   : > { %5270 = vmatmul.f32.vlgmr.msrb.gmra.mxu3 %v12518_v15  ;;  %v4009_v18 = vadd.f32 %v4008_v7, %v3940_v58 }
 0x2ec   : > { %v4045_v3 = vpop.f32.mrf.mxu1 }
 0x2ed   : > { %5124 = vmatmul.f32.vlgmr.msra.gmra.mxu1 %v12518_v15  ;;  %v4046_v50 = vadd.f32 %v4045_v3, %v4009_v18 }
 0x2ee   : > { %5314 = vmatpush.msra.mxu1 %v12494_v8  ;;  %5244 = vmatmul.f32.vlgmr.msrb.gmra.mxu2 %v12604_v23  ;;  %v5515_v8 = vsub.f32 0.0, %v5514_v51 }
 0x2ef   : > { %v4087_v42 = vadd.f32 %v4086_v54, %v4046_v50 }
 0x2f0   : > { %v4241_v26 = vpop.f32.mrf.mxu0  ;;  %v5516_v36 = vmul.f32 1.442695, %v5515_v8 }
 0x2f1   : > { %v4188_v5 = vadd.f32 %v4187_v33, %v4087_v42 }
 0x2f2   : > { %5294 = vmatmul.f32.vlgmr.msra.gmra.mxu0 %v12545_v32  ;;  %6554 = vpow2.f32 %v5516_v36 }
 0x2f3   : > { %5364 = vmatmul.f32.vlgmr.msra.gmra.mxu3 %v12518_v15  ;;  %v4242_v43 = vadd.f32 %v4241_v26, %v4188_v5 }
 0x2f5   : > { %5218 = vmatmul.f32.vlgmr.msrb.gmra.mxu1 %v12518_v15 }
 0x2f6   : > { %5342 = vmatmul.f32.vlgmr.msra.gmra.mxu2 %v12518_v15 }
 0x2f8   : > { %v6555_v27 = vpop.eup %6554 }
 0x2f9   : > { %v5518_v49 = vadd.f32 1.0, %v6555_v27 }
 0x2fb   : > { %v4280_v17 = vpop.f32.mrf.mxu1  ;;  %6556 = vrcp.f32 %v5518_v49  ;;  %v5530_v50 = vand.u32 2147483648, %v5518_v49  ;;  %vm5524_vm0 = vweird.f32 %v5518_v49 }
 0x2fc   : > { %v4281_v63 = vadd.f32 %v4280_v17, %v4242_v43  ;;  %v4349_v16 = vpop.f32.mrf.mxu2 }
 0x2fd   : > { %5318 = vmatmul.f32.vlgmr.msra.gmra.mxu1 %v12570_v44  ;;  %v5531_v26 = vor.u32 1.1754944e-38, %v5530_v50 }
 0x2fe   : > { %v4350_v11 = vadd.f32 %v4349_v16, %v4281_v63 }
 0x2ff   : > { %v4386_v2 = vpop.f32.mrf.mxu3 }
 0x300   : > { %v4387_v53 = vadd.f32 %v4386_v2, %v4350_v11 }
 0x301   : > { %v6557_v30 = vpop.eup %6556 }
 0x302   : > { %v5520_v18 = vmul.f32 %v6557_v30, %v5518_v49  ;;  %vm5525_vm5 = vweird.f32 %v6557_v30 }
 0x303   : > { %vm5526_vm7 = vmor %vm5524_vm0, %vm5525_vm5 }
 0x312   : > { %v4427_v20 = vpop.f32.mrf.mxu0 }
 0x313   : > { %v4428_v12 = vadd.f32 %v4427_v20, %v4387_v53  ;;  %v13892_v20 = vld [vmem:[#allocation18_spill] sm:$0xff] }
 0x314   : > { %vm5534_vm12 = vcmp.eq.s32.totalorder %v13892_v20, 5 }
 0x31e   : > { %v4528_v13 = vpop.f32.mrf.mxu1 }
 0x31f   : > { %v4529_v9 = vadd.f32 %v4528_v13, %v4428_v12  ;;  %v4582_v45 = vpop.f32.mrf.mxu2 }
 0x321   : > { %v4621_v0 = vpop.f32.mrf.mxu3  ;;  %v4583_v56 = vadd.f32 %v4582_v45, %v4529_v9 }
 0x323   : > { %v4622_v24 = vadd.f32 %v4621_v0, %v4583_v56 }
 0x335   : > { %v4690_v48 = vpop.f32.mrf.mxu0 }
 0x336   : > { %v4691_v52 = vadd.f32 %v4690_v48, %v4622_v24 }
 0x340   : > { %v4727_v46 = vpop.f32.mrf.mxu1 }
 0x341   : > { %v4728_v14 = vadd.f32 %v4727_v46, %v4691_v52  ;;  %v4768_v21 = vpop.f32.mrf.mxu2 }
 0x343   : > { %v4769_v40 = vadd.f32 %v4768_v21, %v4728_v14 }
 0x344   : > { %v4869_v62 = vpop.f32.mrf.mxu3 }
 0x345   : > { %v4870_v60 = vadd.f32 %v4869_v62, %v4769_v40 }
 0x356   : > { %v4923_v22 = vpop.f32.mrf.mxu0 }
 0x357   : > { %v4924_v37 = vadd.f32 %v4923_v22, %v4870_v60 }
 0x35e   : > { %v5068_v29 = vpop.f32.mrf.mxu3 }
 0x35f   : > { %v5099_v57 = vpop.f32.mrf.mxu0 }
 0x361   : > { %v5031_v4 = vpop.f32.mrf.mxu2 }
 0x362   : > { %v4962_v35 = vpop.f32.mrf.mxu1 }
 0x363   : > { %v4963_v61 = vadd.f32 %v4962_v35, %v4924_v37 }
 0x365   : > { %v5032_v19 = vadd.f32 %v5031_v4, %v4963_v61 }
 0x366   : > { %v5173_v31 = vpop.f32.mrf.mxu3 }
 0x367   : > { %v5069_v10 = vadd.f32 %v5068_v29, %v5032_v19  ;;  %v5197_v28 = vpop.f32.mrf.mxu0 }
 0x369   : > { %v5383_v55 = vand.u32 4294901760, %v5069_v10  ;;  %v5149_v59 = vpop.f32.mrf.mxu2 }
 0x36a   : > { %v5125_v39 = vpop.f32.mrf.mxu1 }
 0x36b   : > { %v5410_v6 = vsub.f32 %v5069_v10, %v5383_v55  ;;  %5384 = vmatpush.msrb.mxu0 %v5383_v55  ;;  %5460 = vmatpush.msrb.mxu3 %v5383_v55  ;;  %v5126_v38 = vadd.f32 %v5125_v39, %v5099_v57 }
 0x36c   : > { %5390 = vmatmul.f32.vlgmr.msrb.gmra.mxu0 %v12604_v23  ;;  %5464 = vmatmul.f32.vlgmr.msrb.gmra.mxu3 %v12570_v44  ;;  %v5521_v44 = vsub.f32 1.0, %v5520_v18 }
 0x36d   : > { %v5411_v47 = vand.u32 4294901760, %v5410_v6  ;;  %5437 = vmatpush.msrb.mxu2 %v5410_v6  ;;  %v5150_v25 = vadd.f32 %v5149_v59, %v5126_v38 }
 0x36e   : > { %5440 = vmatmul.f32.vlgmr.msrb.gmra.mxu2 %v12545_v32  ;;  %v5271_v41 = vpop.f32.mrf.mxu3  ;;  %v5528_v32 = vand.u32 2147483647, %v5518_v49  ;;  %v5522_v33 = vmul.f32 %v6557_v30, %v5521_v44 }
 0x36f   : > { %v5412_v1 = vsub.f32 %v5410_v6, %v5411_v47  ;;  %5486 = vmatpush.msra.mxu0 %v5411_v47  ;;  %v5174_v58 = vadd.f32 %v5173_v31, %v5150_v25  ;;  %v5295_v54 = vpop.f32.mrf.mxu0 }
 0x370   : > { %v5523_v17 = vadd.f32 %v6557_v30, %v5522_v33  ;;  %vm5529_vm8 = vcmp.eq.f32.partialorder %v5528_v32, 8.507059e+37 }
 0x371   : > { %v5413_v34 = vand.u32 4294901760, %v5412_v1  ;;  %v5245_v3 = vpop.f32.mrf.mxu2  ;;  %v5198_v42 = vadd.f32 %v5197_v28, %v5174_v58 }
 0x372   : > { %v5219_v7 = vpop.f32.mrf.mxu1  ;;  %v5272_v23 = vadd.f32 %v5271_v41, %v5245_v3  ;;  %v5527_v63 = vsel %vm5526_vm7, %v6557_v30, %v5523_v17 }
 0x373   : > { %5414 = vmatpush.msrb.mxu1 %v5413_v34  ;;  %v5220_v43 = vadd.f32 %v5219_v7, %v5198_v42  ;;  %v5532_v2 = vsel %vm5529_vm8, %v5531_v26, %v5527_v63 }
 0x374   : > { %5488 = vmatmul.f32.vlgmr.msra.gmra.mxu0 %v12518_v15  ;;  %5416 = vmatmul.f32.vlgmr.msrb.gmra.mxu1 %v12518_v15  ;;  %v5296_v5 = vadd.f32 %v5295_v54, %v5272_v23  ;;  %v5536_v13 = vperm.slane %v5532_v2, 0  ;;  %v5537_v45 = vperm.slane %v5532_v2, 1  ;;  %v5538_v51 = vperm.slane %v5532_v2, 2 }
 0x375   : > { %5508 = vmatpush.msra.mxu1 %v5383_v55 }
 0x376   : > { %v5365_v12 = vpop.f32.mrf.mxu3  ;;  %v5542_v0 = vsel %vm5534_vm12, %v5536_v13, %v5220_v43 }
 0x377   : > { %5545 = vst [vmem:[%s329_s10] sm:$0xff] %v5542_v0 }
 0x379   : > { %v5343_v11 = vpop.f32.mrf.mxu2 }
 0x37a   : > { %v5319_v16 = vpop.f32.mrf.mxu1 }
 0x37b   : > { %v5320_v53 = vadd.f32 %v5319_v16, %v5296_v5 }
 0x37c   : > { %5510 = vmatmul.f32.vlgmr.msra.gmra.mxu1 %v12518_v15 }
 0x37d   : > { %v5344_v9 = vadd.f32 %v5343_v11, %v5320_v53 }
 0x37f   : > { %v5366_v56 = vadd.f32 %v5365_v12, %v5344_v9 }
 0x381   : > { %v5543_v48 = vsel %vm5534_vm12, %v5537_v45, %v5366_v56 }
 0x382   : > { %5546 = vst [vmem:[%s329_s10 + $0x8] sm:$0xff] %v5543_v48 }
 0x3e9   : > { %v5391_v24 = vpop.f32.mrf.mxu0 }
 0x3ef   : > { %v5465_v14 = vpop.f32.mrf.mxu3 }
 0x3f1   : > { %v5417_v46 = vpop.f32.mrf.mxu1  ;;  %v5441_v52 = vpop.f32.mrf.mxu2 }
 0x3f2   : > { %v5418_v62 = vadd.f32 %v5417_v46, %v5391_v24  ;;  %v5489_v22 = vpop.f32.mrf.mxu0 }
 0x3f4   : > { %v5442_v15 = vadd.f32 %v5441_v52, %v5418_v62 }
 0x3f6   : > { %v5466_v21 = vadd.f32 %v5465_v14, %v5442_v15 }
 0x3f8   : > { %v5490_v40 = vadd.f32 %v5489_v22, %v5466_v21 }
 0x3f9   : > { %v5511_v29 = vpop.f32.mrf.mxu1 }
 0x3fa   : > { %v5512_v8 = vadd.f32 %v5511_v29, %v5490_v40 }
 0x3fc   : > { %v5544_v60 = vsel %vm5534_vm12, %v5538_v51, %v5512_v8 }
 0x3fd   : > { %5547 = vst [vmem:[%s329_s10 + $0x10] sm:$0xff] %v5544_v60 }
 0x3fe   : > { %6707 = shalt.err (!%p6704_p7)
}
 0x3ff   : > { %6499 = dma.vmem_to_hbm [thread:$0]  (%p6829_p11), %s5563_s12, 384, %s5565_s7, %s5549_s19  }
 0x400 PF: > { %s5576_s28 = sand.u32 1, %s6742_s15   ;;  %p6515_p0 = pnand %p5703_p9, %p6833_p12 }
 0x401   : > { %s5577_s22 = scalar_lea.sflag [#allocation4], %s5576_s28 }
 0x402   : > { %p6516_p8 = pneg %p6515_p0 }
 0x404   : > { %6737 = dma.done.wait (%p6516_p8), %s5577_s22, 384  }
 0x405   : > { %6739 = vsyncadd (%p6516_p8), %s5577_s22, 4294966912  ;;  %s13893_s18 = sld [smem:[#allocation16_spill]]  ;;  %s13896_s15 = smov %s6746_s16 }
 0x406   : > { %s13894_s30 = sld [smem:[#allocation15_spill]] }
 0x407   : > { %s13895_s17 = sld [smem:[#allocation17_spill]] }
 0x40b   : > { %p23_p10 = scmp.ge.s32.totalorder %s13893_s18, 4  }
 0x40c   : > { %s13897_s16 = smov %s13894_s30 }
 0x40d   :  { %25 = sbr.rel (!%p23_p10) target bundleno = 11 (0xb), region = 118 }
 0x412   :  { %5583 = vsyncpa [#allocation3], 1 }
 0x413   :  { %5585 = vsyncpa [#allocation3 + $0x1], 1 }
 0x414   :  { %5586 = vsyncpa [#allocation6], 1 }
 0x415   :  { %5588 = vsyncpa [#allocation6 + $0x1], 1 }
 0x416   :  { %5589 = vsyncpa [#allocation9], 1 }
 0x417   :  { %5591 = vsyncpa [#allocation9 + $0x1], 1 }
 0x418   :  { %5592 = vsyncpa [#allocation4], 1 }
 0x419   :  { %5594 = vsyncpa [#allocation4 + $0x1], 1 }

</bundles_post_ra>
